<compile_context>
chip_gen: v7x
topology: tpu7x:2x2x1
jax: 0.10.0
libtpu: 0.0.40
codegen_flags: <defaults>
</compile_context>

<pallas_src>
import jax
import jax.numpy as jnp
from jax.experimental import pallas as pl
from jax.experimental.pallas import tpu as pltpu

L = 98                 # spatial length, so that 64 * (L // 2) == 64 * 49
P = L // 2             # 49 pooled positions
CONV_C = 64            # conv output channels
KSIZE = 3              # conv kernel size
FLAT = CONV_C * P      # 3136 flattened features (PyTorch flatten order c*49+p)
FLAT_PAD = 3200        # 25 * 128 — lane-aligned width of each conv half
K_IN = L + 2 + 1       # zero-padded input (100) + ones column for folded bias
K_PAD = 104            # K_IN rounded up to a multiple of 8
N_PAD = 128            # lane-dense padded FC output width


def _round_up(x, m):
    return (x + m - 1) // m * m


def _fused_kernel(x_ref, be_ref, bo_ref, w2_ref, fbias_ref, out_ref):
    """Fused Conv1d(1->64, k=3, pad=1) + bias + ReLU + MaxPool1d(2) + Linear.

    x_ref    : (TB, K_PAD)         padded input rows (col 100 = 1.0 bias tap)
    be_ref   : (K_PAD, FLAT_PAD)   banded conv weight, EVEN output positions
                                   (col = c*49 + p; bias folded into row 100)
    bo_ref   : (K_PAD, FLAT_PAD)   same, ODD output positions
    w2_ref   : (FLAT_PAD, N_PAD)   fc weight (transposed, zero-padded)
    fbias_ref: (1, N_PAD)          fc bias (zero-padded)
    out_ref  : (TB, N_PAD)         output block (cols >= O are zero)
    """
    x = x_ref[...]
    # Conv (+ folded bias) as two lane-dense MXU matmuls, then ReLU.
    he = jnp.maximum(jnp.dot(x, be_ref[...], preferred_element_type=jnp.float32), 0.0)
    ho = jnp.maximum(jnp.dot(x, bo_ref[...], preferred_element_type=jnp.float32), 0.0)
    # MaxPool1d(2): aligned elementwise max of the even/odd halves
    # (relu(max(a,b)) == max(relu(a), relu(b)), so order is equivalent).
    pooled = jnp.maximum(he, ho)                       # (TB, FLAT_PAD)
    # Fully connected layer (lane-dense 128-wide output).
    out_ref[...] = (
        jnp.dot(pooled, w2_ref[...], preferred_element_type=jnp.float32)
        + fbias_ref[...]
    )


def prepare_params(conv_w, conv_b, fc_w, fc_b):
    """One-time weight preprocessing (hoisted out of the per-call path)."""
    O = fc_w.shape[0]
    assert fc_w.shape == (O, FLAT)
    assert conv_w.shape == (CONV_C, 1, KSIZE)
    taps = conv_w[:, 0, :].astype(jnp.float32)          # (64, 3)
    cb = conv_b.astype(jnp.float32)                     # (64,)

    def make_half(h):
        # band[j, c*49 + p] = conv_w[c, 0, j - (2p + h)] when the tap is valid.
        j = jnp.arange(L + 2).reshape(L + 2, 1, 1)      # padded-input index
        c = jnp.arange(CONV_C).reshape(1, CONV_C, 1)
        p = jnp.arange(P).reshape(1, 1, P)
        l = 2 * p + h                                   # conv output position
        k = j - l                                       # tap index
        valid = (k >= 0) & (k < KSIZE)
        band = jnp.where(valid, taps[c, jnp.clip(k, 0, KSIZE - 1)], 0.0)
        band = band.reshape(L + 2, FLAT)                # col order = c*49 + p
        # Folded conv bias: row L+2 multiplies the ones column of the input.
        bias_row = jnp.repeat(cb, P).reshape(1, FLAT)
        band = jnp.concatenate([band, bias_row], axis=0)          # (101, 3136)
        band = jnp.pad(band, ((0, K_PAD - K_IN), (0, FLAT_PAD - FLAT)))
        return band                                               # (104, 3200)

    band_even = make_half(0)
    band_odd = make_half(1)

    # FC weight transposed to (FLAT, O), zero-padded to (FLAT_PAD, 128).
    w2 = jnp.zeros((FLAT_PAD, N_PAD), jnp.float32)
    w2 = w2.at[:FLAT, :O].set(fc_w.T.astype(jnp.float32))
    fbias = jnp.zeros((1, N_PAD), jnp.float32).at[0, :O].set(fc_b.astype(jnp.float32))
    return band_even, band_odd, w2, fbias, O


def net_forward(x, params, *, batch_tile=256):
    """Forward pass matching the PyTorch Net.

    x      : (B, 1, L) float32 (NCL, same as PyTorch Conv1d input)
    params : output of prepare_params(conv_w, conv_b, fc_w, fc_b)
    returns: (B, O)

    batch_tile: max rows per grid step (256 good for v6e/v7x, 128 for v5e).
    """
    band_even, band_odd, w2, fbias, O = params
    B = x.shape[0]
    assert x.shape[1] == 1 and x.shape[2] == L

    # Adaptive tiling: minimize padding waste, and use >= 2 grid steps when
    # the batch is big enough so both v7x TensorCores get work.
    B8 = _round_up(B, 8)
    g = -(-B8 // batch_tile)                  # ceil
    if B8 >= 16:
        g = max(g, 2)
    TB = _round_up(-(-B8 // g), 8)            # rows per grid step (multiple of 8)
    B_pad = g * TB

    # Input layout: [0 | x_0..x_97 | 0 | 1 | 0 0 0]  (conv zero-pad, bias tap, align pad)
    x2 = x[:, 0, :].astype(jnp.float32)
    xp = jnp.concatenate(
        [
            jnp.zeros((B, 1), jnp.float32),
            x2,
            jnp.zeros((B, 1), jnp.float32),
            jnp.ones((B, 1), jnp.float32),
            jnp.zeros((B, K_PAD - K_IN), jnp.float32),
        ],
        axis=1,
    )                                                       # (B, K_PAD)
    xp = jnp.pad(xp, ((0, B_pad - B), (0, 0)))              # (B_pad, K_PAD)

    cost = pl.CostEstimate(
        flops=2 * B_pad * K_PAD * (2 * FLAT_PAD) + 2 * B_pad * FLAT_PAD * N_PAD,
        transcendentals=0,
        bytes_accessed=4 * (xp.size + band_even.size + band_odd.size
                            + w2.size + fbias.size + B_pad * N_PAD),
    )

    out = pl.pallas_call(
        _fused_kernel,
        out_shape=jax.ShapeDtypeStruct((B_pad, N_PAD), jnp.float32),
        grid_spec=pltpu.PrefetchScalarGridSpec(
            num_scalar_prefetch=0,
            grid=(g,),
            in_specs=[
                pl.BlockSpec((TB, K_PAD), lambda i: (i, 0)),            # x tile
                pl.BlockSpec((K_PAD, FLAT_PAD), lambda i: (0, 0)),      # band even (resident)
                pl.BlockSpec((K_PAD, FLAT_PAD), lambda i: (0, 0)),      # band odd  (resident)
                pl.BlockSpec((FLAT_PAD, N_PAD), lambda i: (0, 0)),      # fc weight (resident)
                pl.BlockSpec((1, N_PAD), lambda i: (0, 0)),             # fc bias   (resident)
            ],
            out_specs=pl.BlockSpec((TB, N_PAD), lambda i: (i, 0)),
        ),
        compiler_params=pltpu.CompilerParams(
            dimension_semantics=("parallel",),
            vmem_limit_bytes=48 * 1024 * 1024,
        ),
        cost_estimate=cost,
    )(xp, band_even, band_odd, w2, fbias)

    return out[:B, :O]


def _reference_forward(x, conv_w, conv_b, fc_w, fc_b):
    """Pure-JAX reference mirroring the PyTorch ops (for verification)."""
    y = jax.lax.conv_general_dilated(
        x, conv_w,
        window_strides=(1,),
        padding=[(1, 1)],
        dimension_numbers=("NCH", "OIH", "NCH"),
    ) + conv_b[None, :, None]                      # (B, 64, L)
    y = jnp.maximum(y, 0.0)
    y = jnp.maximum(y[:, :, 0::2], y[:, :, 1::2])  # MaxPool1d(2) -> (B, 64, 49)
    flat = y.reshape(y.shape[0], -1)               # PyTorch Flatten: (B, 64*49)
    return flat @ fc_w.T + fc_b[None, :]


if __name__ == "__main__":
    B = 2
    OUTPUT_SIZE = 10

    key = jax.random.PRNGKey(0)
    kx, kw1, kb1, kw2, kb2 = jax.random.split(key, 5)

    x = jax.random.normal(kx, (B, 1, L), dtype=jnp.float32)
    conv_w = jax.random.normal(kw1, (CONV_C, 1, KSIZE), dtype=jnp.float32) * 0.1
    conv_b = jax.random.normal(kb1, (CONV_C,), dtype=jnp.float32) * 0.1
    fc_w = jax.random.normal(kw2, (OUTPUT_SIZE, FLAT), dtype=jnp.float32) * 0.02
    fc_b = jax.random.normal(kb2, (OUTPUT_SIZE,), dtype=jnp.float32) * 0.1

    params = prepare_params(conv_w, conv_b, fc_w, fc_b)   # hoisted, reuse across calls
    out = net_forward(x, params)
    out = jax.block_until_ready(out)

    ref = _reference_forward(x, conv_w, conv_b, fc_w, fc_b)
    assert out.shape == (B, OUTPUT_SIZE)
    assert jnp.allclose(out, ref, atol=1e-3, rtol=1e-3), "mismatch vs reference"

    print("KERNEL_OK")
</pallas_src>

<mosaic_0001>
module attributes {stable_mosaic.version = 11 : i64} {
  func.func @_fused_kernel(%arg0: i32, %arg1: memref<8x104xf32, #tpu.memory_space<vmem>>, %arg2: memref<104x3200xf32, #tpu.memory_space<vmem>>, %arg3: memref<104x3200xf32, #tpu.memory_space<vmem>>, %arg4: memref<3200x128xf32, #tpu.memory_space<vmem>>, %arg5: memref<1x128xf32, #tpu.memory_space<vmem>>, %arg6: memref<8x128xf32, #tpu.memory_space<vmem>>) attributes {dimension_semantics = [#tpu.dimension_semantics<parallel>], iteration_bounds = array<i64: 1>, scalar_prefetch = 0 : i64, scratch_operands = 0 : i64, tpu.core_type = #tpu.core_type<tc>, window_params = [{transform_indices = @transform_0, window_bounds = array<i64: 8, 104>}, {pipeline_mode = #tpu.pipeline_mode<synchronous>, transform_indices = @transform_1, window_bounds = array<i64: 104, 3200>}, {pipeline_mode = #tpu.pipeline_mode<synchronous>, transform_indices = @transform_2, window_bounds = array<i64: 104, 3200>}, {pipeline_mode = #tpu.pipeline_mode<synchronous>, transform_indices = @transform_3, window_bounds = array<i64: 3200, 128>}, {pipeline_mode = #tpu.pipeline_mode<synchronous>, transform_indices = @transform_4, window_bounds = array<i64: 1, 128>}, {transform_indices = @transform_5, window_bounds = array<i64: 8, 128>}]} {
    %c0 = arith.constant 0 : index
    %c0_0 = arith.constant 0 : index
    %0 = vector.load %arg1[%c0, %c0_0] : memref<8x104xf32, #tpu.memory_space<vmem>>, vector<8x104xf32>
    %c0_1 = arith.constant 0 : index
    %c0_2 = arith.constant 0 : index
    %1 = vector.load %arg2[%c0_1, %c0_2] : memref<104x3200xf32, #tpu.memory_space<vmem>>, vector<104x3200xf32>
    %cst = arith.constant dense<0.000000e+00> : vector<8x3200xf32>
    %2 = tpu.matmul %0, %1, %cst {dimension_numbers = #tpu.dot_dimension_numbers<[1], [0], [0], [1], [0, 0, 1, 1], [], []>} : vector<8x104xf32>, vector<104x3200xf32>, vector<8x3200xf32> -> vector<8x3200xf32>
    %cst_3 = arith.constant 0.000000e+00 : f32
    %3 = vector.broadcast %cst_3 : f32 to vector<8x3200xf32>
    %4 = arith.maximumf %2, %3 : vector<8x3200xf32>
    %c0_4 = arith.constant 0 : index
    %c0_5 = arith.constant 0 : index
    %5 = vector.load %arg3[%c0_4, %c0_5] : memref<104x3200xf32, #tpu.memory_space<vmem>>, vector<104x3200xf32>
    %cst_6 = arith.constant dense<0.000000e+00> : vector<8x3200xf32>
    %6 = tpu.matmul %0, %5, %cst_6 {dimension_numbers = #tpu.dot_dimension_numbers<[1], [0], [0], [1], [0, 0, 1, 1], [], []>} : vector<8x104xf32>, vector<104x3200xf32>, vector<8x3200xf32> -> vector<8x3200xf32>
    %cst_7 = arith.constant 0.000000e+00 : f32
    %7 = vector.broadcast %cst_7 : f32 to vector<8x3200xf32>
    %8 = arith.maximumf %6, %7 : vector<8x3200xf32>
    %9 = arith.maximumf %4, %8 : vector<8x3200xf32>
    %c0_8 = arith.constant 0 : index
    %c0_9 = arith.constant 0 : index
    %10 = vector.load %arg4[%c0_8, %c0_9] : memref<3200x128xf32, #tpu.memory_space<vmem>>, vector<3200x128xf32>
    %cst_10 = arith.constant dense<0.000000e+00> : vector<8x128xf32>
    %11 = tpu.matmul %9, %10, %cst_10 {dimension_numbers = #tpu.dot_dimension_numbers<[1], [0], [0], [1], [0, 0, 1, 1], [], []>} : vector<8x3200xf32>, vector<3200x128xf32>, vector<8x128xf32> -> vector<8x128xf32>
    %c0_11 = arith.constant 0 : index
    %c0_12 = arith.constant 0 : index
    %12 = vector.load %arg5[%c0_11, %c0_12] : memref<1x128xf32, #tpu.memory_space<vmem>>, vector<1x128xf32>
    %13 = vector.broadcast %12 : vector<1x128xf32> to vector<8x128xf32>
    %14 = arith.addf %11, %13 : vector<8x128xf32>
    %c0_13 = arith.constant 0 : index
    %c0_14 = arith.constant 0 : index
    %15 = vector.load %arg6[%c0_13, %c0_14] : memref<8x128xf32, #tpu.memory_space<vmem>>, vector<8x128xf32>
    tpu.vector_store %arg6[%c0_13, %c0_14], %14 {strides = array<i32>} : memref<8x128xf32, #tpu.memory_space<vmem>>, vector<8x128xf32>,
    return
  }
  func.func @transform_0(%arg0: i32) -> (i32, i32) {
    %c0_i32 = arith.constant 0 : i32
    %c0_i32_0 = arith.constant 0 : i32
    return %arg0, %c0_i32 : i32, i32
  }
  func.func @transform_1(%arg0: i32) -> (i32, i32) {
    %c0_i32 = arith.constant 0 : i32
    %c0_i32_0 = arith.constant 0 : i32
    %c0_i32_1 = arith.constant 0 : i32
    return %c0_i32, %c0_i32_0 : i32, i32
  }
  func.func @transform_2(%arg0: i32) -> (i32, i32) {
    %c0_i32 = arith.constant 0 : i32
    %c0_i32_0 = arith.constant 0 : i32
    %c0_i32_1 = arith.constant 0 : i32
    return %c0_i32, %c0_i32_0 : i32, i32
  }
  func.func @transform_3(%arg0: i32) -> (i32, i32) {
    %c0_i32 = arith.constant 0 : i32
    %c0_i32_0 = arith.constant 0 : i32
    %c0_i32_1 = arith.constant 0 : i32
    return %c0_i32, %c0_i32_0 : i32, i32
  }
  func.func @transform_4(%arg0: i32) -> (i32, i32) {
    %c0_i32 = arith.constant 0 : i32
    %c0_i32_0 = arith.constant 0 : i32
    %c0_i32_1 = arith.constant 0 : i32
    return %c0_i32, %c0_i32_0 : i32, i32
  }
  func.func @transform_5(%arg0: i32) -> (i32, i32) {
    %c0_i32 = arith.constant 0 : i32
    %c0_i32_0 = arith.constant 0 : i32
    return %arg0, %c0_i32 : i32, i32
  }
}

</mosaic_0001>

<bundles_post_ra>
// kernel: tpu_custom_call.1
= control target key start
LH: loop header
LB: loop body
LE: loop exit
PB: predicated region body
PF: predicated region fallthrough
CT: control target
= control target key end

     0   :  { %10 = vsyncpa [#allocation3], 0  ;;  %s6091_s0 = inlined_call_operand.hbm [shape: f32[8,104], index: 0, kind: input, shape index: {}]   ;;  %s6092_s1 = inlined_call_operand.hbm [shape: f32[104,3200], index: 1, kind: input, shape index: {}]   ;;  %s6093_s2 = inlined_call_operand.hbm [shape: f32[104,3200], index: 2, kind: input, shape index: {}]   ;;  %s6094_s3 = inlined_call_operand.hbm [shape: f32[3200,128], index: 3, kind: input, shape index: {}]   ;;  %s6095_s4 = inlined_call_operand.hbm [shape: f32[1,128], index: 4, kind: input, shape index: {}]   ;;  %s6096_s5 = inlined_call_operand.hbm [shape: f32[8,128], index: 5, kind: output, shape index: {}]  }
   0x1   :  { %11 = vsyncpa [#allocation6], 0 }
   0x2   :  { %12 = vsyncpa [#allocation9], 0 }
   0x3   :  { %13 = vsyncpa [#allocation4], 0  ;;  %s5754_s18 = smov [#allocation5]   ;;  %s5614_s22 = scalar_lea.hbm %s6092_s1, 41600 }
   0x4   :  { %s29_s19 = sshll.u32 %s5754_s18, 4  ;;  %p5615_p0 = scmp.ne.s32.totalorder %s6092_s1, %s5614_s22  ;;  %s30_s19 = int_to_ptr.vmem [resolvable:$true] %s29_s19 }
   0x5   :  { %p5618_p1 = scmp.lt.u32.totalorder %s5614_s22, %s6092_s1 }
   0x7   :  { %p5620_p2 = pnand %p5618_p1, %p5615_p0 }
   0x9   :  { %5623 = shalt.err (!%p5620_p2)
}
   0xa   :  { %s5624_s27 = scalar_lea.vmem %s30_s19, 41600  ;;  %p5629_p4 = scmp.lt.s32.totalorder %s30_s19, %s30_s19 }
   0xb   :  { %p5625_p3 = scmp.ne.s32.totalorder %s30_s19, %s5624_s27  ;;  %p5630_p5 = scmp.lt.s32.totalorder %s5624_s27, %s5624_s27 }
   0xd   :  { %p5631_p6 = por %p5630_p5, %p5629_p4 }
   0xf   :  { %p5632_p7 = pnand %p5631_p6, %p5625_p3 }
  0x11   :  { %5635 = shalt.err (!%p5632_p7)
}
  0x12   :  { %s5755_s28 = smov 3200   ;;  %s5756_s29 = smov 200  }
  0x13   :  { %35 = dma.hbm_to_vmem [thread:$0]  %s6092_s1, 41600, %s30_s19, [#allocation6], %s5755_s28, %s5755_s28, %s5756_s29  }
  0x14   :  { %s5757_s7 = smov [#allocation8]   ;;  %s5636_s11 = scalar_lea.hbm %s6094_s3, 51200 }
  0x15   :  { %s53_s8 = sshll.u32 %s5757_s7, 4  ;;  %p5637_p8 = scmp.ne.s32.totalorder %s6094_s3, %s5636_s11  ;;  %s54_s8 = int_to_ptr.vmem [resolvable:$true] %s53_s8 }
  0x16   :  { %p5640_p9 = scmp.lt.u32.totalorder %s5636_s11, %s6094_s3 }
  0x18   :  { %p5642_p10 = pnand %p5640_p9, %p5637_p8 }
  0x1a   :  { %5645 = shalt.err (!%p5642_p10)
}
  0x1b   :  { %s5646_s16 = scalar_lea.vmem %s54_s8, 51200  ;;  %p5651_p12 = scmp.lt.s32.totalorder %s54_s8, %s54_s8 }
  0x1c   :  { %p5647_p11 = scmp.ne.s32.totalorder %s54_s8, %s5646_s16  ;;  %p5652_p13 = scmp.lt.s32.totalorder %s5646_s16, %s5646_s16 }
  0x1e   :  { %p5653_p0 = por %p5652_p13, %p5651_p12 }
  0x20   :  { %p5654_p1 = pnand %p5653_p0, %p5647_p11 }
  0x22   :  { %5657 = shalt.err (!%p5654_p1)
}
  0x23   :  { %s5758_s1 = smov 128   ;;  %s5759_s17 = smov 8  }
  0x24   :  { %59 = dma.hbm_to_vmem [thread:$0]  %s6094_s3, 51200, %s54_s8, [#allocation9], %s5758_s1, %s5758_s1, %s5759_s17  }
  0x25   :  { %s5760_s20 = smov [#allocation2]   ;;  %s5761_s22 = smov [#allocation7]  }
  0x26   :  { %s20_s21 = sshll.u32 %s5760_s20, 4  ;;  %s41_s23 = sshll.u32 %s5761_s22, 4  ;;  %s21_s21 = int_to_ptr.vmem [resolvable:$true] %s20_s21  ;;  %s5824_s23 = int_to_ptr.vmem [resolvable:$true] %s41_s23 }
  0x27   :  { %s5658_s26 = scalar_lea.hbm %s6091_s0, 128 }
  0x28   :  { %p5659_p2 = scmp.ne.s32.totalorder %s6091_s0, %s5658_s26  ;;  %p5662_p3 = scmp.lt.u32.totalorder %s5658_s26, %s6091_s0 }
  0x2a   :  { %p5664_p4 = pnand %p5662_p3, %p5659_p2 }
  0x2c   :  { %5667 = shalt.err (!%p5664_p4)
}
  0x2d   :  { %s5668_s3 = scalar_lea.vmem %s21_s21, 128  ;;  %p5673_p6 = scmp.lt.s32.totalorder %s21_s21, %s21_s21 }
  0x2e   :  { %p5669_p5 = scmp.ne.s32.totalorder %s21_s21, %s5668_s3  ;;  %p5674_p7 = scmp.lt.s32.totalorder %s5668_s3, %s5668_s3 }
  0x30   :  { %p5675_p8 = por %p5674_p7, %p5673_p6 }
  0x32   :  { %p5676_p9 = pnand %p5675_p8, %p5669_p5 }
  0x34   :  { %5679 = shalt.err (!%p5676_p9)
}
  0x35   :  { %23 = dma.hbm_to_vmem [thread:$0]  %s6091_s0, 128, %s21_s21, [#allocation3]  }
  0x36   :  { %s5680_s12 = scalar_lea.hbm %s6093_s2, 41600 }
  0x37   :  { %p5681_p10 = scmp.ne.s32.totalorder %s6093_s2, %s5680_s12  ;;  %p5684_p11 = scmp.lt.u32.totalorder %s5680_s12, %s6093_s2 }
  0x39   :  { %p5686_p12 = pnand %p5684_p11, %p5681_p10 }
  0x3b   :  { %5689 = shalt.err (!%p5686_p12)
}
  0x3c   :  { %s5690_s1 = scalar_lea.vmem %s5824_s23, 41600  ;;  %p5695_p0 = scmp.lt.s32.totalorder %s5824_s23, %s5824_s23 }
  0x3d   :  { %p5691_p13 = scmp.ne.s32.totalorder %s5824_s23, %s5690_s1  ;;  %p5696_p1 = scmp.lt.s32.totalorder %s5690_s1, %s5690_s1 }
  0x3f   :  { %p5697_p2 = por %p5696_p1, %p5695_p0 }
  0x41   :  { %p5698_p3 = pnand %p5697_p2, %p5691_p13 }
  0x43   :  { %5701 = shalt.err (!%p5698_p3)
}
  0x44   :  { %47 = dma.hbm_to_vmem [thread:$0]  %s6093_s2, 41600, %s5824_s23, [#allocation6], %s5755_s28, %s5755_s28, %s5756_s29  }
  0x45   :  { %s5762_s18 = smov [#allocation10]   ;;  %s5702_s22 = scalar_lea.hbm %s6095_s4, 16 }
  0x46   :  { %s66_s19 = sshll.u32 %s5762_s18, 4  ;;  %p5703_p4 = scmp.ne.s32.totalorder %s6095_s4, %s5702_s22  ;;  %s67_s19 = int_to_ptr.vmem [resolvable:$true] %s66_s19 }
  0x47   :  { %p5706_p5 = scmp.lt.u32.totalorder %s5702_s22, %s6095_s4 }
  0x49   :  { %p5708_p6 = pnand %p5706_p5, %p5703_p4 }
  0x4b   :  { %5711 = shalt.err (!%p5708_p6)
}
  0x4c   :  { %s5712_s30 = scalar_lea.vmem %s67_s19, 16  ;;  %s5716_s2 = scalar_lea.vmem %s67_s19, 32 }
  0x4d   :  { %p5713_p7 = scmp.ne.s32.totalorder %s67_s19, %s5712_s30  ;;  %p5717_p8 = scmp.lt.s32.totalorder %s67_s19, %s67_s19 }
  0x4e   :  { %p5718_p9 = scmp.lt.s32.totalorder %s5716_s2, %s5712_s30 }
  0x50   :  { %p5719_p10 = por %p5718_p9, %p5717_p8 }
  0x52   :  { %p5720_p11 = pnand %p5719_p10, %p5713_p7 }
  0x54   :  { %5723 = shalt.err (!%p5720_p11)
}
  0x55   :  { %69 = dma.hbm_to_vmem [thread:$0]  %s6095_s4, 16, %s67_s19, [#allocation9]  }
  0x56   :  { %5746 = dma.done.wait [#allocation3], 128  }
  0x57   :  { %5747 = vsyncadd [#allocation3], 4294967168 }
  0x58   :  { %5748 = dma.done.wait [#allocation6], 83200  }
  0x59   :  { %5749 = vsyncadd [#allocation6], 4294884096 }
  0x5a   :  { %5750 = dma.done.wait [#allocation9], 51216  }
  0x5b   :  { %5751 = vsyncadd [#allocation9], 4294916080  ;;  %v5763_v0 = vmov 0.0   ;;  %v87_v1 = vld [vmem:[#allocation5 + $0x8] sm:$0xff]  ;;  %v112_v2 = vld [vmem:[#allocation5 + $0xd0] sm:$0xff]  ;;  %vm411_vm0 = vcmask 850944  }
  0x5c   :  { %479 = vmatprep.mubr.f32.mxu1 %v5763_v0  ;;  %621 = vmatprep.mubr.f32.mxu0 %v5763_v0  ;;  %v91_v3 = vld [vmem:[#allocation5 + $0x28] sm:$0xff]  ;;  %v4579_v4 = vpack.c.bf16 %v112_v2, %v87_v1  ;;  %v116_v5 = vld [vmem:[#allocation5 + $0xf0] sm:$0xff]  ;;  %v86_v6 = vld [vmem:[#allocation5] sm:$0xff]  ;;  %vm5765_vm1 = vmmov 0   ;;  %s5766_s4 = smov [#allocation11]  }
  0x5d   :  { %v111_v7 = vld [vmem:[#allocation5 + $0xc8] sm:$0xff]  ;;  %v4627_v8 = vpack.c.bf16 %v116_v5, %v91_v3  ;;  %v90_v10 = vld [vmem:[#allocation5 + $0x20] sm:$0xff]  ;;  %v137_v12 = vld [vmem:[#allocation5 + $0x198] sm:$0xff]  ;;  %s3983_s23 = sshll.u32 %s5766_s4, 4  ;;  %s3984_s23 = int_to_ptr.vmem [resolvable:$true] %s3983_s23 }
  0x5e   :  { %v4581_v9 = vpack.c.bf16 %v111_v7, %v86_v6  ;;  %v115_v11 = vld [vmem:[#allocation5 + $0xe8] sm:$0xff]  ;;  %4580 = vmatprep.subr.bf16.mxu1 %v4579_v4  ;;  %v162_v14 = vld [vmem:[#allocation5 + $0x260] sm:$0xff]  ;;  %v141_v15 = vld [vmem:[#allocation5 + $0x1b8] sm:$0xff]  ;;  %s5724_s6 = scalar_lea.vmem %s3984_s23, 128  ;;  %p5729_p13 = scmp.lt.s32.totalorder %s3984_s23, %s3984_s23 }
  0x5f   :  { %v4629_v13 = vpack.c.bf16 %v115_v11, %v90_v10  ;;  %v166_v16 = vld [vmem:[#allocation5 + $0x280] sm:$0xff]  ;;  %4628 = vmatprep.subr.bf16.mxu0 %v4627_v8  ;;  %v4583_v17 = vpack.c.bf16 %v162_v14, %v137_v12  ;;  %v136_v19 = vld [vmem:[#allocation5 + $0x190] sm:$0xff]  ;;  %v161_v20 = vld [vmem:[#allocation5 + $0x258] sm:$0xff]  ;;  %p5725_p12 = scmp.ne.s32.totalorder %s3984_s23, %s5724_s6  ;;  %p5730_p0 = scmp.lt.s32.totalorder %s5724_s6, %s5724_s6 }
  0x60   :  { %4582 = vmatpush1.bf16.msra.mxu1 %v4581_v9  ;;  %v4631_v18 = vpack.c.bf16 %v166_v16, %v141_v15  ;;  %v140_v21 = vld [vmem:[#allocation5 + $0x1b0] sm:$0xff]  ;;  %v4585_v22 = vpack.c.bf16 %v161_v20, %v136_v19  ;;  %v165_v23 = vld [vmem:[#allocation5 + $0x278] sm:$0xff]  ;;  %v187_v24 = vld [vmem:[#allocation5 + $0x328] sm:$0xff] }
  0x61   :  { %4630 = vmatpush1.bf16.msra.mxu0 %v4629_v13  ;;  %v212_v25 = vld [vmem:[#allocation5 + $0x3f0] sm:$0xff]  ;;  %4584 = vmatprep.subr.bf16.mxu1 %v4583_v17  ;;  %v4633_v26 = vpack.c.bf16 %v165_v23, %v140_v21  ;;  %v191_v28 = vld [vmem:[#allocation5 + $0x348] sm:$0xff]  ;;  %v186_v30 = vld [vmem:[#allocation5 + $0x320] sm:$0xff]  ;;  %p5731_p1 = por %p5730_p0, %p5729_p13 }
  0x62   :  { %4632 = vmatprep.subr.bf16.mxu0 %v4631_v18  ;;  %v4587_v27 = vpack.c.bf16 %v212_v25, %v187_v24  ;;  %v216_v29 = vld [vmem:[#allocation5 + $0x410] sm:$0xff]  ;;  %v211_v32 = vld [vmem:[#allocation5 + $0x3e8] sm:$0xff]  ;;  %v190_v33 = vld [vmem:[#allocation5 + $0x340] sm:$0xff] }
  0x63   :  { %v4635_v31 = vpack.c.bf16 %v216_v29, %v191_v28  ;;  %v215_v34 = vld [vmem:[#allocation5 + $0x408] sm:$0xff]  ;;  %v4589_v35 = vpack.c.bf16 %v211_v32, %v186_v30  ;;  %v237_v36 = vld [vmem:[#allocation5 + $0x4b8] sm:$0xff]  ;;  %v262_v37 = vld [vmem:[#allocation5 + $0x580] sm:$0xff]  ;;  %p5732_p2 = pnand %p5731_p1, %p5725_p12 }
  0x64   :  { %4586 = vmatpush1.bf16.msra.mxu1 %v4585_v22  ;;  %v241_v38 = vld [vmem:[#allocation5 + $0x4d8] sm:$0xff]  ;;  %v4637_v39 = vpack.c.bf16 %v215_v34, %v190_v33  ;;  %v4591_v40 = vpack.c.bf16 %v262_v37, %v237_v36  ;;  %v266_v41 = vld [vmem:[#allocation5 + $0x5a0] sm:$0xff]  ;;  %v236_v42 = vld [vmem:[#allocation5 + $0x4b0] sm:$0xff] }
  0x65   :  { %4634 = vmatpush1.bf16.msra.mxu0 %v4633_v26  ;;  %4588 = vmatprep.subr.bf16.mxu1 %v4587_v27  ;;  %v261_v43 = vld [vmem:[#allocation5 + $0x578] sm:$0xff]  ;;  %v4639_v44 = vpack.c.bf16 %v266_v41, %v241_v38  ;;  %v240_v45 = vld [vmem:[#allocation5 + $0x4d0] sm:$0xff]  ;;  %v287_v47 = vld [vmem:[#allocation5 + $0x648] sm:$0xff] }
  0x66   :  { %4636 = vmatprep.subr.bf16.mxu0 %v4635_v31  ;;  %v265_v46 = vld [vmem:[#allocation5 + $0x598] sm:$0xff]  ;;  %v312_v48 = vld [vmem:[#allocation5 + $0x710] sm:$0xff]  ;;  %v291_v49 = vld [vmem:[#allocation5 + $0x668] sm:$0xff]  ;;  %v4593_v51 = vpack.c.bf16 %v261_v43, %v236_v42 }
  0x67   :  { %v316_v50 = vld [vmem:[#allocation5 + $0x730] sm:$0xff]  ;;  %v4641_v52 = vpack.c.bf16 %v265_v46, %v240_v45  ;;  %v4595_v53 = vpack.c.bf16 %v312_v48, %v287_v47  ;;  %v286_v54 = vld [vmem:[#allocation5 + $0x640] sm:$0xff]  ;;  %v311_v55 = vld [vmem:[#allocation5 + $0x708] sm:$0xff] }
  0x68   :  { %4590 = vmatpush1.bf16.msra.mxu1 %v4589_v35  ;;  %v290_v56 = vld [vmem:[#allocation5 + $0x660] sm:$0xff]  ;;  %v4643_v57 = vpack.c.bf16 %v316_v50, %v291_v49  ;;  %v315_v58 = vld [vmem:[#allocation5 + $0x728] sm:$0xff]  ;;  %v337_v59 = vld [vmem:[#allocation5 + $0x7d8] sm:$0xff]  ;;  %v4597_v63 = vpack.c.bf16 %v311_v55, %v286_v54 }
  0x69   :  { %4638 = vmatpush1.bf16.msra.mxu0 %v4637_v39  ;;  %4592 = vmatprep.subr.bf16.mxu1 %v4591_v40  ;;  %v362_v60 = vld [vmem:[#allocation5 + $0x8a0] sm:$0xff]  ;;  %v341_v61 = vld [vmem:[#allocation5 + $0x7f8] sm:$0xff]  ;;  %v4645_v1 = vpack.c.bf16 %v315_v58, %v290_v56  ;;  %v336_v3 = vld [vmem:[#allocation5 + $0x7d0] sm:$0xff] }
  0x6a   :  { %4640 = vmatprep.subr.bf16.mxu0 %v4639_v44  ;;  %v366_v62 = vld [vmem:[#allocation5 + $0x8c0] sm:$0xff]  ;;  %v4599_v2 = vpack.c.bf16 %v362_v60, %v337_v59  ;;  %v361_v4 = vld [vmem:[#allocation5 + $0x898] sm:$0xff]  ;;  %v340_v6 = vld [vmem:[#allocation5 + $0x7f0] sm:$0xff] }
  0x6b   :  { %v4647_v5 = vpack.c.bf16 %v366_v62, %v341_v61  ;;  %v365_v7 = vld [vmem:[#allocation5 + $0x8b8] sm:$0xff]  ;;  %v4601_v8 = vpack.c.bf16 %v361_v4, %v336_v3  ;;  %v387_v10 = vld [vmem:[#allocation5 + $0x968] sm:$0xff]  ;;  %v386_v13 = vld [vmem:[#allocation5 + $0x960] sm:$0xff] }
  0x6c   :  { %4594 = vmatpush1.bf16.msra.mxu1 %v4593_v51  ;;  %v4649_v9 = vpack.c.bf16 %v365_v7, %v340_v6  ;;  %v391_v11 = vld [vmem:[#allocation5 + $0x988] sm:$0xff]  ;;  %v89_v12 = vld [vmem:[#allocation5 + $0x18] sm:$0xff]  ;;  %v114_v14 = vld [vmem:[#allocation5 + $0xe0] sm:$0xff] }
  0x6d   :  { %4642 = vmatpush1.bf16.msra.mxu0 %v4641_v52  ;;  %4596 = vmatprep.subr.bf16.mxu1 %v4595_v53  ;;  %v95_v15 = vld [vmem:[#allocation5 + $0x48] sm:$0xff]  ;;  %v120_v16 = vld [vmem:[#allocation5 + $0x110] sm:$0xff]  ;;  %v390_v17 = vld [vmem:[#allocation5 + $0x980] sm:$0xff]  ;;  %v4603_v25 = vpack.c.bf16 %v114_v14, %v89_v12 }
  0x6e   :  { %4644 = vmatprep.subr.bf16.mxu0 %v4643_v57  ;;  %v88_v18 = vld [vmem:[#allocation5 + $0x10] sm:$0xff]  ;;  %v113_v19 = vld [vmem:[#allocation5 + $0xd8] sm:$0xff]  ;;  %v94_v20 = vld [vmem:[#allocation5 + $0x40] sm:$0xff]  ;;  %v4675_v26 = vpack.c.bf16 %v120_v16, %v95_v15 }
  0x6f   :  { %v119_v21 = vld [vmem:[#allocation5 + $0x108] sm:$0xff]  ;;  %v164_v23 = vld [vmem:[#allocation5 + $0x270] sm:$0xff]  ;;  %v5872_v24 = vld [vmem:[#allocation2] sm:$0xff]  ;;  %v4605_v29 = vpack.c.bf16 %v113_v19, %v88_v18 }
  0x70   :  { %4598 = vmatpush1.bf16.msra.mxu1 %v4597_v63  ;;  %v139_v22 = vld [vmem:[#allocation5 + $0x1a8] sm:$0xff]  ;;  %v145_v27 = vld [vmem:[#allocation5 + $0x1d8] sm:$0xff]  ;;  %v170_v28 = vld [vmem:[#allocation5 + $0x2a0] sm:$0xff]  ;;  %v4677_v30 = vpack.c.bf16 %v119_v21, %v94_v20 }
  0x71   :  { %4646 = vmatpush1.bf16.msra.mxu0 %v4645_v1  ;;  %4600 = vmatprep.subr.bf16.mxu1 %v4599_v2  ;;  %v4607_v31 = vpack.c.bf16 %v164_v23, %v139_v22  ;;  %v138_v32 = vld [vmem:[#allocation5 + $0x1a0] sm:$0xff]  ;;  %v163_v33 = vld [vmem:[#allocation5 + $0x268] sm:$0xff]  ;;  %v144_v34 = vld [vmem:[#allocation5 + $0x1d0] sm:$0xff]  ;;  %v4679_v35 = vpack.c.bf16 %v170_v28, %v145_v27 }
  0x72   :  { %4648 = vmatprep.subr.bf16.mxu0 %v4647_v5  ;;  %v169_v36 = vld [vmem:[#allocation5 + $0x298] sm:$0xff]  ;;  %v214_v38 = vld [vmem:[#allocation5 + $0x400] sm:$0xff]  ;;  %v195_v39 = vld [vmem:[#allocation5 + $0x368] sm:$0xff]  ;;  %v4609_v41 = vpack.c.bf16 %v163_v33, %v138_v32 }
  0x73   :  { %v189_v37 = vld [vmem:[#allocation5 + $0x338] sm:$0xff]  ;;  %v220_v40 = vld [vmem:[#allocation5 + $0x430] sm:$0xff]  ;;  %v4681_v42 = vpack.c.bf16 %v169_v36, %v144_v34  ;;  %v194_v46 = vld [vmem:[#allocation5 + $0x360] sm:$0xff] }
  0x74   :  { %4602 = vmatpush1.bf16.msra.mxu1 %v4601_v8  ;;  %v4611_v43 = vpack.c.bf16 %v214_v38, %v189_v37  ;;  %v188_v44 = vld [vmem:[#allocation5 + $0x330] sm:$0xff]  ;;  %v213_v45 = vld [vmem:[#allocation5 + $0x3f8] sm:$0xff]  ;;  %v4683_v47 = vpack.c.bf16 %v220_v40, %v195_v39  ;;  %v219_v48 = vld [vmem:[#allocation5 + $0x428] sm:$0xff] }
  0x75   :  { %4650 = vmatpush1.bf16.msra.mxu0 %v4649_v9  ;;  %439 = vmatprep.subr.mxu1 %v387_v10  ;;  %v239_v49 = vld [vmem:[#allocation5 + $0x4c8] sm:$0xff]  ;;  %v264_v50 = vld [vmem:[#allocation5 + $0x590] sm:$0xff]  ;;  %v245_v51 = vld [vmem:[#allocation5 + $0x4f8] sm:$0xff]  ;;  %v4613_v53 = vpack.c.bf16 %v213_v45, %v188_v44  ;;  %v4685_v54 = vpack.c.bf16 %v219_v48, %v194_v46 }
  0x76   :  { %581 = vmatprep.subr.mxu0 %v391_v11  ;;  %v270_v52 = vld [vmem:[#allocation5 + $0x5c0] sm:$0xff]  ;;  %v4615_v55 = vpack.c.bf16 %v264_v50, %v239_v49  ;;  %v263_v57 = vld [vmem:[#allocation5 + $0x588] sm:$0xff]  ;;  %v244_v58 = vld [vmem:[#allocation5 + $0x4f0] sm:$0xff] }
  0x77   :  { %v238_v56 = vld [vmem:[#allocation5 + $0x4c0] sm:$0xff]  ;;  %v4687_v59 = vpack.c.bf16 %v270_v52, %v245_v51  ;;  %v269_v60 = vld [vmem:[#allocation5 + $0x5b8] sm:$0xff]  ;;  %v295_v63 = vld [vmem:[#allocation5 + $0x688] sm:$0xff] }
  0x78   :  { %440 = vmatpush1.msra.mxu1 %v386_v13  ;;  %v289_v61 = vld [vmem:[#allocation5 + $0x658] sm:$0xff]  ;;  %v314_v62 = vld [vmem:[#allocation5 + $0x720] sm:$0xff]  ;;  %v320_v1 = vld [vmem:[#allocation5 + $0x750] sm:$0xff]  ;;  %v4617_v2 = vpack.c.bf16 %v263_v57, %v238_v56  ;;  %v4689_v3 = vpack.c.bf16 %v269_v60, %v244_v58 }
  0x79   :  { %582 = vmatpush1.msra.mxu0 %v390_v17  ;;  %3994 = vmatmul.mubr.msk.f32.vlgmr.msra.gmra.mrb[0].mxu1 %vm411_vm0, %v5872_v24  ;;  %v4619_v4 = vpack.c.bf16 %v314_v62, %v289_v61  ;;  %v288_v5 = vld [vmem:[#allocation5 + $0x650] sm:$0xff]  ;;  %v313_v6 = vld [vmem:[#allocation5 + $0x718] sm:$0xff]  ;;  %v294_v7 = vld [vmem:[#allocation5 + $0x680] sm:$0xff]  ;;  %v4691_v8 = vpack.c.bf16 %v320_v1, %v295_v63 }
  0x7a   :  { %4604 = vmatprep.subr.bf16.mxu1 %v4603_v25  ;;  %4676 = vmatprep.subr.bf16.mxu0 %v4675_v26  ;;  %v319_v9 = vld [vmem:[#allocation5 + $0x748] sm:$0xff]  ;;  %v364_v11 = vld [vmem:[#allocation5 + $0x8b0] sm:$0xff]  ;;  %v345_v12 = vld [vmem:[#allocation5 + $0x818] sm:$0xff]  ;;  %v4621_v14 = vpack.c.bf16 %v313_v6, %v288_v5 }
  0x7b   :  { %4606 = vmatpush1.bf16.msra.mxu1 %v4605_v29  ;;  %3996 = vmatmul.mubr.msk.f32.vlgmr.msra.gmra.mrb[0].mxu0 %vm411_vm0, %v5872_v24  ;;  %v339_v10 = vld [vmem:[#allocation5 + $0x7e8] sm:$0xff]  ;;  %v370_v13 = vld [vmem:[#allocation5 + $0x8e0] sm:$0xff]  ;;  %v4693_v15 = vpack.c.bf16 %v319_v9, %v294_v7  ;;  %v344_v20 = vld [vmem:[#allocation5 + $0x810] sm:$0xff] }
  0x7c   :  { %4678 = vmatpush1.bf16.msra.mxu0 %v4677_v30  ;;  %4608 = vmatprep.subr.bf16.mxu1 %v4607_v31  ;;  %v4623_v16 = vpack.c.bf16 %v364_v11, %v339_v10  ;;  %v338_v17 = vld [vmem:[#allocation5 + $0x7e0] sm:$0xff]  ;;  %v363_v18 = vld [vmem:[#allocation5 + $0x8a8] sm:$0xff]  ;;  %v4695_v19 = vpack.c.bf16 %v370_v13, %v345_v12  ;;  %v369_v21 = vld [vmem:[#allocation5 + $0x8d8] sm:$0xff] }
  0x7d   :  { %4680 = vmatprep.subr.bf16.mxu0 %v4679_v35  ;;  %550 = vmatprep.mubr.f32.mxu1 %v5763_v0  ;;  %v4625_v22 = vpack.c.bf16 %v363_v18, %v338_v17  ;;  %v4697_v23 = vpack.c.bf16 %v369_v21, %v344_v20  ;;  %v389_v25 = vld [vmem:[#allocation5 + $0x978] sm:$0xff]  ;;  %v395_v26 = vld [vmem:[#allocation5 + $0x9a8] sm:$0xff]  ;;  %v388_v28 = vld [vmem:[#allocation5 + $0x970] sm:$0xff] }
  0x7e   :  { %763 = vmatprep.mubr.f32.mxu0 %v5763_v0  ;;  %v93_v27 = vld [vmem:[#allocation5 + $0x38] sm:$0xff]  ;;  %v118_v29 = vld [vmem:[#allocation5 + $0x100] sm:$0xff]  ;;  %v99_v30 = vld [vmem:[#allocation5 + $0x68] sm:$0xff] }
  0x7f   :  { %4610 = vmatpush1.bf16.msra.mxu1 %v4609_v41  ;;  %v124_v31 = vld [vmem:[#allocation5 + $0x130] sm:$0xff]  ;;  %v117_v33 = vld [vmem:[#allocation5 + $0xf8] sm:$0xff]  ;;  %v98_v34 = vld [vmem:[#allocation5 + $0x60] sm:$0xff]  ;;  %v4651_v39 = vpack.c.bf16 %v118_v29, %v93_v27 }
  0x80   :  { %4682 = vmatpush1.bf16.msra.mxu0 %v4681_v42  ;;  %4612 = vmatprep.subr.bf16.mxu1 %v4611_v43  ;;  %v92_v32 = vld [vmem:[#allocation5 + $0x30] sm:$0xff]  ;;  %v123_v35 = vld [vmem:[#allocation5 + $0x128] sm:$0xff]  ;;  %v394_v38 = vld [vmem:[#allocation5 + $0x9a0] sm:$0xff]  ;;  %v4723_v40 = vpack.c.bf16 %v124_v31, %v99_v30 }
  0x81   :  { %4684 = vmatprep.subr.bf16.mxu0 %v4683_v47  ;;  %v143_v36 = vld [vmem:[#allocation5 + $0x1c8] sm:$0xff]  ;;  %v168_v37 = vld [vmem:[#allocation5 + $0x290] sm:$0xff]  ;;  %v149_v41 = vld [vmem:[#allocation5 + $0x1f8] sm:$0xff]  ;;  %v4653_v43 = vpack.c.bf16 %v117_v33, %v92_v32  ;;  %v4725_v44 = vpack.c.bf16 %v123_v35, %v98_v34 }
  0x82   :  { %v174_v42 = vld [vmem:[#allocation5 + $0x2c0] sm:$0xff]  ;;  %v4655_v45 = vpack.c.bf16 %v168_v37, %v143_v36  ;;  %v167_v47 = vld [vmem:[#allocation5 + $0x288] sm:$0xff]  ;;  %v148_v48 = vld [vmem:[#allocation5 + $0x1f0] sm:$0xff] }
  0x83   :  { %4614 = vmatpush1.bf16.msra.mxu1 %v4613_v53  ;;  %v142_v46 = vld [vmem:[#allocation5 + $0x1c0] sm:$0xff]  ;;  %v4727_v49 = vpack.c.bf16 %v174_v42, %v149_v41  ;;  %v173_v50 = vld [vmem:[#allocation5 + $0x2b8] sm:$0xff]  ;;  %v199_v53 = vld [vmem:[#allocation5 + $0x388] sm:$0xff] }
  0x84   :  { %4686 = vmatpush1.bf16.msra.mxu0 %v4685_v54  ;;  %4616 = vmatprep.subr.bf16.mxu1 %v4615_v55  ;;  %v193_v51 = vld [vmem:[#allocation5 + $0x358] sm:$0xff]  ;;  %v218_v52 = vld [vmem:[#allocation5 + $0x420] sm:$0xff]  ;;  %v224_v54 = vld [vmem:[#allocation5 + $0x450] sm:$0xff]  ;;  %v4657_v55 = vpack.c.bf16 %v167_v47, %v142_v46  ;;  %v4729_v56 = vpack.c.bf16 %v173_v50, %v148_v48 }
  0x85   :  { %4688 = vmatprep.subr.bf16.mxu0 %v4687_v59  ;;  %v4659_v57 = vpack.c.bf16 %v218_v52, %v193_v51  ;;  %v192_v58 = vld [vmem:[#allocation5 + $0x350] sm:$0xff]  ;;  %v217_v59 = vld [vmem:[#allocation5 + $0x418] sm:$0xff]  ;;  %v198_v60 = vld [vmem:[#allocation5 + $0x380] sm:$0xff]  ;;  %v4731_v61 = vpack.c.bf16 %v224_v54, %v199_v53 }
  0x86   :  { %v223_v62 = vld [vmem:[#allocation5 + $0x448] sm:$0xff]  ;;  %v268_v1 = vld [vmem:[#allocation5 + $0x5b0] sm:$0xff]  ;;  %v242_v7 = vld [vmem:[#allocation5 + $0x4e0] sm:$0xff] }
  0x87   :  { %4618 = vmatpush1.bf16.msra.mxu1 %v4617_v2  ;;  %v243_v63 = vld [vmem:[#allocation5 + $0x4e8] sm:$0xff]  ;;  %v249_v2 = vld [vmem:[#allocation5 + $0x518] sm:$0xff]  ;;  %v4733_v5 = vpack.c.bf16 %v223_v62, %v198_v60  ;;  %v248_v9 = vld [vmem:[#allocation5 + $0x510] sm:$0xff] }
  0x88   :  { %4690 = vmatpush1.bf16.msra.mxu0 %v4689_v3  ;;  %4620 = vmatprep.subr.bf16.mxu1 %v4619_v4  ;;  %v274_v3 = vld [vmem:[#allocation5 + $0x5e0] sm:$0xff]  ;;  %v4661_v4 = vpack.c.bf16 %v217_v59, %v192_v58  ;;  %v4663_v6 = vpack.c.bf16 %v268_v1, %v243_v63  ;;  %v273_v11 = vld [vmem:[#allocation5 + $0x5d8] sm:$0xff]  ;;  %v367_v33 = vld [vmem:[#allocation5 + $0x8c8] sm:$0xff] }
  0x89   :  { %4692 = vmatprep.subr.bf16.mxu0 %v4691_v8  ;;  %v267_v8 = vld [vmem:[#allocation5 + $0x5a8] sm:$0xff]  ;;  %v4735_v10 = vpack.c.bf16 %v274_v3, %v249_v2  ;;  %v293_v12 = vld [vmem:[#allocation5 + $0x678] sm:$0xff]  ;;  %v318_v13 = vld [vmem:[#allocation5 + $0x740] sm:$0xff]  ;;  %v4737_v17 = vpack.c.bf16 %v273_v11, %v248_v9 }
  0x8a   :  { %v4667_v18 = vpack.c.bf16 %v318_v13, %v293_v12  ;;  %v317_v20 = vld [vmem:[#allocation5 + $0x738] sm:$0xff]  ;;  %v298_v21 = vld [vmem:[#allocation5 + $0x6a0] sm:$0xff]  ;;  %v348_v35 = vld [vmem:[#allocation5 + $0x830] sm:$0xff] }
  0x8b   :  { %4622 = vmatpush1.bf16.msra.mxu1 %v4621_v14  ;;  %v299_v14 = vld [vmem:[#allocation5 + $0x6a8] sm:$0xff]  ;;  %v349_v27 = vld [vmem:[#allocation5 + $0x838] sm:$0xff]  ;;  %v342_v32 = vld [vmem:[#allocation5 + $0x800] sm:$0xff] }
  0x8c   :  { %4694 = vmatpush1.bf16.msra.mxu0 %v4693_v15  ;;  %4624 = vmatprep.subr.bf16.mxu1 %v4623_v16  ;;  %v324_v15 = vld [vmem:[#allocation5 + $0x770] sm:$0xff]  ;;  %v4665_v16 = vpack.c.bf16 %v267_v8, %v242_v7  ;;  %v373_v36 = vld [vmem:[#allocation5 + $0x8f8] sm:$0xff]  ;;  %v4673_v37 = vpack.c.bf16 %v367_v33, %v342_v32  ;;  %v102_v48 = vld [vmem:[#allocation5 + $0x80] sm:$0xff] }
  0x8d   :  { %4696 = vmatprep.subr.bf16.mxu0 %v4695_v19  ;;  %v292_v19 = vld [vmem:[#allocation5 + $0x670] sm:$0xff]  ;;  %v97_v41 = vld [vmem:[#allocation5 + $0x58] sm:$0xff]  ;;  %v147_v50 = vld [vmem:[#allocation5 + $0x1e8] sm:$0xff] }
  0x8e   :  { %v4669_v29 = vpack.c.bf16 %v317_v20, %v292_v19  ;;  %v392_v42 = vld [vmem:[#allocation5 + $0x990] sm:$0xff]  ;;  %v121_v47 = vld [vmem:[#allocation5 + $0x118] sm:$0xff]  ;;  %v398_v52 = vld [vmem:[#allocation5 + $0x9c0] sm:$0xff] }
  0x8f   :  { %4626 = vmatpush1.bf16.msra.mxu1 %v4625_v22  ;;  %v4739_v22 = vpack.c.bf16 %v324_v15, %v299_v14  ;;  %v96_v46 = vld [vmem:[#allocation5 + $0x50] sm:$0xff]  ;;  %v146_v60 = vld [vmem:[#allocation5 + $0x1e0] sm:$0xff]  ;;  %v177_v1 = vld [vmem:[#allocation5 + $0x2d8] sm:$0xff] }
  0x90   :  { %4698 = vmatpush1.bf16.msra.mxu0 %v4697_v23  ;;  %510 = vmatprep.subr.mxu1 %v389_v25  ;;  %v323_v23 = vld [vmem:[#allocation5 + $0x768] sm:$0xff]  ;;  %v172_v51 = vld [vmem:[#allocation5 + $0x2b0] sm:$0xff]  ;;  %v197_v2 = vld [vmem:[#allocation5 + $0x378] sm:$0xff] }
  0x91   :  { %723 = vmatprep.subr.mxu0 %v395_v26  ;;  %v343_v25 = vld [vmem:[#allocation5 + $0x808] sm:$0xff]  ;;  %v368_v26 = vld [vmem:[#allocation5 + $0x8d0] sm:$0xff]  ;;  %v4741_v30 = vpack.c.bf16 %v323_v23, %v298_v21  ;;  %v4703_v59 = vpack.c.bf16 %v172_v51, %v147_v50  ;;  %v222_v3 = vld [vmem:[#allocation5 + $0x440] sm:$0xff] }
  0x92   :  { %v4671_v31 = vpack.c.bf16 %v368_v26, %v343_v25  ;;  %v152_v62 = vld [vmem:[#allocation5 + $0x210] sm:$0xff]  ;;  %v4707_v8 = vpack.c.bf16 %v222_v3, %v197_v2  ;;  %v202_v11 = vld [vmem:[#allocation5 + $0x3a0] sm:$0xff]  ;;  %v227_v13 = vld [vmem:[#allocation5 + $0x468] sm:$0xff] }
  0x93   :  { %511 = vmatpush1.msra.mxu1 %v388_v28  ;;  %v374_v28 = vld [vmem:[#allocation5 + $0x900] sm:$0xff]  ;;  %v4777_v7 = vpack.c.bf16 %v177_v1, %v152_v62  ;;  %v196_v9 = vld [vmem:[#allocation5 + $0x370] sm:$0xff]  ;;  %v247_v14 = vld [vmem:[#allocation5 + $0x508] sm:$0xff]  ;;  %v4781_v19 = vpack.c.bf16 %v227_v13, %v202_v11 }
  0x94   :  { %724 = vmatpush1.msra.mxu0 %v394_v38  ;;  %3995 = vmatmul.mubr.msk.f32.vlgmr.msra.gmra.mrb[2].mxu1 %vm411_vm0, %v5872_v24  ;;  %v4743_v34 = vpack.c.bf16 %v374_v28, %v349_v27  ;;  %v4745_v38 = vpack.c.bf16 %v373_v36, %v348_v35  ;;  %v272_v15 = vld [vmem:[#allocation5 + $0x5d0] sm:$0xff]  ;;  %v246_v21 = vld [vmem:[#allocation5 + $0x500] sm:$0xff]  ;;  %v277_v26 = vld [vmem:[#allocation5 + $0x5f8] sm:$0xff] }
  0x95   :  { %4652 = vmatprep.subr.bf16.mxu1 %v4651_v39  ;;  %4724 = vmatprep.subr.bf16.mxu0 %v4723_v40  ;;  %v393_v39 = vld [vmem:[#allocation5 + $0x998] sm:$0xff]  ;;  %v399_v40 = vld [vmem:[#allocation5 + $0x9c8] sm:$0xff]  ;;  %v4711_v20 = vpack.c.bf16 %v272_v15, %v247_v14  ;;  %v252_v23 = vld [vmem:[#allocation5 + $0x530] sm:$0xff] }
  0x96   :  { %4654 = vmatpush1.bf16.msra.mxu1 %v4653_v43  ;;  %3998 = vmatmul.mubr.msk.f32.vlgmr.msra.gmra.mrb[2].mxu0 %vm411_vm0, %v5872_v24  ;;  %v122_v43 = vld [vmem:[#allocation5 + $0x120] sm:$0xff]  ;;  %v297_v27 = vld [vmem:[#allocation5 + $0x698] sm:$0xff]  ;;  %v4785_v32 = vpack.c.bf16 %v277_v26, %v252_v23  ;;  %v151_v1 = vld [vmem:[#allocation5 + $0x208] sm:$0xff] }
  0x97   :  { %4726 = vmatpush1.bf16.msra.mxu0 %v4725_v44  ;;  %4656 = vmatprep.subr.bf16.mxu1 %v4655_v45  ;;  %v103_v44 = vld [vmem:[#allocation5 + $0x88] sm:$0xff]  ;;  %v128_v45 = vld [vmem:[#allocation5 + $0x150] sm:$0xff]  ;;  %v4699_v53 = vpack.c.bf16 %v122_v43, %v97_v41  ;;  %v322_v28 = vld [vmem:[#allocation5 + $0x760] sm:$0xff] }
  0x98   :  { %4728 = vmatprep.subr.bf16.mxu0 %v4727_v49  ;;  %692 = vmatprep.mubr.f32.mxu1 %v5763_v0  ;;  %v127_v49 = vld [vmem:[#allocation5 + $0x148] sm:$0xff]  ;;  %v4771_v54 = vpack.c.bf16 %v128_v45, %v103_v44  ;;  %v4715_v33 = vpack.c.bf16 %v322_v28, %v297_v27  ;;  %v321_v35 = vld [vmem:[#allocation5 + $0x758] sm:$0xff]  ;;  %v302_v36 = vld [vmem:[#allocation5 + $0x6c0] sm:$0xff] }
  0x99   :  { %905 = vmatprep.mubr.f32.mxu0 %v5763_v0  ;;  %v4773_v58 = vpack.c.bf16 %v127_v49, %v102_v48  ;;  %v353_v41 = vld [vmem:[#allocation5 + $0x858] sm:$0xff]  ;;  %v352_v49 = vld [vmem:[#allocation5 + $0x850] sm:$0xff]  ;;  %v106_v62 = vld [vmem:[#allocation5 + $0xa0] sm:$0xff] }
  0x9a   :  { %4658 = vmatpush1.bf16.msra.mxu1 %v4657_v55  ;;  %v153_v55 = vld [vmem:[#allocation5 + $0x218] sm:$0xff]  ;;  %v176_v2 = vld [vmem:[#allocation5 + $0x2d0] sm:$0xff]  ;;  %v402_v3 = vld [vmem:[#allocation5 + $0x9e0] sm:$0xff] }
  0x9b   :  { %4730 = vmatpush1.bf16.msra.mxu0 %v4729_v56  ;;  %4660 = vmatprep.subr.bf16.mxu1 %v4659_v57  ;;  %v178_v56 = vld [vmem:[#allocation5 + $0x2e0] sm:$0xff]  ;;  %v4701_v57 = vpack.c.bf16 %v121_v47, %v96_v46  ;;  %v371_v47 = vld [vmem:[#allocation5 + $0x8e8] sm:$0xff]  ;;  %v377_v50 = vld [vmem:[#allocation5 + $0x918] sm:$0xff] }
  0x9c   :  { %4732 = vmatprep.subr.bf16.mxu0 %v4731_v61  ;;  %v171_v61 = vld [vmem:[#allocation5 + $0x2a8] sm:$0xff]  ;;  %v4775_v63 = vpack.c.bf16 %v178_v56, %v153_v55  ;;  %v346_v46 = vld [vmem:[#allocation5 + $0x820] sm:$0xff]  ;;  %v101_v55 = vld [vmem:[#allocation5 + $0x78] sm:$0xff] }
  0x9d   :  { %v4721_v51 = vpack.c.bf16 %v371_v47, %v346_v46  ;;  %v396_v56 = vld [vmem:[#allocation5 + $0x9b0] sm:$0xff]  ;;  %v150_v11 = vld [vmem:[#allocation5 + $0x200] sm:$0xff]  ;;  %v181_v15 = vld [vmem:[#allocation5 + $0x2f8] sm:$0xff] }
  0x9e   :  { %4662 = vmatpush1.bf16.msra.mxu1 %v4661_v4  ;;  %v203_v4 = vld [vmem:[#allocation5 + $0x3a8] sm:$0xff]  ;;  %v156_v13 = vld [vmem:[#allocation5 + $0x230] sm:$0xff]  ;;  %v206_v26 = vld [vmem:[#allocation5 + $0x3c0] sm:$0xff] }
  0x9f   :  { %4734 = vmatpush1.bf16.msra.mxu0 %v4733_v5  ;;  %4664 = vmatprep.subr.bf16.mxu1 %v4663_v6  ;;  %v228_v5 = vld [vmem:[#allocation5 + $0x470] sm:$0xff]  ;;  %v4705_v6 = vpack.c.bf16 %v171_v61, %v146_v60  ;;  %v125_v61 = vld [vmem:[#allocation5 + $0x138] sm:$0xff]  ;;  %v231_v28 = vld [vmem:[#allocation5 + $0x488] sm:$0xff] }
  0xa0   :  { %4736 = vmatprep.subr.bf16.mxu0 %v4735_v10  ;;  %v221_v10 = vld [vmem:[#allocation5 + $0x438] sm:$0xff]  ;;  %v4779_v12 = vpack.c.bf16 %v228_v5, %v203_v4  ;;  %v100_v60 = vld [vmem:[#allocation5 + $0x70] sm:$0xff] }
  0xa1   :  { %v200_v23 = vld [vmem:[#allocation5 + $0x390] sm:$0xff] }
  0xa2   :  { %4666 = vmatpush1.bf16.msra.mxu1 %v4665_v16  ;;  %v253_v16 = vld [vmem:[#allocation5 + $0x538] sm:$0xff] }
  0xa3   :  { %4738 = vmatpush1.bf16.msra.mxu0 %v4737_v17  ;;  %4668 = vmatprep.subr.bf16.mxu1 %v4667_v18  ;;  %v278_v17 = vld [vmem:[#allocation5 + $0x600] sm:$0xff]  ;;  %v4709_v18 = vpack.c.bf16 %v221_v10, %v196_v9  ;;  %v4751_v10 = vpack.c.bf16 %v176_v2, %v151_v1  ;;  %v381_v1 = vld [vmem:[#allocation5 + $0x938] sm:$0xff] }
  0xa4   :  { %4740 = vmatprep.subr.bf16.mxu0 %v4739_v22  ;;  %v271_v22 = vld [vmem:[#allocation5 + $0x5c8] sm:$0xff]  ;;  %v4783_v25 = vpack.c.bf16 %v278_v17, %v253_v16  ;;  %v201_v16 = vld [vmem:[#allocation5 + $0x398] sm:$0xff]  ;;  %v226_v17 = vld [vmem:[#allocation5 + $0x460] sm:$0xff] }
  0xa6   :  { %4670 = vmatpush1.bf16.msra.mxu1 %v4669_v29  ;;  %v303_v29 = vld [vmem:[#allocation5 + $0x6c8] sm:$0xff] }
  0xa7   :  { %4742 = vmatpush1.bf16.msra.mxu0 %v4741_v30  ;;  %4672 = vmatprep.subr.bf16.mxu1 %v4671_v31  ;;  %v328_v30 = vld [vmem:[#allocation5 + $0x790] sm:$0xff]  ;;  %v4713_v31 = vpack.c.bf16 %v271_v22, %v246_v21  ;;  %v4825_v21 = vpack.c.bf16 %v181_v15, %v156_v13  ;;  %v4755_v22 = vpack.c.bf16 %v226_v17, %v201_v16  ;;  %v155_v13 = vld [vmem:[#allocation5 + $0x228] sm:$0xff]  ;;  %v406_v15 = vld [vmem:[#allocation5 + $0xa00] sm:$0xff] }
  0xa8   :  { %4744 = vmatprep.subr.bf16.mxu0 %v4743_v34  ;;  %v296_v34 = vld [vmem:[#allocation5 + $0x690] sm:$0xff] }
  0xa9   :  { %v4717_v43 = vpack.c.bf16 %v321_v35, %v296_v34  ;;  %v4829_v34 = vpack.c.bf16 %v231_v28, %v206_v26  ;;  %v230_v26 = vld [vmem:[#allocation5 + $0x480] sm:$0xff] }
  0xaa   :  { %4674 = vmatpush1.bf16.msra.mxu1 %v4673_v37  ;;  %v4787_v37 = vpack.c.bf16 %v328_v30, %v303_v29  ;;  %v251_v29 = vld [vmem:[#allocation5 + $0x528] sm:$0xff]  ;;  %v276_v30 = vld [vmem:[#allocation5 + $0x5f0] sm:$0xff] }
  0xab   :  { %4746 = vmatpush1.bf16.msra.mxu0 %v4745_v38  ;;  %652 = vmatprep.subr.mxu1 %v393_v39  ;;  %v327_v38 = vld [vmem:[#allocation5 + $0x788] sm:$0xff]  ;;  %v4759_v35 = vpack.c.bf16 %v276_v30, %v251_v29 }
  0xac   :  { %865 = vmatprep.subr.mxu0 %v399_v40  ;;  %v347_v39 = vld [vmem:[#allocation5 + $0x828] sm:$0xff]  ;;  %v372_v40 = vld [vmem:[#allocation5 + $0x8f0] sm:$0xff]  ;;  %v4789_v44 = vpack.c.bf16 %v327_v38, %v302_v36  ;;  %v250_v36 = vld [vmem:[#allocation5 + $0x520] sm:$0xff] }
  0xad   :  { %v4719_v45 = vpack.c.bf16 %v372_v40, %v347_v39  ;;  %v256_v38 = vld [vmem:[#allocation5 + $0x550] sm:$0xff]  ;;  %v281_v40 = vld [vmem:[#allocation5 + $0x618] sm:$0xff] }
  0xae   :  { %653 = vmatpush1.msra.mxu1 %v392_v42  ;;  %v378_v42 = vld [vmem:[#allocation5 + $0x920] sm:$0xff]  ;;  %v4833_v46 = vpack.c.bf16 %v281_v40, %v256_v38  ;;  %v279_v40 = vld [vmem:[#allocation5 + $0x608] sm:$0xff] }
  0xaf   :  { %866 = vmatpush1.msra.mxu0 %v398_v52  ;;  %3997 = vmatmul.mubr.msk.f32.vlgmr.msra.gmra.mrb[4].mxu1 %vm411_vm0, %v5872_v24  ;;  %v4791_v48 = vpack.c.bf16 %v378_v42, %v353_v41  ;;  %v4793_v52 = vpack.c.bf16 %v377_v50, %v352_v49  ;;  %v301_v41 = vld [vmem:[#allocation5 + $0x6b8] sm:$0xff]  ;;  %v326_v42 = vld [vmem:[#allocation5 + $0x780] sm:$0xff] }
  0xb0   :  { %4700 = vmatprep.subr.bf16.mxu1 %v4699_v53  ;;  %4772 = vmatprep.subr.bf16.mxu0 %v4771_v54  ;;  %v397_v53 = vld [vmem:[#allocation5 + $0x9b8] sm:$0xff]  ;;  %v403_v54 = vld [vmem:[#allocation5 + $0x9e8] sm:$0xff]  ;;  %v4763_v47 = vpack.c.bf16 %v326_v42, %v301_v41  ;;  %v306_v50 = vld [vmem:[#allocation5 + $0x6e0] sm:$0xff] }
  0xb1   :  { %4702 = vmatpush1.bf16.msra.mxu1 %v4701_v57  ;;  %4000 = vmatmul.mubr.msk.f32.vlgmr.msra.gmra.mrb[4].mxu0 %vm411_vm0, %v5872_v24  ;;  %v126_v57 = vld [vmem:[#allocation5 + $0x140] sm:$0xff]  ;;  %v325_v49 = vld [vmem:[#allocation5 + $0x778] sm:$0xff]  ;;  %v260_v41 = vld [vmem:[#allocation5 + $0x570] sm:$0xff] }
  0xb2   :  { %4774 = vmatpush1.bf16.msra.mxu0 %v4773_v58  ;;  %4704 = vmatprep.subr.bf16.mxu1 %v4703_v59  ;;  %v107_v58 = vld [vmem:[#allocation5 + $0xa8] sm:$0xff]  ;;  %v132_v59 = vld [vmem:[#allocation5 + $0x170] sm:$0xff]  ;;  %v4747_v4 = vpack.c.bf16 %v126_v57, %v101_v55  ;;  %v357_v55 = vld [vmem:[#allocation5 + $0x878] sm:$0xff] }
  0xb3   :  { %4776 = vmatprep.subr.bf16.mxu0 %v4775_v63  ;;  %834 = vmatprep.mubr.f32.mxu1 %v5763_v0  ;;  %v131_v63 = vld [vmem:[#allocation5 + $0x168] sm:$0xff]  ;;  %v4819_v5 = vpack.c.bf16 %v132_v59, %v107_v58  ;;  %v285_v42 = vld [vmem:[#allocation5 + $0x638] sm:$0xff] }
  0xb4   :  { %1047 = vmatprep.mubr.f32.mxu0 %v5763_v0  ;;  %v4821_v9 = vpack.c.bf16 %v131_v63, %v106_v62  ;;  %v356_v63 = vld [vmem:[#allocation5 + $0x870] sm:$0xff] }
  0xb5   :  { %4706 = vmatpush1.bf16.msra.mxu1 %v4705_v6  ;;  %v157_v6 = vld [vmem:[#allocation5 + $0x238] sm:$0xff] }
  0xb6   :  { %4778 = vmatpush1.bf16.msra.mxu0 %v4777_v7  ;;  %4708 = vmatprep.subr.bf16.mxu1 %v4707_v8  ;;  %v182_v7 = vld [vmem:[#allocation5 + $0x300] sm:$0xff]  ;;  %v4749_v8 = vpack.c.bf16 %v125_v61, %v100_v60  ;;  %v375_v61 = vld [vmem:[#allocation5 + $0x908] sm:$0xff] }
  0xb7   :  { %4780 = vmatprep.subr.bf16.mxu0 %v4779_v12  ;;  %v175_v12 = vld [vmem:[#allocation5 + $0x2c8] sm:$0xff]  ;;  %v4823_v14 = vpack.c.bf16 %v182_v7, %v157_v6  ;;  %v350_v60 = vld [vmem:[#allocation5 + $0x840] sm:$0xff]  ;;  %v400_v6 = vld [vmem:[#allocation5 + $0x9d0] sm:$0xff] }
  0xb8   :  { %v4769_v2 = vpack.c.bf16 %v375_v61, %v350_v60  ;;  %v105_v7 = vld [vmem:[#allocation5 + $0x98] sm:$0xff] }
  0xb9   :  { %4710 = vmatpush1.bf16.msra.mxu1 %v4709_v18  ;;  %v207_v18 = vld [vmem:[#allocation5 + $0x3c8] sm:$0xff]  ;;  %v385_v60 = vld [vmem:[#allocation5 + $0x958] sm:$0xff] }
  0xba   :  { %4782 = vmatpush1.bf16.msra.mxu0 %v4781_v19  ;;  %4712 = vmatprep.subr.bf16.mxu1 %v4711_v20  ;;  %v232_v19 = vld [vmem:[#allocation5 + $0x490] sm:$0xff]  ;;  %v4753_v20 = vpack.c.bf16 %v175_v12, %v150_v11  ;;  %v110_v11 = vld [vmem:[#allocation5 + $0xc0] sm:$0xff]  ;;  %v135_v12 = vld [vmem:[#allocation5 + $0x188] sm:$0xff] }
  0xbb   :  { %4784 = vmatprep.subr.bf16.mxu0 %v4783_v25  ;;  %v225_v25 = vld [vmem:[#allocation5 + $0x458] sm:$0xff]  ;;  %v4827_v27 = vpack.c.bf16 %v232_v19, %v207_v18  ;;  %v4868_v18 = vpack.c.bf16 %v135_v12, %v110_v11  ;;  %v184_v11 = vld [vmem:[#allocation5 + $0x310] sm:$0xff]  ;;  %v410_v12 = vld [vmem:[#allocation5 + $0xa20] sm:$0xff] }
  0xbd   :  { %4714 = vmatpush1.bf16.msra.mxu1 %v4713_v31  ;;  %v257_v31 = vld [vmem:[#allocation5 + $0x558] sm:$0xff] }
  0xbe   :  { %4786 = vmatpush1.bf16.msra.mxu0 %v4785_v32  ;;  %4716 = vmatprep.subr.bf16.mxu1 %v4715_v33  ;;  %v282_v32 = vld [vmem:[#allocation5 + $0x620] sm:$0xff]  ;;  %v4757_v33 = vpack.c.bf16 %v225_v25, %v200_v23  ;;  %v185_v23 = vld [vmem:[#allocation5 + $0x318] sm:$0xff] }
  0xbf   :  { %4788 = vmatprep.subr.bf16.mxu0 %v4787_v37  ;;  %v275_v37 = vld [vmem:[#allocation5 + $0x5e8] sm:$0xff]  ;;  %v4831_v39 = vpack.c.bf16 %v282_v32, %v257_v31  ;;  %v205_v25 = vld [vmem:[#allocation5 + $0x3b8] sm:$0xff]  ;;  %v204_v31 = vld [vmem:[#allocation5 + $0x3b0] sm:$0xff] }
  0xc0   :  { %v4803_v30 = vpack.c.bf16 %v230_v26, %v205_v25  ;;  %v229_v32 = vld [vmem:[#allocation5 + $0x478] sm:$0xff]  ;;  %v1439_v26 = vld [vmem:[#allocation7 + $0x268] sm:$0xff] }
  0xc1   :  { %4718 = vmatpush1.bf16.msra.mxu1 %v4717_v43  ;;  %v307_v43 = vld [vmem:[#allocation5 + $0x6e8] sm:$0xff] }
  0xc2   :  { %4790 = vmatpush1.bf16.msra.mxu0 %v4789_v44  ;;  %4720 = vmatprep.subr.bf16.mxu1 %v4719_v45  ;;  %v332_v44 = vld [vmem:[#allocation5 + $0x7b0] sm:$0xff]  ;;  %v4761_v45 = vpack.c.bf16 %v275_v37, %v250_v36 }
  0xc3   :  { %4792 = vmatprep.subr.bf16.mxu0 %v4791_v48  ;;  %v300_v48 = vld [vmem:[#allocation5 + $0x6b0] sm:$0xff] }
  0xc4   :  { %v4765_v57 = vpack.c.bf16 %v325_v49, %v300_v48  ;;  %v280_v36 = vld [vmem:[#allocation5 + $0x610] sm:$0xff]  ;;  %v329_v49 = vld [vmem:[#allocation5 + $0x798] sm:$0xff] }
  0xc5   :  { %4722 = vmatpush1.bf16.msra.mxu1 %v4721_v51  ;;  %v4835_v51 = vpack.c.bf16 %v332_v44, %v307_v43  ;;  %v305_v43 = vld [vmem:[#allocation5 + $0x6d8] sm:$0xff]  ;;  %v330_v44 = vld [vmem:[#allocation5 + $0x7a0] sm:$0xff]  ;;  %v304_v48 = vld [vmem:[#allocation5 + $0x6d0] sm:$0xff] }
  0xc6   :  { %4794 = vmatpush1.bf16.msra.mxu0 %v4793_v52  ;;  %794 = vmatprep.subr.mxu1 %v397_v53  ;;  %v331_v52 = vld [vmem:[#allocation5 + $0x7a8] sm:$0xff] }
  0xc7   :  { %1007 = vmatprep.subr.mxu0 %v403_v54  ;;  %v351_v53 = vld [vmem:[#allocation5 + $0x848] sm:$0xff]  ;;  %v376_v54 = vld [vmem:[#allocation5 + $0x910] sm:$0xff]  ;;  %v4837_v58 = vpack.c.bf16 %v331_v52, %v306_v50  ;;  %v310_v50 = vld [vmem:[#allocation5 + $0x700] sm:$0xff] }
  0xc8   :  { %v4767_v59 = vpack.c.bf16 %v376_v54, %v351_v53  ;;  %v355_v52 = vld [vmem:[#allocation5 + $0x868] sm:$0xff]  ;;  %v380_v53 = vld [vmem:[#allocation5 + $0x930] sm:$0xff]  ;;  %v4813_v54 = vpack.c.bf16 %v329_v49, %v304_v48 }
  0xc9   :  { %795 = vmatpush1.msra.mxu1 %v396_v56  ;;  %v382_v56 = vld [vmem:[#allocation5 + $0x940] sm:$0xff]  ;;  %v1514_v48 = vld [vmem:[#allocation7 + $0x4c0] sm:$0xff] }
  0xca   :  { %1008 = vmatpush1.msra.mxu0 %v402_v3  ;;  %3999 = vmatmul.mubr.msk.f32.vlgmr.msra.gmra.mrb[6].mxu1 %vm411_vm0, %v5872_v24  ;;  %v4839_v62 = vpack.c.bf16 %v382_v56, %v357_v55  ;;  %v4841_v3 = vpack.c.bf16 %v381_v1, %v356_v63  ;;  %v4815_v56 = vpack.c.bf16 %v380_v53, %v355_v52  ;;  %v405_v63 = vld [vmem:[#allocation5 + $0x9f8] sm:$0xff]  ;;  %v334_v52 = vld [vmem:[#allocation5 + $0x7c0] sm:$0xff] }
  0xcb   :  { %4748 = vmatprep.subr.bf16.mxu1 %v4747_v4  ;;  %4820 = vmatprep.subr.bf16.mxu0 %v4819_v5  ;;  %v401_v4 = vld [vmem:[#allocation5 + $0x9d8] sm:$0xff]  ;;  %v407_v5 = vld [vmem:[#allocation5 + $0xa08] sm:$0xff]  ;;  %v1565_v53 = vld [vmem:[#allocation7 + $0x658] sm:$0xff] }
  0xcc   :  { %4750 = vmatpush1.bf16.msra.mxu1 %v4749_v8  ;;  %4002 = vmatmul.mubr.msk.f32.vlgmr.msra.gmra.mrb[6].mxu0 %vm411_vm0, %v5872_v24  ;;  %v130_v8 = vld [vmem:[#allocation5 + $0x160] sm:$0xff]  ;;  %v109_v1 = vld [vmem:[#allocation5 + $0xb8] sm:$0xff] }
  0xcd   :  { %4822 = vmatpush1.bf16.msra.mxu0 %v4821_v9  ;;  %4752 = vmatprep.subr.bf16.mxu1 %v4751_v10  ;;  %v104_v9 = vld [vmem:[#allocation5 + $0x90] sm:$0xff]  ;;  %v129_v10 = vld [vmem:[#allocation5 + $0x158] sm:$0xff]  ;;  %v4795_v16 = vpack.c.bf16 %v130_v8, %v105_v7 }
  0xce   :  { %4824 = vmatprep.subr.bf16.mxu0 %v4823_v14  ;;  %976 = vmatprep.mubr.f32.mxu1 %v5763_v0  ;;  %v180_v14 = vld [vmem:[#allocation5 + $0x2f0] sm:$0xff]  ;;  %v4797_v17 = vpack.c.bf16 %v129_v10, %v104_v9  ;;  %v133_v7 = vld [vmem:[#allocation5 + $0x178] sm:$0xff]  ;;  %v1389_v9 = vld [vmem:[#allocation7 + $0xd8] sm:$0xff] }
  0xcf   :  { %1189 = vmatprep.mubr.f32.mxu0 %v5763_v0  ;;  %v4799_v19 = vpack.c.bf16 %v180_v14, %v155_v13  ;;  %v1364_v8 = vld [vmem:[#allocation7 + $0x10] sm:$0xff]  ;;  %v159_v10 = vld [vmem:[#allocation5 + $0x248] sm:$0xff] }
  0xd0   :  { %4754 = vmatpush1.bf16.msra.mxu1 %v4753_v20  ;;  %v154_v20 = vld [vmem:[#allocation5 + $0x220] sm:$0xff] }
  0xd1   :  { %4826 = vmatpush1.bf16.msra.mxu0 %v4825_v21  ;;  %4756 = vmatprep.subr.bf16.mxu1 %v4755_v22  ;;  %v179_v21 = vld [vmem:[#allocation5 + $0x2e8] sm:$0xff]  ;;  %v160_v22 = vld [vmem:[#allocation5 + $0x250] sm:$0xff] }
  0xd2   :  { %4828 = vmatprep.subr.bf16.mxu0 %v4827_v27  ;;  %v5764_v27 = vmov 0.0|0.0   ;;  %v4801_v28 = vpack.c.bf16 %v179_v21, %v154_v20  ;;  %v4871_v29 = vpack.c.bf16 %v185_v23, %v160_v22  ;;  %v158_v20 = vld [vmem:[#allocation5 + $0x240] sm:$0xff]  ;;  %v183_v21 = vld [vmem:[#allocation5 + $0x308] sm:$0xff]  ;;  %v5912_v23 = vld [vmem:[#allocation2] sm:$0xff] }
  0xd3   :  { %v1414_v22 = vld [vmem:[#allocation7 + $0x1a0] sm:$0xff] }
  0xd4   :  { %4758 = vmatpush1.bf16.msra.mxu1 %v4757_v33  ;;  %v210_v33 = vld [vmem:[#allocation5 + $0x3e0] sm:$0xff] }
  0xd5   :  { %4830 = vmatpush1.bf16.msra.mxu0 %v4829_v34  ;;  %4760 = vmatprep.subr.bf16.mxu1 %v4759_v35  ;;  %v235_v34 = vld [vmem:[#allocation5 + $0x4a8] sm:$0xff] }
  0xd6   :  { %4832 = vmatprep.subr.bf16.mxu0 %v4831_v39  ;;  %v255_v35 = vld [vmem:[#allocation5 + $0x548] sm:$0xff]  ;;  %v4874_v37 = vpack.c.bf16 %v235_v34, %v210_v33  ;;  %v254_v39 = vld [vmem:[#allocation5 + $0x540] sm:$0xff]  ;;  %v4915_v33 = vpack.c.bf16 %v1439_v26, %v1414_v22  ;;  %v1387_v22 = vld [vmem:[#allocation7 + $0xc8] sm:$0xff] }
  0xd7   :  { %v4807_v38 = vpack.c.bf16 %v280_v36, %v255_v35  ;;  %v208_v35 = vld [vmem:[#allocation5 + $0x3d0] sm:$0xff]  ;;  %v233_v36 = vld [vmem:[#allocation5 + $0x498] sm:$0xff]  ;;  %v1393_v26 = vld [vmem:[#allocation7 + $0xf8] sm:$0xff] }
  0xd8   :  { %4762 = vmatpush1.bf16.msra.mxu1 %v4761_v45  ;;  %v4809_v45 = vpack.c.bf16 %v279_v40, %v254_v39  ;;  %v259_v39 = vld [vmem:[#allocation5 + $0x568] sm:$0xff]  ;;  %v284_v40 = vld [vmem:[#allocation5 + $0x630] sm:$0xff] }
  0xd9   :  { %4834 = vmatpush1.bf16.msra.mxu0 %v4833_v46  ;;  %4764 = vmatprep.subr.bf16.mxu1 %v4763_v47  ;;  %v4877_v46 = vpack.c.bf16 %v285_v42, %v260_v41  ;;  %v4811_v47 = vpack.c.bf16 %v330_v44, %v305_v43  ;;  %v1515_v41 = vld [vmem:[#allocation7 + $0x4c8] sm:$0xff]  ;;  %v1540_v42 = vld [vmem:[#allocation7 + $0x590] sm:$0xff]  ;;  %v4853_v43 = vpack.c.bf16 %v233_v36, %v208_v35 }
  0xda   :  { %4836 = vmatprep.subr.bf16.mxu0 %v4835_v51  ;;  %v335_v51 = vld [vmem:[#allocation5 + $0x7c8] sm:$0xff]  ;;  %v4921_v49 = vpack.c.bf16 %v1540_v42, %v1515_v41  ;;  %v1443_v41 = vld [vmem:[#allocation7 + $0x288] sm:$0xff] }
  0xdb   :  { %v4880_v55 = vpack.c.bf16 %v335_v51, %v310_v50  ;;  %v1539_v50 = vld [vmem:[#allocation7 + $0x588] sm:$0xff]  ;;  %v309_v51 = vld [vmem:[#allocation5 + $0x6f8] sm:$0xff] }
  0xdc   :  { %4766 = vmatpush1.bf16.msra.mxu1 %v4765_v57  ;;  %v354_v57 = vld [vmem:[#allocation5 + $0x860] sm:$0xff]  ;;  %v1463_v42 = vld [vmem:[#allocation7 + $0x328] sm:$0xff] }
  0xdd   :  { %4838 = vmatpush1.bf16.msra.mxu0 %v4837_v58  ;;  %4768 = vmatprep.subr.bf16.mxu1 %v4767_v59  ;;  %v379_v58 = vld [vmem:[#allocation5 + $0x928] sm:$0xff]  ;;  %v360_v59 = vld [vmem:[#allocation5 + $0x890] sm:$0xff] }
  0xde   :  { %4840 = vmatprep.subr.bf16.mxu0 %v4839_v62  ;;  %v4817_v61 = vpack.c.bf16 %v379_v58, %v354_v57  ;;  %v4883_v62 = vpack.c.bf16 %v385_v60, %v360_v59  ;;  %v4859_v57 = vpack.c.bf16 %v334_v52, %v309_v51  ;;  %v308_v58 = vld [vmem:[#allocation5 + $0x6f0] sm:$0xff]  ;;  %v333_v59 = vld [vmem:[#allocation5 + $0x7b8] sm:$0xff] }
  0xdf   :  { %v1564_v60 = vld [vmem:[#allocation7 + $0x650] sm:$0xff] }
  0xe0   :  { %4770 = vmatpush1.bf16.msra.mxu1 %v4769_v2  ;;  %v404_v2 = vld [vmem:[#allocation5 + $0x9f0] sm:$0xff]  ;;  %v1468_v51 = vld [vmem:[#allocation7 + $0x350] sm:$0xff] }
  0xe1   :  { %4842 = vmatpush1.bf16.msra.mxu0 %v4841_v3  ;;  %936 = vmatprep.subr.mxu1 %v401_v4  ;;  %v134_v3 = vld [vmem:[#allocation5 + $0x180] sm:$0xff] }
  0xe2   :  { %1149 = vmatprep.subr.mxu0 %v407_v5  ;;  %v1365_v4 = vld [vmem:[#allocation7 + $0x18] sm:$0xff]  ;;  %v1390_v5 = vld [vmem:[#allocation7 + $0xe0] sm:$0xff]  ;;  %v4843_v13 = vpack.c.bf16 %v134_v3, %v109_v1  ;;  %v384_v1 = vld [vmem:[#allocation5 + $0x950] sm:$0xff] }
  0xe3   :  { %v4909_v14 = vpack.c.bf16 %v1390_v5, %v1365_v4  ;;  %v1640_v3 = vld [vmem:[#allocation7 + $0x8b0] sm:$0xff]  ;;  %v4861_v4 = vpack.c.bf16 %v333_v59, %v308_v58 }
  0xe4   :  { %937 = vmatpush1.msra.mxu1 %v400_v6  ;;  %v108_v6 = vld [vmem:[#allocation5 + $0xb0] sm:$0xff] }
  0xe5   :  { %1150 = vmatpush1.msra.mxu0 %v406_v15  ;;  %4001 = vmatmul.mubr.msk.f32.vlgmr.msra.gmra.mrb[8].mxu1 %vm411_vm0, %v5872_v24  ;;  %v1415_v15 = vld [vmem:[#allocation7 + $0x1a8] sm:$0xff] }
  0xe6   :  { %4796 = vmatprep.subr.bf16.mxu1 %v4795_v16  ;;  %4867 = vmatprep.subr.bf16.mxu0 %v5764_v27  ;;  %v1440_v16 = vld [vmem:[#allocation7 + $0x270] sm:$0xff] }
  0xe7   :  { %4798 = vmatpush1.bf16.msra.mxu1 %v4797_v17  ;;  %4004 = vmatmul.mubr.msk.f32.vlgmr.msra.gmra.mrb[8].mxu0 %vm411_vm0, %v5872_v24  ;;  %v4805_v24 = vpack.c.bf16 %v229_v32, %v204_v31  ;;  %v4845_v17 = vpack.c.bf16 %v133_v7, %v108_v6  ;;  %v4913_v25 = vpack.c.bf16 %v1440_v16, %v1415_v15  ;;  %v1490_v31 = vld [vmem:[#allocation7 + $0x400] sm:$0xff]  ;;  %v358_v7 = vld [vmem:[#allocation5 + $0x880] sm:$0xff]  ;;  %v1363_v16 = vld [vmem:[#allocation7 + $0x8] sm:$0xff] }
  0xe8   :  { %4869 = vmatpush3.bf16.msra.mxu0 %v4868_v18  ;;  %4800 = vmatprep.subr.bf16.mxu1 %v4799_v19  ;;  %v4911_v18 = vpack.c.bf16 %v1389_v9, %v1364_v8  ;;  %v4847_v19 = vpack.c.bf16 %v184_v11, %v159_v10  ;;  %v4849_v32 = vpack.c.bf16 %v183_v21, %v158_v20  ;;  %v383_v8 = vld [vmem:[#allocation5 + $0x948] sm:$0xff]  ;;  %v1639_v11 = vld [vmem:[#allocation7 + $0x8a8] sm:$0xff]  ;;  %v1665_v15 = vld [vmem:[#allocation7 + $0x978] sm:$0xff] }
  0xe9   :  { %4870 = vmatprep.subr.bf16.mxu0 %v5764_v27  ;;  %1118 = vmatprep.mubr.f32.mxu1 %v5763_v0  ;;  %v1614_v10 = vld [vmem:[#allocation7 + $0x7e0] sm:$0xff] }
  0xea   :  { %4512 = vmatprep.mubr.msk.f32.mxu0 %vm5765_vm1, %v5763_v0  ;;  %v1394_v20 = vld [vmem:[#allocation7 + $0x100] sm:$0xff] }
  0xeb   :  { %4802 = vmatpush1.bf16.msra.mxu1 %v4801_v28  ;;  %v209_v28 = vld [vmem:[#allocation5 + $0x3d8] sm:$0xff]  ;;  %v1362_v21 = vld [vmem:[#allocation7] sm:$0xff] }
  0xec   :  { %4872 = vmatpush3.bf16.msra.mxu0 %v4871_v29  ;;  %4804 = vmatprep.subr.bf16.mxu1 %v4803_v30  ;;  %v234_v29 = vld [vmem:[#allocation5 + $0x4a0] sm:$0xff]  ;;  %v4887_v35 = vpack.c.bf16 %v1387_v22, %v1362_v21  ;;  %v1612_v22 = vld [vmem:[#allocation7 + $0x7d0] sm:$0xff] }
  0xed   :  { %4873 = vmatprep.subr.bf16.mxu0 %v5764_v27  ;;  %v1465_v30 = vld [vmem:[#allocation7 + $0x338] sm:$0xff]  ;;  %v4851_v34 = vpack.c.bf16 %v234_v29, %v209_v28  ;;  %v1438_v29 = vld [vmem:[#allocation7 + $0x260] sm:$0xff] }
  0xee   :  { %v1413_v28 = vld [vmem:[#allocation7 + $0x198] sm:$0xff] }
  0xef   :  { %4806 = vmatpush1.bf16.msra.mxu1 %v4805_v24  ;;  %v1464_v24 = vld [vmem:[#allocation7 + $0x330] sm:$0xff] }
  0xf0   :  { %4875 = vmatpush3.bf16.msra.mxu0 %v4874_v37  ;;  %4808 = vmatprep.subr.bf16.mxu1 %v4807_v38  ;;  %v4917_v37 = vpack.c.bf16 %v1490_v31, %v1465_v30  ;;  %v1489_v38 = vld [vmem:[#allocation7 + $0x3f8] sm:$0xff]  ;;  %v1664_v30 = vld [vmem:[#allocation7 + $0x970] sm:$0xff] }
  0xf1   :  { %4876 = vmatprep.subr.bf16.mxu0 %v5764_v27  ;;  %v4919_v44 = vpack.c.bf16 %v1489_v38, %v1464_v24  ;;  %v4889_v24 = vpack.c.bf16 %v1438_v29, %v1413_v28  ;;  %v1437_v38 = vld [vmem:[#allocation7 + $0x258] sm:$0xff]  ;;  %v1618_v28 = vld [vmem:[#allocation7 + $0x800] sm:$0xff]  ;;  %v1643_v29 = vld [vmem:[#allocation7 + $0x8c8] sm:$0xff] }
  0xf3   :  { %4810 = vmatpush1.bf16.msra.mxu1 %v4809_v45  ;;  %v4855_v45 = vpack.c.bf16 %v284_v40, %v259_v39  ;;  %v1418_v39 = vld [vmem:[#allocation7 + $0x1c0] sm:$0xff] }
  0xf4   :  { %4878 = vmatpush3.bf16.msra.mxu0 %v4877_v46  ;;  %4812 = vmatprep.subr.bf16.mxu1 %v4811_v47  ;;  %v258_v46 = vld [vmem:[#allocation5 + $0x560] sm:$0xff]  ;;  %v283_v47 = vld [vmem:[#allocation5 + $0x628] sm:$0xff] }
  0xf5   :  { %4879 = vmatprep.subr.bf16.mxu0 %v5764_v27 }
  0xf7   :  { %4814 = vmatpush1.bf16.msra.mxu1 %v4813_v54  ;;  %v1590_v54 = vld [vmem:[#allocation7 + $0x720] sm:$0xff] }
  0xf8   :  { %4881 = vmatpush3.bf16.msra.mxu0 %v4880_v55  ;;  %4816 = vmatprep.subr.bf16.mxu1 %v4815_v56  ;;  %v4857_v55 = vpack.c.bf16 %v283_v47, %v258_v46  ;;  %v4923_v56 = vpack.c.bf16 %v1539_v50, %v1514_v48  ;;  %v4963_v47 = vpack.c.bf16 %v1443_v41, %v1418_v39  ;;  %v1487_v50 = vld [vmem:[#allocation7 + $0x3e8] sm:$0xff]  ;;  %v1397_v41 = vld [vmem:[#allocation7 + $0x118] sm:$0xff] }
  0xf9   :  { %4882 = vmatprep.subr.bf16.mxu0 %v5764_v27  ;;  %v1391_v39 = vld [vmem:[#allocation7 + $0xe8] sm:$0xff] }
  0xfb   :  { %4818 = vmatpush1.bf16.msra.mxu1 %v4817_v61  ;;  %v4925_v61 = vpack.c.bf16 %v1590_v54, %v1565_v53  ;;  %v1493_v53 = vld [vmem:[#allocation7 + $0x418] sm:$0xff] }
  0xfc   :  { %4884 = vmatpush3.bf16.msra.mxu0 %v4883_v62  ;;  %1078 = vmatprep.subr.mxu1 %v405_v63  ;;  %v1589_v62 = vld [vmem:[#allocation7 + $0x718] sm:$0xff]  ;;  %v359_v63 = vld [vmem:[#allocation5 + $0x888] sm:$0xff]  ;;  %v4967_v59 = vpack.c.bf16 %v1493_v53, %v1468_v51 }
  0xfd   :  { %4510 = vmatprep.subr.mxu0 %v5763_v0  ;;  %v4927_v5 = vpack.c.bf16 %v1589_v62, %v1564_v60  ;;  %v4863_v6 = vpack.c.bf16 %v384_v1, %v359_v63  ;;  %v1513_v54 = vld [vmem:[#allocation7 + $0x4b8] sm:$0xff]  ;;  %v1518_v63 = vld [vmem:[#allocation7 + $0x4e0] sm:$0xff] }
  0xfe   :  { %v1537_v62 = vld [vmem:[#allocation7 + $0x578] sm:$0xff] }
  0xff   :  { %1079 = vmatpush1.msra.mxu1 %v404_v2  ;;  %v1615_v2 = vld [vmem:[#allocation7 + $0x7e8] sm:$0xff]  ;;  %v1441_v53 = vld [vmem:[#allocation7 + $0x278] sm:$0xff] }
 0x100   :  { %4511 = vmatpush3.msra.mxu0 %v410_v12  ;;  %4003 = vmatmul.mubr.msk.f32.vlgmr.msra.gmra.mrb[10].mxu1 %vm411_vm0, %v5912_v23  ;;  %v4929_v9 = vpack.c.bf16 %v1640_v3, %v1615_v2  ;;  %v4865_v12 = vpack.c.bf16 %v383_v8, %v358_v7  ;;  %v1543_v2 = vld [vmem:[#allocation7 + $0x5a8] sm:$0xff] }
 0x101   :  { %4844 = vmatprep.subr.bf16.mxu1 %v4843_v13  ;;  %4910 = vmatprep.subr.bf16.mxu0 %v4909_v14  ;;  %v4931_v13 = vpack.c.bf16 %v1639_v11, %v1614_v10  ;;  %v409_v14 = vld [vmem:[#allocation5 + $0xa18] sm:$0xff]  ;;  %v1563_v3 = vld [vmem:[#allocation7 + $0x648] sm:$0xff]  ;;  %v4971_v8 = vpack.c.bf16 %v1543_v2, %v1518_v63  ;;  %v1562_v10 = vld [vmem:[#allocation7 + $0x640] sm:$0xff] }
 0x102   :  { %4846 = vmatpush1.bf16.msra.mxu1 %v4845_v17  ;;  %4513 = vmatmul.mubr.msk.f32.vlgmr.msra.gmra.mrb[10].mxu0 %vm411_vm0, %v5912_v23  ;;  %v408_v17 = vld [vmem:[#allocation5 + $0xa10] sm:$0xff] }
 0x103   :  { %4912 = vmatpush1.bf16.msra.mxu0 %v4911_v18  ;;  %4848 = vmatprep.subr.bf16.mxu1 %v4847_v19  ;;  %v1388_v18 = vld [vmem:[#allocation7 + $0xd0] sm:$0xff]  ;;  %v1369_v19 = vld [vmem:[#allocation7 + $0x38] sm:$0xff]  ;;  %v1587_v11 = vld [vmem:[#allocation7 + $0x708] sm:$0xff] }
 0x104   :  { %4914 = vmatprep.subr.bf16.mxu0 %v4913_v25  ;;  %1260 = vmatprep.mubr.f32.mxu1 %v5763_v0  ;;  %v1368_v25 = vld [vmem:[#allocation7 + $0x30] sm:$0xff]  ;;  %v4885_v31 = vpack.c.bf16 %v1388_v18, %v1363_v16  ;;  %v1638_v16 = vld [vmem:[#allocation7 + $0x8a0] sm:$0xff]  ;;  %v1491_v2 = vld [vmem:[#allocation7 + $0x408] sm:$0xff] }
 0x105   :  { %1822 = vmatprep.mubr.f32.mxu0 %v5763_v0  ;;  %v4959_v36 = vpack.c.bf16 %v1393_v26, %v1368_v25  ;;  %v1644_v18 = vld [vmem:[#allocation7 + $0x8d0] sm:$0xff]  ;;  %v1637_v25 = vld [vmem:[#allocation7 + $0x898] sm:$0xff] }
 0x106   :  { %4850 = vmatpush1.bf16.msra.mxu1 %v4849_v32  ;;  %v1419_v32 = vld [vmem:[#allocation7 + $0x1c8] sm:$0xff] }
 0x107   :  { %4916 = vmatpush1.bf16.msra.mxu0 %v4915_v33  ;;  %4852 = vmatprep.subr.bf16.mxu1 %v4851_v34  ;;  %v1444_v33 = vld [vmem:[#allocation7 + $0x290] sm:$0xff]  ;;  %v4957_v34 = vpack.c.bf16 %v1394_v20, %v1369_v19  ;;  %v4903_v19 = vpack.c.bf16 %v1587_v11, %v1562_v10 }
 0x108   :  { %4918 = vmatprep.subr.bf16.mxu0 %v4917_v37  ;;  %v1412_v37 = vld [vmem:[#allocation7 + $0x190] sm:$0xff]  ;;  %v4961_v40 = vpack.c.bf16 %v1444_v33, %v1419_v32  ;;  %v1663_v32 = vld [vmem:[#allocation7 + $0x968] sm:$0xff]  ;;  %v1669_v33 = vld [vmem:[#allocation7 + $0x998] sm:$0xff] }
 0x109   :  { %v4891_v46 = vpack.c.bf16 %v1437_v38, %v1412_v37  ;;  %v1398_v37 = vld [vmem:[#allocation7 + $0x120] sm:$0xff] }
 0x10a   :  { %4854 = vmatpush1.bf16.msra.mxu1 %v4853_v43  ;;  %v1488_v43 = vld [vmem:[#allocation7 + $0x3f0] sm:$0xff]  ;;  %v1366_v38 = vld [vmem:[#allocation7 + $0x20] sm:$0xff] }
 0x10b   :  { %4920 = vmatpush1.bf16.msra.mxu0 %v4919_v44  ;;  %4856 = vmatprep.subr.bf16.mxu1 %v4855_v45  ;;  %v1469_v44 = vld [vmem:[#allocation7 + $0x358] sm:$0xff]  ;;  %v1494_v45 = vld [vmem:[#allocation7 + $0x420] sm:$0xff]  ;;  %v4893_v48 = vpack.c.bf16 %v1488_v43, %v1463_v42 }
 0x10c   :  { %4922 = vmatprep.subr.bf16.mxu0 %v4921_v49  ;;  %v1462_v49 = vld [vmem:[#allocation7 + $0x320] sm:$0xff]  ;;  %v4965_v52 = vpack.c.bf16 %v1494_v45, %v1469_v44  ;;  %v1417_v42 = vld [vmem:[#allocation7 + $0x1b8] sm:$0xff]  ;;  %v1668_v44 = vld [vmem:[#allocation7 + $0x990] sm:$0xff] }
 0x10d   :  { %v4895_v58 = vpack.c.bf16 %v1487_v50, %v1462_v49  ;;  %v1442_v43 = vld [vmem:[#allocation7 + $0x280] sm:$0xff]  ;;  %v4935_v49 = vpack.c.bf16 %v1391_v39, %v1366_v38  ;;  %v1616_v39 = vld [vmem:[#allocation7 + $0x7f0] sm:$0xff] }
 0x10e   :  { %4858 = vmatpush1.bf16.msra.mxu1 %v4857_v55  ;;  %v1538_v55 = vld [vmem:[#allocation7 + $0x580] sm:$0xff]  ;;  %v4937_v51 = vpack.c.bf16 %v1442_v43, %v1417_v42  ;;  %v1647_v43 = vld [vmem:[#allocation7 + $0x8e8] sm:$0xff] }
 0x10f   :  { %4924 = vmatpush1.bf16.msra.mxu0 %v4923_v56  ;;  %4860 = vmatprep.subr.bf16.mxu1 %v4859_v57  ;;  %v1519_v56 = vld [vmem:[#allocation7 + $0x4e8] sm:$0xff]  ;;  %v1544_v57 = vld [vmem:[#allocation7 + $0x5b0] sm:$0xff]  ;;  %v4897_v60 = vpack.c.bf16 %v1538_v55, %v1513_v54  ;;  %v1422_v54 = vld [vmem:[#allocation7 + $0x1e0] sm:$0xff] }
 0x110   :  { %4926 = vmatprep.subr.bf16.mxu0 %v4925_v61  ;;  %v1512_v61 = vld [vmem:[#allocation7 + $0x4b0] sm:$0xff]  ;;  %v4969_v1 = vpack.c.bf16 %v1544_v57, %v1519_v56  ;;  %v1447_v56 = vld [vmem:[#allocation7 + $0x2a8] sm:$0xff]  ;;  %v1622_v42 = vld [vmem:[#allocation7 + $0x820] sm:$0xff] }
 0x111   :  { %v4899_v7 = vpack.c.bf16 %v1537_v62, %v1512_v61  ;;  %v1467_v57 = vld [vmem:[#allocation7 + $0x348] sm:$0xff]  ;;  %v5011_v62 = vpack.c.bf16 %v1447_v56, %v1422_v54 }
 0x112   :  { %4862 = vmatpush1.bf16.msra.mxu1 %v4861_v4  ;;  %v1588_v4 = vld [vmem:[#allocation7 + $0x710] sm:$0xff]  ;;  %v1395_v54 = vld [vmem:[#allocation7 + $0x108] sm:$0xff] }
 0x113   :  { %4928 = vmatpush1.bf16.msra.mxu0 %v4927_v5  ;;  %4864 = vmatprep.subr.bf16.mxu1 %v4863_v6  ;;  %v1569_v5 = vld [vmem:[#allocation7 + $0x678] sm:$0xff]  ;;  %v1594_v6 = vld [vmem:[#allocation7 + $0x740] sm:$0xff] }
 0x114   :  { %4930 = vmatprep.subr.bf16.mxu0 %v4929_v9  ;;  %v4901_v9 = vpack.c.bf16 %v1588_v4, %v1563_v3  ;;  %v1472_v3 = vld [vmem:[#allocation7 + $0x370] sm:$0xff] }
 0x116   :  { %4866 = vmatpush1.bf16.msra.mxu1 %v4865_v12  ;;  %v1568_v12 = vld [vmem:[#allocation7 + $0x670] sm:$0xff] }
 0x117   :  { %4932 = vmatpush1.bf16.msra.mxu0 %v4931_v13  ;;  %1220 = vmatprep.subr.mxu1 %v409_v14  ;;  %v4973_v13 = vpack.c.bf16 %v1594_v6, %v1569_v5  ;;  %v1593_v14 = vld [vmem:[#allocation7 + $0x738] sm:$0xff] }
 0x118   :  { %1782 = vmatprep.subr.mxu0 %v1665_v15  ;;  %v1613_v15 = vld [vmem:[#allocation7 + $0x7d8] sm:$0xff]  ;;  %v4975_v20 = vpack.c.bf16 %v1593_v14, %v1568_v12 }
 0x119   :  { %v4905_v21 = vpack.c.bf16 %v1638_v16, %v1613_v15  ;;  %v1497_v5 = vld [vmem:[#allocation7 + $0x438] sm:$0xff]  ;;  %v1522_v15 = vld [vmem:[#allocation7 + $0x500] sm:$0xff] }
 0x11a   :  { %1221 = vmatpush1.msra.mxu1 %v408_v17  ;;  %v1619_v17 = vld [vmem:[#allocation7 + $0x808] sm:$0xff]  ;;  %v1517_v6 = vld [vmem:[#allocation7 + $0x4d8] sm:$0xff]  ;;  %v5015_v11 = vpack.c.bf16 %v1497_v5, %v1472_v3 }
 0x11b   :  { %1783 = vmatpush1.msra.mxu0 %v1664_v30  ;;  %4005 = vmatmul.mubr.msk.f32.vlgmr.msra.gmra.mrb[12].mxu1 %vm411_vm0, %v5912_v23  ;;  %v4977_v26 = vpack.c.bf16 %v1644_v18, %v1619_v17  ;;  %v4907_v30 = vpack.c.bf16 %v1637_v25, %v1612_v22  ;;  %v1541_v14 = vld [vmem:[#allocation7 + $0x598] sm:$0xff]  ;;  %v1547_v17 = vld [vmem:[#allocation7 + $0x5c8] sm:$0xff] }
 0x11c   :  { %4886 = vmatprep.subr.bf16.mxu1 %v4885_v31  ;;  %4008 = vmatmul.mubr.msk.f32.vlgmr.msra.gmra.mrb[12].mxu0 %vm411_vm0, %v5912_v23  ;;  %v4979_v31 = vpack.c.bf16 %v1643_v29, %v1618_v28  ;;  %v1567_v18 = vld [vmem:[#allocation7 + $0x668] sm:$0xff]  ;;  %v5019_v25 = vpack.c.bf16 %v1547_v17, %v1522_v15  ;;  %v1566_v28 = vld [vmem:[#allocation7 + $0x660] sm:$0xff]  ;;  %v1477_v15 = vld [vmem:[#allocation7 + $0x398] sm:$0xff] }
 0x11d   :  { %4958 = vmatprep.subr.bf16.mxu0 %v4957_v34  ;;  %4888 = vmatpush1.bf16.msra.mxu1 %v4887_v35  ;;  %v1367_v34 = vld [vmem:[#allocation7 + $0x28] sm:$0xff]  ;;  %v1662_v35 = vld [vmem:[#allocation7 + $0x960] sm:$0xff] }
 0x11e   :  { %4960 = vmatpush1.bf16.msra.mxu0 %v4959_v36  ;;  %4890 = vmatprep.subr.bf16.mxu1 %v4889_v24  ;;  %v1392_v36 = vld [vmem:[#allocation7 + $0xf0] sm:$0xff]  ;;  %v1373_v24 = vld [vmem:[#allocation7 + $0x58] sm:$0xff]  ;;  %v1591_v29 = vld [vmem:[#allocation7 + $0x728] sm:$0xff] }
 0x11f   :  { %4962 = vmatprep.subr.bf16.mxu0 %v4961_v40  ;;  %1751 = vmatprep.mubr.f32.mxu1 %v5763_v0  ;;  %v1372_v40 = vld [vmem:[#allocation7 + $0x50] sm:$0xff]  ;;  %v4933_v45 = vpack.c.bf16 %v1392_v36, %v1367_v34  ;;  %v1642_v34 = vld [vmem:[#allocation7 + $0x8c0] sm:$0xff] }
 0x120   :  { %1964 = vmatprep.mubr.f32.mxu0 %v5763_v0  ;;  %v5007_v50 = vpack.c.bf16 %v1397_v41, %v1372_v40  ;;  %v1648_v36 = vld [vmem:[#allocation7 + $0x8f0] sm:$0xff]  ;;  %v1641_v40 = vld [vmem:[#allocation7 + $0x8b8] sm:$0xff] }
 0x121   :  { %4892 = vmatpush1.bf16.msra.mxu1 %v4891_v46  ;;  %v1423_v46 = vld [vmem:[#allocation7 + $0x1e8] sm:$0xff] }
 0x122   :  { %4964 = vmatpush1.bf16.msra.mxu0 %v4963_v47  ;;  %4894 = vmatprep.subr.bf16.mxu1 %v4893_v48  ;;  %v1448_v47 = vld [vmem:[#allocation7 + $0x2b0] sm:$0xff]  ;;  %v5005_v48 = vpack.c.bf16 %v1398_v37, %v1373_v24  ;;  %v4951_v24 = vpack.c.bf16 %v1591_v29, %v1566_v28  ;;  %v1521_v28 = vld [vmem:[#allocation7 + $0x4f8] sm:$0xff]  ;;  %v1546_v29 = vld [vmem:[#allocation7 + $0x5c0] sm:$0xff] }
 0x123   :  { %4966 = vmatprep.subr.bf16.mxu0 %v4965_v52  ;;  %v1416_v52 = vld [vmem:[#allocation7 + $0x1b0] sm:$0xff]  ;;  %v5009_v55 = vpack.c.bf16 %v1448_v47, %v1423_v46  ;;  %v1667_v46 = vld [vmem:[#allocation7 + $0x988] sm:$0xff]  ;;  %v1673_v47 = vld [vmem:[#allocation7 + $0x9b8] sm:$0xff] }
 0x124   :  { %v4939_v61 = vpack.c.bf16 %v1441_v53, %v1416_v52  ;;  %v1402_v52 = vld [vmem:[#allocation7 + $0x140] sm:$0xff] }
 0x125   :  { %4896 = vmatpush1.bf16.msra.mxu1 %v4895_v58  ;;  %v1492_v58 = vld [vmem:[#allocation7 + $0x410] sm:$0xff]  ;;  %v1370_v53 = vld [vmem:[#allocation7 + $0x40] sm:$0xff] }
 0x126   :  { %4968 = vmatpush1.bf16.msra.mxu0 %v4967_v59  ;;  %4898 = vmatprep.subr.bf16.mxu1 %v4897_v60  ;;  %v1473_v59 = vld [vmem:[#allocation7 + $0x378] sm:$0xff]  ;;  %v1498_v60 = vld [vmem:[#allocation7 + $0x440] sm:$0xff]  ;;  %v4941_v63 = vpack.c.bf16 %v1492_v58, %v1467_v57 }
 0x127   :  { %4970 = vmatprep.subr.bf16.mxu0 %v4969_v1  ;;  %v1466_v1 = vld [vmem:[#allocation7 + $0x340] sm:$0xff]  ;;  %v5013_v4 = vpack.c.bf16 %v1498_v60, %v1473_v59  ;;  %v1401_v57 = vld [vmem:[#allocation7 + $0x138] sm:$0xff] }
 0x128   :  { %v4943_v10 = vpack.c.bf16 %v1491_v2, %v1466_v1  ;;  %v1421_v59 = vld [vmem:[#allocation7 + $0x1d8] sm:$0xff]  ;;  %v1446_v60 = vld [vmem:[#allocation7 + $0x2a0] sm:$0xff]  ;;  %v1452_v1 = vld [vmem:[#allocation7 + $0x2d0] sm:$0xff] }
 0x129   :  { %4900 = vmatpush1.bf16.msra.mxu1 %v4899_v7  ;;  %v1542_v7 = vld [vmem:[#allocation7 + $0x5a0] sm:$0xff] }
 0x12a   :  { %4972 = vmatpush1.bf16.msra.mxu0 %v4971_v8  ;;  %4902 = vmatprep.subr.bf16.mxu1 %v4901_v9  ;;  %v1523_v8 = vld [vmem:[#allocation7 + $0x508] sm:$0xff]  ;;  %v1548_v9 = vld [vmem:[#allocation7 + $0x5d0] sm:$0xff]  ;;  %v4945_v12 = vpack.c.bf16 %v1542_v7, %v1517_v6  ;;  %v4985_v7 = vpack.c.bf16 %v1446_v60, %v1421_v59 }
 0x12b   :  { %4974 = vmatprep.subr.bf16.mxu0 %v4973_v13  ;;  %v1516_v13 = vld [vmem:[#allocation7 + $0x4d0] sm:$0xff]  ;;  %v5017_v16 = vpack.c.bf16 %v1548_v9, %v1523_v8  ;;  %v1445_v9 = vld [vmem:[#allocation7 + $0x298] sm:$0xff] }
 0x12c   :  { %v4947_v22 = vpack.c.bf16 %v1541_v14, %v1516_v13  ;;  %v1420_v8 = vld [vmem:[#allocation7 + $0x1d0] sm:$0xff]  ;;  %v1471_v13 = vld [vmem:[#allocation7 + $0x368] sm:$0xff] }
 0x12d   :  { %4904 = vmatpush1.bf16.msra.mxu1 %v4903_v19  ;;  %v1592_v19 = vld [vmem:[#allocation7 + $0x730] sm:$0xff]  ;;  %v4987_v17 = vpack.c.bf16 %v1445_v9, %v1420_v8  ;;  %v1375_v8 = vld [vmem:[#allocation7 + $0x68] sm:$0xff]  ;;  %v1670_v9 = vld [vmem:[#allocation7 + $0x9a0] sm:$0xff] }
 0x12e   :  { %4976 = vmatpush1.bf16.msra.mxu0 %v4975_v20  ;;  %4906 = vmatprep.subr.bf16.mxu1 %v4905_v21  ;;  %v1573_v20 = vld [vmem:[#allocation7 + $0x698] sm:$0xff]  ;;  %v1598_v21 = vld [vmem:[#allocation7 + $0x760] sm:$0xff]  ;;  %v1496_v14 = vld [vmem:[#allocation7 + $0x430] sm:$0xff] }
 0x12f   :  { %4978 = vmatprep.subr.bf16.mxu0 %v4977_v26  ;;  %v4949_v26 = vpack.c.bf16 %v1592_v19, %v1567_v18  ;;  %v4989_v19 = vpack.c.bf16 %v1496_v14, %v1471_v13  ;;  %v1620_v60 = vld [vmem:[#allocation7 + $0x810] sm:$0xff]  ;;  %v1374_v13 = vld [vmem:[#allocation7 + $0x60] sm:$0xff]  ;;  %v1399_v14 = vld [vmem:[#allocation7 + $0x128] sm:$0xff] }
 0x131   :  { %4908 = vmatpush1.bf16.msra.mxu1 %v4907_v30  ;;  %v1572_v30 = vld [vmem:[#allocation7 + $0x690] sm:$0xff] }
 0x132   :  { %4980 = vmatpush1.bf16.msra.mxu0 %v4979_v31  ;;  %1711 = vmatprep.subr.mxu1 %v1663_v32  ;;  %v5021_v31 = vpack.c.bf16 %v1598_v21, %v1573_v20  ;;  %v1597_v32 = vld [vmem:[#allocation7 + $0x758] sm:$0xff]  ;;  %v1470_v20 = vld [vmem:[#allocation7 + $0x360] sm:$0xff]  ;;  %v1495_v21 = vld [vmem:[#allocation7 + $0x428] sm:$0xff] }
 0x133   :  { %1924 = vmatprep.subr.mxu0 %v1669_v33  ;;  %v1617_v33 = vld [vmem:[#allocation7 + $0x7f8] sm:$0xff]  ;;  %v5023_v37 = vpack.c.bf16 %v1597_v32, %v1572_v30  ;;  %v1527_v30 = vld [vmem:[#allocation7 + $0x528] sm:$0xff]  ;;  %v4991_v32 = vpack.c.bf16 %v1495_v21, %v1470_v20  ;;  %v1450_v20 = vld [vmem:[#allocation7 + $0x2c0] sm:$0xff] }
 0x134   :  { %v4953_v38 = vpack.c.bf16 %v1642_v34, %v1617_v33  ;;  %v4993_v34 = vpack.c.bf16 %v1546_v29, %v1521_v28  ;;  %v1676_v21 = vld [vmem:[#allocation7 + $0x9d0] sm:$0xff] }
 0x135   :  { %1712 = vmatpush1.msra.mxu1 %v1662_v35  ;;  %v1623_v35 = vld [vmem:[#allocation7 + $0x828] sm:$0xff] }
 0x136   :  { %1925 = vmatpush1.msra.mxu0 %v1668_v44  ;;  %4007 = vmatmul.mubr.msk.f32.vlgmr.msra.gmra.mrb[14].mxu1 %vm411_vm0, %v5912_v23  ;;  %v5025_v41 = vpack.c.bf16 %v1648_v36, %v1623_v35  ;;  %v4955_v44 = vpack.c.bf16 %v1641_v40, %v1616_v39  ;;  %v1520_v35 = vld [vmem:[#allocation7 + $0x4f0] sm:$0xff]  ;;  %v1545_v36 = vld [vmem:[#allocation7 + $0x5b8] sm:$0xff]  ;;  %v1571_v39 = vld [vmem:[#allocation7 + $0x688] sm:$0xff] }
 0x137   :  { %4934 = vmatprep.subr.bf16.mxu1 %v4933_v45  ;;  %4010 = vmatmul.mubr.msk.f32.vlgmr.msra.gmra.mrb[14].mxu0 %vm411_vm0, %v5912_v23  ;;  %v5027_v45 = vpack.c.bf16 %v1647_v43, %v1622_v42  ;;  %v1596_v40 = vld [vmem:[#allocation7 + $0x750] sm:$0xff]  ;;  %v1602_v42 = vld [vmem:[#allocation7 + $0x780] sm:$0xff]  ;;  %v4995_v43 = vpack.c.bf16 %v1545_v36, %v1520_v35  ;;  %v1449_v35 = vld [vmem:[#allocation7 + $0x2b8] sm:$0xff] }
 0x138   :  { %5006 = vmatprep.subr.bf16.mxu0 %v5005_v48  ;;  %4936 = vmatpush1.bf16.msra.mxu1 %v4935_v49  ;;  %v1371_v48 = vld [vmem:[#allocation7 + $0x48] sm:$0xff]  ;;  %v1666_v49 = vld [vmem:[#allocation7 + $0x980] sm:$0xff] }
 0x139   :  { %5008 = vmatpush1.bf16.msra.mxu0 %v5007_v50  ;;  %4938 = vmatprep.subr.bf16.mxu1 %v4937_v51  ;;  %v1396_v50 = vld [vmem:[#allocation7 + $0x110] sm:$0xff]  ;;  %v1377_v51 = vld [vmem:[#allocation7 + $0x78] sm:$0xff]  ;;  %v1430_v36 = vld [vmem:[#allocation7 + $0x220] sm:$0xff] }
 0x13a   :  { %5010 = vmatprep.subr.bf16.mxu0 %v5009_v55  ;;  %1893 = vmatprep.mubr.f32.mxu1 %v5763_v0  ;;  %v1376_v55 = vld [vmem:[#allocation7 + $0x70] sm:$0xff]  ;;  %v5053_v3 = vpack.c.bf16 %v1402_v52, %v1377_v51  ;;  %v1621_v51 = vld [vmem:[#allocation7 + $0x818] sm:$0xff]  ;;  %v1646_v52 = vld [vmem:[#allocation7 + $0x8e0] sm:$0xff] }
 0x13b   :  { %2106 = vmatprep.mubr.f32.mxu0 %v5763_v0  ;;  %v5055_v6 = vpack.c.bf16 %v1401_v57, %v1376_v55  ;;  %v5001_v59 = vpack.c.bf16 %v1646_v52, %v1621_v51  ;;  %v1550_v51 = vld [vmem:[#allocation7 + $0x5e0] sm:$0xff]  ;;  %v1556_v52 = vld [vmem:[#allocation7 + $0x610] sm:$0xff] }
 0x13c   :  { %4940 = vmatpush1.bf16.msra.mxu1 %v4939_v61  ;;  %v1672_v61 = vld [vmem:[#allocation7 + $0x9b0] sm:$0xff] }
 0x13d   :  { %5012 = vmatpush1.bf16.msra.mxu0 %v5011_v62  ;;  %4942 = vmatprep.subr.bf16.mxu1 %v4941_v63  ;;  %v4981_v62 = vpack.c.bf16 %v1396_v50, %v1371_v48  ;;  %v1427_v63 = vld [vmem:[#allocation7 + $0x208] sm:$0xff]  ;;  %v1576_v48 = vld [vmem:[#allocation7 + $0x6b0] sm:$0xff]  ;;  %v1601_v50 = vld [vmem:[#allocation7 + $0x778] sm:$0xff] }
 0x13e   :  { %5014 = vmatprep.subr.bf16.mxu0 %v5013_v4  ;;  %v4983_v4 = vpack.c.bf16 %v1395_v54, %v1370_v53  ;;  %v1627_v53 = vld [vmem:[#allocation7 + $0x848] sm:$0xff]  ;;  %v1652_v54 = vld [vmem:[#allocation7 + $0x910] sm:$0xff]  ;;  %v5071_v57 = vpack.c.bf16 %v1601_v50, %v1576_v48  ;;  %v1525_v50 = vld [vmem:[#allocation7 + $0x518] sm:$0xff] }
 0x140   :  { %4944 = vmatpush1.bf16.msra.mxu1 %v4943_v10  ;;  %v1426_v10 = vld [vmem:[#allocation7 + $0x200] sm:$0xff] }
 0x141   :  { %5016 = vmatpush1.bf16.msra.mxu0 %v5015_v11  ;;  %4946 = vmatprep.subr.bf16.mxu1 %v4945_v12  ;;  %v5057_v11 = vpack.c.bf16 %v1452_v1, %v1427_v63  ;;  %v1451_v12 = vld [vmem:[#allocation7 + $0x2c8] sm:$0xff]  ;;  %v1626_v63 = vld [vmem:[#allocation7 + $0x840] sm:$0xff] }
 0x142   :  { %5018 = vmatprep.subr.bf16.mxu0 %v5017_v16  ;;  %v1502_v16 = vld [vmem:[#allocation7 + $0x460] sm:$0xff]  ;;  %v5059_v18 = vpack.c.bf16 %v1451_v12, %v1426_v10  ;;  %v1651_v1 = vld [vmem:[#allocation7 + $0x908] sm:$0xff]  ;;  %v1400_v10 = vld [vmem:[#allocation7 + $0x130] sm:$0xff] }
 0x143   :  { %v1406_v12 = vld [vmem:[#allocation7 + $0x160] sm:$0xff] }
 0x144   :  { %4948 = vmatpush1.bf16.msra.mxu1 %v4947_v22  ;;  %v1476_v22 = vld [vmem:[#allocation7 + $0x390] sm:$0xff] }
 0x145   :  { %5020 = vmatpush1.bf16.msra.mxu0 %v5019_v25  ;;  %4950 = vmatprep.subr.bf16.mxu1 %v4949_v26  ;;  %v5061_v25 = vpack.c.bf16 %v1502_v16, %v1477_v15  ;;  %v1501_v26 = vld [vmem:[#allocation7 + $0x458] sm:$0xff]  ;;  %v1380_v15 = vld [vmem:[#allocation7 + $0x90] sm:$0xff] }
 0x146   :  { %5022 = vmatprep.subr.bf16.mxu0 %v5021_v31  ;;  %v1552_v31 = vld [vmem:[#allocation7 + $0x5f0] sm:$0xff]  ;;  %v5063_v33 = vpack.c.bf16 %v1501_v26, %v1476_v22  ;;  %v5029_v22 = vpack.c.bf16 %v1400_v10, %v1375_v8  ;;  %v1599_v10 = vld [vmem:[#allocation7 + $0x768] sm:$0xff] }
 0x147   :  { %v1456_v26 = vld [vmem:[#allocation7 + $0x2f0] sm:$0xff] }
 0x148   :  { %4952 = vmatpush1.bf16.msra.mxu1 %v4951_v24  ;;  %v1526_v24 = vld [vmem:[#allocation7 + $0x520] sm:$0xff] }
 0x149   :  { %5024 = vmatpush1.bf16.msra.mxu0 %v5023_v37  ;;  %4954 = vmatprep.subr.bf16.mxu1 %v4953_v38  ;;  %v5065_v37 = vpack.c.bf16 %v1552_v31, %v1527_v30  ;;  %v1551_v38 = vld [vmem:[#allocation7 + $0x5e8] sm:$0xff]  ;;  %v5031_v30 = vpack.c.bf16 %v1399_v14, %v1374_v13  ;;  %v1605_v13 = vld [vmem:[#allocation7 + $0x798] sm:$0xff] }
 0x14a   :  { %5026 = vmatprep.subr.bf16.mxu0 %v5025_v41  ;;  %v1577_v41 = vld [vmem:[#allocation7 + $0x6b8] sm:$0xff] }
 0x14b   :  { %v1625_v14 = vld [vmem:[#allocation7 + $0x838] sm:$0xff] }
 0x14c   :  { %4956 = vmatpush1.bf16.msra.mxu1 %v4955_v44  ;;  %v5932_v56 = vpop.f32.mrb[0].mxu1  ;;  %v5067_v44 = vpack.c.bf16 %v1551_v38, %v1526_v24  ;;  %v1475_v38 = vld [vmem:[#allocation7 + $0x388] sm:$0xff] }
 0x14d   :  { %5028 = vmatpush1.bf16.msra.mxu0 %v5027_v45  ;;  %1853 = vmatprep.subr.mxu1 %v1667_v46  ;;  %v5934_v58 = vpop.f32.mrb[1].mxu1  ;;  %v4997_v45 = vpack.c.bf16 %v1596_v40, %v1571_v39  ;;  %v1570_v46 = vld [vmem:[#allocation7 + $0x680] sm:$0xff]  ;;  %v1500_v39 = vld [vmem:[#allocation7 + $0x450] sm:$0xff]  ;;  %v1481_v40 = vld [vmem:[#allocation7 + $0x3b8] sm:$0xff] }
 0x14e   :  { %2066 = vmatprep.subr.mxu0 %v1673_v47  ;;  %v5936_v2 = vpop.f32.mrb[0].mxu0  ;;  %v1595_v47 = vld [vmem:[#allocation7 + $0x748] sm:$0xff] }
 0x14f   :  { %v5938_v5 = vpop.f32.mrb[1].mxu0  ;;  %v4999_v55 = vpack.c.bf16 %v1595_v47, %v1570_v46  ;;  %v1499_v46 = vld [vmem:[#allocation7 + $0x448] sm:$0xff]  ;;  %v1480_v47 = vld [vmem:[#allocation7 + $0x3b0] sm:$0xff] }
 0x150   :  { %1854 = vmatpush1.msra.mxu1 %v1666_v49  ;;  %v5069_v49 = vpack.c.bf16 %v1602_v42, %v1577_v41  ;;  %v1506_v41 = vld [vmem:[#allocation7 + $0x480] sm:$0xff] }
 0x151   :  { %2067 = vmatpush1.msra.mxu0 %v1672_v61  ;;  %4009 = vmatmul.mubr.msk.f32.vlgmr.msra.gmra.mrb[16].mxu1 %vm411_vm0, %v5912_v23  ;;  %v1645_v61 = vld [vmem:[#allocation7 + $0x8d8] sm:$0xff]  ;;  %v5109_v48 = vpack.c.bf16 %v1506_v41, %v1481_v40  ;;  %v1410_v40 = vld [vmem:[#allocation7 + $0x180] sm:$0xff] }
 0x152   :  { %4982 = vmatprep.subr.bf16.mxu1 %v4981_v62  ;;  %4012 = vmatmul.mubr.msk.f32.vlgmr.msra.gmra.mrb[16].mxu0 %vm411_vm0, %v5912_v23  ;;  %v5073_v62 = vpack.c.bf16 %v1652_v54, %v1627_v53  ;;  %v1378_v41 = vld [vmem:[#allocation7 + $0x80] sm:$0xff] }
 0x153   :  { %5054 = vmatprep.subr.bf16.mxu0 %v5053_v3  ;;  %4984 = vmatpush1.bf16.msra.mxu1 %v4983_v4  ;;  %v5003_v3 = vpack.c.bf16 %v1645_v61, %v1620_v60  ;;  %v5075_v4 = vpack.c.bf16 %v1651_v1, %v1626_v63  ;;  %v1530_v60 = vld [vmem:[#allocation7 + $0x540] sm:$0xff]  ;;  %v1575_v63 = vld [vmem:[#allocation7 + $0x6a8] sm:$0xff]  ;;  %v1600_v1 = vld [vmem:[#allocation7 + $0x770] sm:$0xff] }
 0x154   :  { %5056 = vmatpush1.bf16.msra.mxu0 %v5055_v6  ;;  %4986 = vmatprep.subr.bf16.mxu1 %v4985_v7  ;;  %v1671_v6 = vld [vmem:[#allocation7 + $0x9a8] sm:$0xff]  ;;  %v1677_v7 = vld [vmem:[#allocation7 + $0x9d8] sm:$0xff]  ;;  %v5045_v8 = vpack.c.bf16 %v1600_v1, %v1575_v63  ;;  %v5968_v63 = vld [vmem:[#allocation2] sm:$0xff] }
 0x155   :  { %5058 = vmatprep.subr.bf16.mxu0 %v5057_v11  ;;  %2035 = vmatprep.mubr.f32.mxu1 %v5763_v0  ;;  %v1381_v11 = vld [vmem:[#allocation7 + $0x98] sm:$0xff] }
 0x156   :  { %2248 = vmatprep.mubr.f32.mxu0 %v5763_v0  ;;  %v5101_v29 = vpack.c.bf16 %v1406_v12, %v1381_v11  ;;  %v1580_v11 = vld [vmem:[#allocation7 + $0x6d0] sm:$0xff] }
 0x157   :  { %4988 = vmatpush1.bf16.msra.mxu1 %v4987_v17  ;;  %v1405_v17 = vld [vmem:[#allocation7 + $0x158] sm:$0xff] }
 0x158   :  { %5060 = vmatpush1.bf16.msra.mxu0 %v5059_v18  ;;  %4990 = vmatprep.subr.bf16.mxu1 %v4989_v19  ;;  %v1425_v19 = vld [vmem:[#allocation7 + $0x1f8] sm:$0xff] }
 0x159   :  { %5062 = vmatprep.subr.bf16.mxu0 %v5061_v25  ;;  %v1431_v25 = vld [vmem:[#allocation7 + $0x228] sm:$0xff] }
 0x15a   :  { %v5105_v24 = vpack.c.bf16 %v1456_v26, %v1431_v25  ;;  %v1624_v25 = vld [vmem:[#allocation7 + $0x830] sm:$0xff]  ;;  %v1649_v26 = vld [vmem:[#allocation7 + $0x8f8] sm:$0xff] }
 0x15b   :  { %4992 = vmatpush1.bf16.msra.mxu1 %v4991_v32  ;;  %v5103_v32 = vpack.c.bf16 %v1405_v17, %v1380_v15  ;;  %v1650_v15 = vld [vmem:[#allocation7 + $0x900] sm:$0xff]  ;;  %v1631_v17 = vld [vmem:[#allocation7 + $0x868] sm:$0xff] }
 0x15c   :  { %5064 = vmatpush1.bf16.msra.mxu0 %v5063_v33  ;;  %4994 = vmatprep.subr.bf16.mxu1 %v4993_v34  ;;  %v5033_v33 = vpack.c.bf16 %v1450_v20, %v1425_v19  ;;  %v1424_v34 = vld [vmem:[#allocation7 + $0x1f0] sm:$0xff] }
 0x15d   :  { %5066 = vmatprep.subr.bf16.mxu0 %v5065_v37  ;;  %v1455_v37 = vld [vmem:[#allocation7 + $0x2e8] sm:$0xff]  ;;  %v5035_v42 = vpack.c.bf16 %v1449_v35, %v1424_v34  ;;  %v1656_v19 = vld [vmem:[#allocation7 + $0x930] sm:$0xff] }
 0x15e   :  { %v1675_v35 = vld [vmem:[#allocation7 + $0x9c8] sm:$0xff] }
 0x15f   :  { %4996 = vmatpush1.bf16.msra.mxu1 %v4995_v43  ;;  %v5107_v43 = vpack.c.bf16 %v1455_v37, %v1430_v36  ;;  %v1681_v36 = vld [vmem:[#allocation7 + $0x9f8] sm:$0xff]  ;;  %v1674_v37 = vld [vmem:[#allocation7 + $0x9c0] sm:$0xff] }
 0x160   :  { %5068 = vmatpush1.bf16.msra.mxu0 %v5067_v44  ;;  %4998 = vmatprep.subr.bf16.mxu1 %v4997_v45  ;;  %v5037_v44 = vpack.c.bf16 %v1500_v39, %v1475_v38  ;;  %v1474_v45 = vld [vmem:[#allocation7 + $0x380] sm:$0xff]  ;;  %v1404_v38 = vld [vmem:[#allocation7 + $0x150] sm:$0xff]  ;;  %v1385_v39 = vld [vmem:[#allocation7 + $0xb8] sm:$0xff] }
 0x161   :  { %5070 = vmatprep.subr.bf16.mxu0 %v5069_v49  ;;  %v1505_v49 = vld [vmem:[#allocation7 + $0x478] sm:$0xff]  ;;  %v5039_v53 = vpack.c.bf16 %v1499_v46, %v1474_v45 }
 0x162   :  { %v5111_v54 = vpack.c.bf16 %v1505_v49, %v1480_v47  ;;  %v1409_v45 = vld [vmem:[#allocation7 + $0x178] sm:$0xff]  ;;  %v1680_v49 = vld [vmem:[#allocation7 + $0x9f0] sm:$0xff] }
 0x163   :  { %5000 = vmatpush1.bf16.msra.mxu1 %v4999_v55  ;;  %v5041_v55 = vpack.c.bf16 %v1550_v51, %v1525_v50  ;;  %v1429_v47 = vld [vmem:[#allocation7 + $0x218] sm:$0xff]  ;;  %v1435_v51 = vld [vmem:[#allocation7 + $0x248] sm:$0xff] }
 0x164   :  { %5072 = vmatpush1.bf16.msra.mxu0 %v5071_v57  ;;  %5002 = vmatprep.subr.bf16.mxu1 %v5001_v59  ;;  %v1524_v57 = vld [vmem:[#allocation7 + $0x510] sm:$0xff]  ;;  %v1549_v59 = vld [vmem:[#allocation7 + $0x5d8] sm:$0xff] }
 0x165   :  { %5074 = vmatprep.subr.bf16.mxu0 %v5073_v62  ;;  %v1555_v62 = vld [vmem:[#allocation7 + $0x608] sm:$0xff] }
 0x167   :  { %5004 = vmatpush1.bf16.msra.mxu1 %v5003_v3  ;;  %v5946_v16 = vpop.f32.mrb[2].mxu1  ;;  %v1581_v3 = vld [vmem:[#allocation7 + $0x6d8] sm:$0xff] }
 0x168   :  { %5076 = vmatpush1.bf16.msra.mxu0 %v5075_v4  ;;  %1995 = vmatprep.subr.mxu1 %v1671_v6  ;;  %v5948_v18 = vpop.f32.mrb[3].mxu1  ;;  %v1606_v4 = vld [vmem:[#allocation7 + $0x7a0] sm:$0xff]  ;;  %v5043_v6 = vpack.c.bf16 %v1549_v59, %v1524_v57 }
 0x169   :  { %2208 = vmatprep.subr.mxu0 %v1677_v7  ;;  %v5950_v28 = vpop.f32.mrb[2].mxu0  ;;  %v5115_v7 = vpack.c.bf16 %v1555_v62, %v1530_v60  ;;  %v5117_v12 = vpack.c.bf16 %v1606_v4, %v1581_v3  ;;  %v1428_v60 = vld [vmem:[#allocation7 + $0x210] sm:$0xff]  ;;  %v1434_v62 = vld [vmem:[#allocation7 + $0x240] sm:$0xff]  ;;  %v1459_v3 = vld [vmem:[#allocation7 + $0x308] sm:$0xff] }
 0x16a   :  { %v5952_v31 = vpop.f32.mrb[3].mxu0  ;;  %v1479_v4 = vld [vmem:[#allocation7 + $0x3a8] sm:$0xff] }
 0x16b   :  { %1996 = vmatpush1.msra.mxu1 %v1670_v9  ;;  %v1574_v9 = vld [vmem:[#allocation7 + $0x6a0] sm:$0xff] }
 0x16c   :  { %2209 = vmatpush1.msra.mxu0 %v1676_v21  ;;  %4011 = vmatmul.mubr.msk.f32.vlgmr.msra.gmra.mrb[18].mxu1 %vm411_vm0, %v5912_v23  ;;  %v5047_v20 = vpack.c.bf16 %v1599_v10, %v1574_v9  ;;  %v5119_v21 = vpack.c.bf16 %v1605_v13, %v1580_v11  ;;  %v5155_v10 = vpack.c.bf16 %v1459_v3, %v1434_v62  ;;  %v1503_v13 = vld [vmem:[#allocation7 + $0x468] sm:$0xff]  ;;  %v1634_v62 = vld [vmem:[#allocation7 + $0x880] sm:$0xff] }
 0x16d   :  { %5030 = vmatprep.subr.bf16.mxu1 %v5029_v22  ;;  %4014 = vmatmul.mubr.msk.f32.vlgmr.msra.gmra.mrb[18].mxu0 %vm411_vm0, %v5912_v23  ;;  %v1531_v23 = vld [vmem:[#allocation7 + $0x548] sm:$0xff]  ;;  %v5049_v22 = vpack.c.bf16 %v1650_v15, %v1625_v14  ;;  %v1484_v14 = vld [vmem:[#allocation7 + $0x3d0] sm:$0xff] }
 0x16e   :  { %5102 = vmatprep.subr.bf16.mxu0 %v5101_v29  ;;  %5032 = vmatpush1.bf16.msra.mxu1 %v5031_v30  ;;  %v5113_v61 = vpack.c.bf16 %v1556_v52, %v1531_v23  ;;  %v5121_v29 = vpack.c.bf16 %v1656_v19, %v1631_v17  ;;  %v1630_v30 = vld [vmem:[#allocation7 + $0x860] sm:$0xff]  ;;  %v1460_v23 = vld [vmem:[#allocation7 + $0x310] sm:$0xff]  ;;  %v1509_v17 = vld [vmem:[#allocation7 + $0x498] sm:$0xff] }
 0x16f   :  { %5104 = vmatpush1.bf16.msra.mxu0 %v5103_v32  ;;  %5034 = vmatprep.subr.bf16.mxu1 %v5033_v33  ;;  %v1655_v32 = vld [vmem:[#allocation7 + $0x928] sm:$0xff]  ;;  %v5051_v33 = vpack.c.bf16 %v1649_v26, %v1624_v25  ;;  %v5153_v1 = vpack.c.bf16 %v1460_v23, %v1435_v51  ;;  %v1529_v19 = vld [vmem:[#allocation7 + $0x538] sm:$0xff]  ;;  %v5159_v26 = vpack.c.bf16 %v1509_v17, %v1484_v14  ;;  %v1660_v23 = vld [vmem:[#allocation7 + $0x950] sm:$0xff] }
 0x170   :  { %5106 = vmatprep.subr.bf16.mxu0 %v5105_v24  ;;  %2177 = vmatprep.mubr.f32.mxu1 %v5763_v0  ;;  %v5123_v34 = vpack.c.bf16 %v1655_v32, %v1630_v30  ;;  %v1379_v24 = vld [vmem:[#allocation7 + $0x88] sm:$0xff]  ;;  %v1528_v30 = vld [vmem:[#allocation7 + $0x530] sm:$0xff]  ;;  %v1553_v32 = vld [vmem:[#allocation7 + $0x5f8] sm:$0xff] }
 0x171   :  { %2390 = vmatprep.mubr.f32.mxu0 %v5763_v0  ;;  %v5077_v50 = vpack.c.bf16 %v1404_v38, %v1379_v24  ;;  %v1604_v24 = vld [vmem:[#allocation7 + $0x790] sm:$0xff]  ;;  %v1610_v38 = vld [vmem:[#allocation7 + $0x7c0] sm:$0xff]  ;;  %v1635_v51 = vld [vmem:[#allocation7 + $0x888] sm:$0xff] }
 0x172   :  { %5036 = vmatpush1.bf16.msra.mxu1 %v5035_v42  ;;  %v1403_v42 = vld [vmem:[#allocation7 + $0x148] sm:$0xff]  ;;  %v1433_v14 = vld [vmem:[#allocation7 + $0x238] sm:$0xff]  ;;  %v1458_v17 = vld [vmem:[#allocation7 + $0x300] sm:$0xff] }
 0x173   :  { %5108 = vmatpush1.bf16.msra.mxu0 %v5107_v43  ;;  %5038 = vmatprep.subr.bf16.mxu1 %v5037_v44  ;;  %v1384_v43 = vld [vmem:[#allocation7 + $0xb0] sm:$0xff] }
 0x174   :  { %5110 = vmatprep.subr.bf16.mxu0 %v5109_v48  ;;  %v1454_v48 = vld [vmem:[#allocation7 + $0x2e0] sm:$0xff]  ;;  %v5151_v57 = vpack.c.bf16 %v1409_v45, %v1384_v43  ;;  %v1603_v43 = vld [vmem:[#allocation7 + $0x788] sm:$0xff]  ;;  %v1584_v45 = vld [vmem:[#allocation7 + $0x6f0] sm:$0xff] }
 0x175   :  { %v5081_v59 = vpack.c.bf16 %v1454_v48, %v1429_v47  ;;  %v1609_v48 = vld [vmem:[#allocation7 + $0x7b8] sm:$0xff] }
 0x176   :  { %5040 = vmatpush1.bf16.msra.mxu1 %v5039_v53  ;;  %v5149_v53 = vpack.c.bf16 %v1410_v40, %v1385_v39  ;;  %v5091_v39 = vpack.c.bf16 %v1553_v32, %v1528_v30 }
 0x177   :  { %5112 = vmatpush1.bf16.msra.mxu0 %v5111_v54  ;;  %5042 = vmatprep.subr.bf16.mxu1 %v5041_v55  ;;  %v5079_v54 = vpack.c.bf16 %v1403_v42, %v1378_v41  ;;  %v1578_v42 = vld [vmem:[#allocation7 + $0x6c0] sm:$0xff] }
 0x178   :  { %5114 = vmatprep.subr.bf16.mxu0 %v5113_v61  ;;  %v1453_v61 = vld [vmem:[#allocation7 + $0x2d8] sm:$0xff] }
 0x179   :  { %v5083_v9 = vpack.c.bf16 %v1453_v61, %v1428_v60  ;;  %v1653_v60 = vld [vmem:[#allocation7 + $0x918] sm:$0xff]  ;;  %v5169_v61 = vpack.c.bf16 %v1660_v23, %v1635_v51  ;;  %v1507_v51 = vld [vmem:[#allocation7 + $0x488] sm:$0xff] }
 0x17a   :  { %5044 = vmatpush1.bf16.msra.mxu1 %v5043_v6  ;;  %v1504_v6 = vld [vmem:[#allocation7 + $0x470] sm:$0xff]  ;;  %v1533_v23 = vld [vmem:[#allocation7 + $0x558] sm:$0xff] }
 0x17b   :  { %5116 = vmatpush1.bf16.msra.mxu0 %v5115_v7  ;;  %5046 = vmatprep.subr.bf16.mxu1 %v5045_v8  ;;  %v1485_v7 = vld [vmem:[#allocation7 + $0x3d8] sm:$0xff]  ;;  %v1510_v8 = vld [vmem:[#allocation7 + $0x4a0] sm:$0xff]  ;;  %v5085_v11 = vpack.c.bf16 %v1504_v6, %v1479_v4  ;;  %v1679_v6 = vld [vmem:[#allocation7 + $0x9e8] sm:$0xff] }
 0x17c   :  { %5118 = vmatprep.subr.bf16.mxu0 %v5117_v12  ;;  %v1478_v12 = vld [vmem:[#allocation7 + $0x3a0] sm:$0xff]  ;;  %v5157_v15 = vpack.c.bf16 %v1510_v8, %v1485_v7  ;;  %v1685_v7 = vld [vmem:[#allocation7 + $0xa18] sm:$0xff] }
 0x17d   :  { %v5087_v25 = vpack.c.bf16 %v1503_v13, %v1478_v12  ;;  %v1678_v8 = vld [vmem:[#allocation7 + $0x9e0] sm:$0xff]  ;;  %v1407_v12 = vld [vmem:[#allocation7 + $0x168] sm:$0xff] }
 0x17e   :  { %5048 = vmatpush1.bf16.msra.mxu1 %v5047_v20  ;;  %v1554_v20 = vld [vmem:[#allocation7 + $0x600] sm:$0xff] }
 0x17f   :  { %5120 = vmatpush1.bf16.msra.mxu0 %v5119_v21  ;;  %5050 = vmatprep.subr.bf16.mxu1 %v5049_v22  ;;  %v1535_v21 = vld [vmem:[#allocation7 + $0x568] sm:$0xff]  ;;  %v1560_v22 = vld [vmem:[#allocation7 + $0x630] sm:$0xff] }
 0x180   :  { %5122 = vmatprep.subr.bf16.mxu0 %v5121_v29  ;;  %v5089_v29 = vpack.c.bf16 %v1554_v20, %v1529_v19  ;;  %v2675_v19 = vld [vmem:[#allocation8 + $0x80] sm:$0xff]  ;;  %v2676_v20 = vld [vmem:[#allocation8 + $0x88] sm:$0xff] }
 0x182   :  { %5052 = vmatpush1.bf16.msra.mxu1 %v5051_v33  ;;  %v5960_v44 = vpop.f32.mrb[4].mxu1  ;;  %v1534_v33 = vld [vmem:[#allocation7 + $0x560] sm:$0xff] }
 0x183   :  { %5124 = vmatpush1.bf16.msra.mxu0 %v5123_v34  ;;  %2137 = vmatprep.subr.mxu1 %v1675_v35  ;;  %v5962_v46 = vpop.f32.mrb[5].mxu1  ;;  %v5161_v34 = vpack.c.bf16 %v1560_v22, %v1535_v21  ;;  %v1559_v35 = vld [vmem:[#allocation7 + $0x628] sm:$0xff]  ;;  %v1684_v21 = vld [vmem:[#allocation7 + $0xa10] sm:$0xff] }
 0x184   :  { %2350 = vmatprep.subr.mxu0 %v1681_v36  ;;  %v5964_v52 = vpop.f32.mrb[4].mxu0  ;;  %v1579_v36 = vld [vmem:[#allocation7 + $0x6c8] sm:$0xff]  ;;  %v5163_v40 = vpack.c.bf16 %v1559_v35, %v1534_v33  ;;  %v2677_v33 = vld [vmem:[#allocation8 + $0x90] sm:$0xff]  ;;  %v5129_v35 = vpack.c.bf16 %v1458_v17, %v1433_v14 }
 0x185   :  { %v5966_v55 = vpop.f32.mrb[5].mxu0  ;;  %v5093_v41 = vpack.c.bf16 %v1604_v24, %v1579_v36  ;;  %v1432_v36 = vld [vmem:[#allocation7 + $0x230] sm:$0xff]  ;;  %v1457_v24 = vld [vmem:[#allocation7 + $0x2f8] sm:$0xff]  ;;  %v2683_v17 = vld [vmem:[#allocation8 + $0xc0] sm:$0xff] }
 0x186   :  { %2138 = vmatpush1.msra.mxu1 %v1674_v37  ;;  %v1585_v37 = vld [vmem:[#allocation7 + $0x6f8] sm:$0xff] }
 0x187   :  { %2351 = vmatpush1.msra.mxu0 %v1680_v49  ;;  %4013 = vmatmul.mubr.msk.f32.vlgmr.msra.gmra.mrb[20].mxu1 %vm411_vm0, %v5968_v63  ;;  %v5165_v47 = vpack.c.bf16 %v1610_v38, %v1585_v37  ;;  %v1629_v49 = vld [vmem:[#allocation7 + $0x858] sm:$0xff]  ;;  %v5191_v37 = vpack.c.bf16 %v2676_v20, %v2675_v19  ;;  %v1483_v38 = vld [vmem:[#allocation7 + $0x3c8] sm:$0xff]  ;;  %v2684_v19 = vld [vmem:[#allocation8 + $0xc8] sm:$0xff] }
 0x188   :  { %5078 = vmatprep.subr.bf16.mxu1 %v5077_v50  ;;  %4016 = vmatmul.mubr.msk.f32.vlgmr.msra.gmra.mrb[20].mxu0 %vm411_vm0, %v5968_v63  ;;  %v1654_v50 = vld [vmem:[#allocation7 + $0x920] sm:$0xff] }
 0x189   :  { %5150 = vmatprep.subr.bf16.mxu0 %v5149_v53  ;;  %5080 = vmatpush1.bf16.msra.mxu1 %v5079_v54  ;;  %v5095_v53 = vpack.c.bf16 %v1603_v43, %v1578_v42  ;;  %v5167_v54 = vpack.c.bf16 %v1609_v48, %v1584_v45  ;;  %v2661_v42 = vld [vmem:[#allocation8 + $0x10] sm:$0xff]  ;;  %v2662_v43 = vld [vmem:[#allocation8 + $0x18] sm:$0xff]  ;;  %v5131_v45 = vpack.c.bf16 %v1457_v24, %v1432_v36  ;;  %v2680_v48 = vld [vmem:[#allocation8 + $0xa8] sm:$0xff] }
 0x18a   :  { %5152 = vmatpush1.bf16.msra.mxu0 %v5151_v57  ;;  %5082 = vmatprep.subr.bf16.mxu1 %v5081_v59  ;;  %v5097_v57 = vpack.c.bf16 %v1654_v50, %v1629_v49  ;;  %v1628_v59 = vld [vmem:[#allocation7 + $0x850] sm:$0xff]  ;;  %v1482_v50 = vld [vmem:[#allocation7 + $0x3c0] sm:$0xff]  ;;  %v2685_v24 = vld [vmem:[#allocation8 + $0xd0] sm:$0xff] }
 0x18b   :  { %5154 = vmatprep.subr.bf16.mxu0 %v5153_v1  ;;  %2319 = vmatprep.mubr.f32.mxu1 %v5763_v0  ;;  %v1659_v1 = vld [vmem:[#allocation7 + $0x948] sm:$0xff]  ;;  %v5099_v3 = vpack.c.bf16 %v1653_v60, %v1628_v59  ;;  %v2664_v60 = vld [vmem:[#allocation8 + $0x28] sm:$0xff] }
 0x18c   :  { %2532 = vmatprep.mubr.f32.mxu0 %v5763_v0  ;;  %v5171_v4 = vpack.c.bf16 %v1659_v1, %v1634_v62  ;;  %v2663_v59 = vld [vmem:[#allocation8 + $0x20] sm:$0xff]  ;;  %v2681_v62 = vld [vmem:[#allocation8 + $0xb0] sm:$0xff]  ;;  %v2682_v1 = vld [vmem:[#allocation8 + $0xb8] sm:$0xff] }
 0x18d   :  { %5084 = vmatpush1.bf16.msra.mxu1 %v5083_v9  ;;  %v1383_v9 = vld [vmem:[#allocation7 + $0xa8] sm:$0xff] }
 0x18e   :  { %5156 = vmatpush1.bf16.msra.mxu0 %v5155_v10  ;;  %5086 = vmatprep.subr.bf16.mxu1 %v5085_v11  ;;  %v1408_v10 = vld [vmem:[#allocation7 + $0x170] sm:$0xff]  ;;  %v1382_v11 = vld [vmem:[#allocation7 + $0xa0] sm:$0xff] }
 0x18f   :  { %5158 = vmatprep.subr.bf16.mxu0 %v5157_v15  ;;  %v5125_v22 = vpack.c.bf16 %v1408_v10, %v1383_v9  ;;  %v5127_v30 = vpack.c.bf16 %v1407_v12, %v1382_v11  ;;  %v5201_v9 = vpack.c.bf16 %v2664_v60, %v2663_v59  ;;  %v5203_v10 = vpack.c.bf16 %v2682_v1, %v2681_v62  ;;  %v2665_v11 = vld [vmem:[#allocation8 + $0x30] sm:$0xff]  ;;  %v2666_v12 = vld [vmem:[#allocation8 + $0x38] sm:$0xff]  ;;  %v2671_v59 = vld [vmem:[#allocation8 + $0x60] sm:$0xff] }
 0x190   :  { %v2672_v60 = vld [vmem:[#allocation8 + $0x68] sm:$0xff]  ;;  %v2689_v1 = vld [vmem:[#allocation8 + $0xf0] sm:$0xff] }
 0x191   :  { %5088 = vmatpush1.bf16.msra.mxu1 %v5087_v25 }
 0x192   :  { %5160 = vmatpush1.bf16.msra.mxu0 %v5159_v26  ;;  %5090 = vmatprep.subr.bf16.mxu1 %v5089_v29  ;;  %v2659_v26 = vld [vmem:[#allocation8] sm:$0xff]  ;;  %v2660_v29 = vld [vmem:[#allocation8 + $0x8] sm:$0xff] }
 0x193   :  { %5162 = vmatprep.subr.bf16.mxu0 %v5161_v34  ;;  %v2678_v34 = vld [vmem:[#allocation8 + $0x98] sm:$0xff] }
 0x195   :  { %5092 = vmatpush1.bf16.msra.mxu1 %v5091_v39  ;;  %v1508_v39 = vld [vmem:[#allocation7 + $0x490] sm:$0xff] }
 0x196   :  { %5164 = vmatpush1.bf16.msra.mxu0 %v5163_v40  ;;  %5094 = vmatprep.subr.bf16.mxu1 %v5093_v41  ;;  %v5193_v40 = vpack.c.bf16 %v2660_v29, %v2659_v26  ;;  %v5195_v41 = vpack.c.bf16 %v2678_v34, %v2677_v33  ;;  %v5133_v49 = vpack.c.bf16 %v1508_v39, %v1483_v38  ;;  %v1633_v26 = vld [vmem:[#allocation7 + $0x878] sm:$0xff]  ;;  %v1658_v29 = vld [vmem:[#allocation7 + $0x940] sm:$0xff]  ;;  %v2667_v34 = vld [vmem:[#allocation8 + $0x40] sm:$0xff] }
 0x197   :  { %5166 = vmatprep.subr.bf16.mxu0 %v5165_v47  ;;  %v2679_v47 = vld [vmem:[#allocation8 + $0xa0] sm:$0xff]  ;;  %v5207_v33 = vpack.c.bf16 %v2684_v19, %v2683_v17  ;;  %v5145_v38 = vpack.c.bf16 %v1658_v29, %v1633_v26  ;;  %v1632_v39 = vld [vmem:[#allocation7 + $0x870] sm:$0xff] }
 0x198   :  { %v2739_v17 = vld [vmem:[#allocation8 + $0x280] sm:$0xff]  ;;  %v2740_v19 = vld [vmem:[#allocation8 + $0x288] sm:$0xff] }
 0x199   :  { %5096 = vmatpush1.bf16.msra.mxu1 %v5095_v53  ;;  %v1558_v53 = vld [vmem:[#allocation7 + $0x620] sm:$0xff]  ;;  %v5255_v29 = vpack.c.bf16 %v2740_v19, %v2739_v17 }
 0x19a   :  { %5168 = vmatpush1.bf16.msra.mxu0 %v5167_v54  ;;  %5098 = vmatprep.subr.bf16.mxu1 %v5097_v57  ;;  %v5197_v54 = vpack.c.bf16 %v2662_v43, %v2661_v42  ;;  %v5199_v57 = vpack.c.bf16 %v2680_v48, %v2679_v47  ;;  %v2669_v43 = vld [vmem:[#allocation8 + $0x50] sm:$0xff]  ;;  %v2687_v48 = vld [vmem:[#allocation8 + $0xe0] sm:$0xff] }
 0x19b   :  { %5170 = vmatprep.subr.bf16.mxu0 %v5169_v61  ;;  %v5135_v61 = vpack.c.bf16 %v1507_v51, %v1482_v50  ;;  %v1683_v50 = vld [vmem:[#allocation7 + $0xa08] sm:$0xff] }
 0x19d   :  { %5100 = vmatpush1.bf16.msra.mxu1 %v5099_v3  ;;  %v5976_v13 = vpop.f32.mrb[6].mxu1  ;;  %v5137_v3 = vpack.c.bf16 %v1558_v53, %v1533_v23  ;;  %v1386_v23 = vld [vmem:[#allocation7 + $0xc0] sm:$0xff]  ;;  %v1411_v53 = vld [vmem:[#allocation7 + $0x188] sm:$0xff] }
 0x19e   :  { %5172 = vmatpush1.bf16.msra.mxu0 %v5171_v4  ;;  %2279 = vmatprep.subr.mxu1 %v1679_v6  ;;  %v5978_v15 = vpop.f32.mrb[7].mxu1  ;;  %v1532_v4 = vld [vmem:[#allocation7 + $0x550] sm:$0xff]  ;;  %v1557_v6 = vld [vmem:[#allocation7 + $0x618] sm:$0xff] }
 0x19f   :  { %2492 = vmatprep.subr.mxu0 %v1685_v7  ;;  %v5980_v25 = vpop.f32.mrb[6].mxu0  ;;  %v1583_v7 = vld [vmem:[#allocation7 + $0x6e8] sm:$0xff]  ;;  %v5139_v14 = vpack.c.bf16 %v1557_v6, %v1532_v4  ;;  %v5174_v4 = vpack.c.bf16 %v1411_v53, %v1386_v23 }
 0x1a0   :  { %v5982_v32 = vpop.f32.mrb[7].mxu0 }
 0x1a1   :  { %2280 = vmatpush1.msra.mxu1 %v1678_v8  ;;  %v1608_v8 = vld [vmem:[#allocation7 + $0x7b0] sm:$0xff] }
 0x1a2   :  { %2493 = vmatpush1.msra.mxu0 %v1684_v21  ;;  %4015 = vmatmul.mubr.msk.f32.vlgmr.msra.gmra.mrb[22].mxu1 %vm411_vm0, %v5968_v63  ;;  %v5141_v20 = vpack.c.bf16 %v1608_v8, %v1583_v7  ;;  %v1582_v21 = vld [vmem:[#allocation7 + $0x6e0] sm:$0xff]  ;;  %v1436_v7 = vld [vmem:[#allocation7 + $0x250] sm:$0xff]  ;;  %v1461_v8 = vld [vmem:[#allocation7 + $0x318] sm:$0xff] }
 0x1a3   :  { %5126 = vmatprep.subr.bf16.mxu1 %v5125_v22  ;;  %4018 = vmatmul.mubr.msk.f32.vlgmr.msra.gmra.mrb[22].mxu0 %vm411_vm0, %v5968_v63  ;;  %v1607_v22 = vld [vmem:[#allocation7 + $0x7a8] sm:$0xff] }
 0x1a4   :  { %5128 = vmatpush1.bf16.msra.mxu1 %v5127_v30  ;;  %2461 = vmatprep.mubr.f32.mxu1 %v5763_v0  ;;  %v5205_v30 = vpack.c.bf16 %v2666_v12, %v2665_v11  ;;  %v5143_v36 = vpack.c.bf16 %v1607_v22, %v1582_v21  ;;  %v2673_v12 = vld [vmem:[#allocation8 + $0x70] sm:$0xff]  ;;  %v1486_v21 = vld [vmem:[#allocation7 + $0x3e0] sm:$0xff]  ;;  %v1511_v22 = vld [vmem:[#allocation7 + $0x4a8] sm:$0xff] }
 0x1a5   :  { %5130 = vmatprep.subr.bf16.mxu1 %v5129_v35  ;;  %5192 = vmatprep.subr.bf16.mxu0 %v5191_v37  ;;  %v2668_v35 = vld [vmem:[#allocation8 + $0x48] sm:$0xff]  ;;  %v2686_v37 = vld [vmem:[#allocation8 + $0xd8] sm:$0xff] }
 0x1a6   :  { %5194 = vmatpush3.bf16.msra.mxu0 %v5193_v40  ;;  %v1657_v40 = vld [vmem:[#allocation7 + $0x938] sm:$0xff]  ;;  %v5211_v42 = vpack.c.bf16 %v2686_v37, %v2685_v24  ;;  %v1611_v24 = vld [vmem:[#allocation7 + $0x7c8] sm:$0xff] }
 0x1a7   :  { %5196 = vmatprep.subr.bf16.mxu0 %v5195_v41  ;;  %v5209_v41 = vpack.c.bf16 %v2668_v35, %v2667_v34  ;;  %v5147_v47 = vpack.c.bf16 %v1657_v40, %v1632_v39  ;;  %v1561_v34 = vld [vmem:[#allocation7 + $0x638] sm:$0xff] }
 0x1a8   :  { %5132 = vmatpush1.bf16.msra.mxu1 %v5131_v45  ;;  %v2670_v45 = vld [vmem:[#allocation8 + $0x58] sm:$0xff]  ;;  %v1661_v39 = vld [vmem:[#allocation7 + $0x958] sm:$0xff] }
 0x1a9   :  { %5134 = vmatprep.subr.bf16.mxu1 %v5133_v49  ;;  %v2688_v49 = vld [vmem:[#allocation8 + $0xe8] sm:$0xff]  ;;  %v5213_v51 = vpack.c.bf16 %v2670_v45, %v2669_v43  ;;  %v2691_v43 = vld [vmem:[#allocation8 + $0x100] sm:$0xff] }
 0x1aa   :  { %5198 = vmatpush3.bf16.msra.mxu0 %v5197_v54  ;;  %v5215_v54 = vpack.c.bf16 %v2688_v49, %v2687_v48  ;;  %v2692_v45 = vld [vmem:[#allocation8 + $0x108] sm:$0xff]  ;;  %v2710_v48 = vld [vmem:[#allocation8 + $0x198] sm:$0xff] }
 0x1ab   :  { %5200 = vmatprep.subr.bf16.mxu0 %v5199_v57  ;;  %v1686_v49 = vld [vmem:[#allocation7 + $0xa20] sm:$0xff]  ;;  %v5225_v53 = vpack.c.bf16 %v2692_v45, %v2691_v43  ;;  %v2703_v43 = vld [vmem:[#allocation8 + $0x160] sm:$0xff]  ;;  %v2704_v45 = vld [vmem:[#allocation8 + $0x168] sm:$0xff] }
 0x1ac   :  { %5136 = vmatpush1.bf16.msra.mxu1 %v5135_v61  ;;  %v1682_v61 = vld [vmem:[#allocation7 + $0xa00] sm:$0xff] }
 0x1ad   :  { %5138 = vmatprep.subr.bf16.mxu1 %v5137_v3  ;;  %v2690_v3 = vld [vmem:[#allocation8 + $0xf8] sm:$0xff] }
 0x1ae   :  { %5202 = vmatpush3.bf16.msra.mxu0 %v5201_v9  ;;  %v5219_v11 = vpack.c.bf16 %v2690_v3, %v2689_v1  ;;  %v2711_v1 = vld [vmem:[#allocation8 + $0x1a0] sm:$0xff]  ;;  %v2712_v3 = vld [vmem:[#allocation8 + $0x1a8] sm:$0xff] }
 0x1af   :  { %5204 = vmatprep.subr.bf16.mxu0 %v5203_v10  ;;  %v5217_v10 = vpack.c.bf16 %v2672_v60, %v2671_v59  ;;  %v2693_v59 = vld [vmem:[#allocation8 + $0x110] sm:$0xff]  ;;  %v2694_v60 = vld [vmem:[#allocation8 + $0x118] sm:$0xff] }
 0x1b0   :  { %5140 = vmatpush1.bf16.msra.mxu1 %v5139_v14  ;;  %v2674_v14 = vld [vmem:[#allocation8 + $0x78] sm:$0xff] }
 0x1b1   :  { %5142 = vmatprep.subr.bf16.mxu1 %v5141_v20  ;;  %v5177_v20 = vpack.c.bf16 %v1461_v8, %v1436_v7  ;;  %v5221_v26 = vpack.c.bf16 %v2674_v14, %v2673_v12  ;;  %v5229_v7 = vpack.c.bf16 %v2694_v60, %v2693_v59  ;;  %v5231_v8 = vpack.c.bf16 %v2712_v3, %v2711_v1  ;;  %v2713_v12 = vld [vmem:[#allocation8 + $0x1b0] sm:$0xff]  ;;  %v2714_v14 = vld [vmem:[#allocation8 + $0x1b8] sm:$0xff]  ;;  %v2771_v60 = vld [vmem:[#allocation8 + $0x380] sm:$0xff] }
 0x1b2   :  { %5206 = vmatpush3.bf16.msra.mxu0 %v5205_v30  ;;  %v5180_v30 = vpack.c.bf16 %v1511_v22, %v1486_v21  ;;  %v5235_v19 = vpack.c.bf16 %v2714_v14, %v2713_v12  ;;  %v2698_v21 = vld [vmem:[#allocation8 + $0x138] sm:$0xff]  ;;  %v2715_v22 = vld [vmem:[#allocation8 + $0x1c0] sm:$0xff]  ;;  %v2772_v1 = vld [vmem:[#allocation8 + $0x388] sm:$0xff]  ;;  %v1340_v12 = vmax.f32 %v5948_v18, 0.0 }
 0x1b3   :  { %5208 = vmatprep.subr.bf16.mxu0 %v5207_v33  ;;  %v1536_v33 = vld [vmem:[#allocation7 + $0x570] sm:$0xff] }
 0x1b4   :  { %5144 = vmatpush1.bf16.msra.mxu1 %v5143_v36  ;;  %v5183_v35 = vpack.c.bf16 %v1561_v34, %v1536_v33  ;;  %v1586_v36 = vld [vmem:[#allocation7 + $0x700] sm:$0xff]  ;;  %v2700_v33 = vld [vmem:[#allocation8 + $0x148] sm:$0xff]  ;;  %v2717_v34 = vld [vmem:[#allocation8 + $0x1d0] sm:$0xff] }
 0x1b5   :  { %5146 = vmatprep.subr.bf16.mxu1 %v5145_v38  ;;  %v5186_v37 = vpack.c.bf16 %v1611_v24, %v1586_v36  ;;  %v1636_v38 = vld [vmem:[#allocation7 + $0x890] sm:$0xff] }
 0x1b6   :  { %5210 = vmatpush3.bf16.msra.mxu0 %v5209_v41  ;;  %v5189_v40 = vpack.c.bf16 %v1661_v39, %v1636_v38  ;;  %v2707_v41 = vld [vmem:[#allocation8 + $0x180] sm:$0xff]  ;;  %v2702_v38 = vld [vmem:[#allocation8 + $0x158] sm:$0xff] }
 0x1b7   :  { %5212 = vmatprep.subr.bf16.mxu0 %v5211_v42  ;;  %v2708_v42 = vld [vmem:[#allocation8 + $0x188] sm:$0xff]  ;;  %v2719_v39 = vld [vmem:[#allocation8 + $0x1e0] sm:$0xff] }
 0x1b8   :  { %5148 = vmatpush1.bf16.msra.mxu1 %v5147_v47  ;;  %v5989_v57 = vpop.f32.mrb[8].mxu1  ;;  %v2709_v47 = vld [vmem:[#allocation8 + $0x190] sm:$0xff] }
 0x1b9   :  { %2421 = vmatprep.subr.mxu1 %v1683_v50  ;;  %v5991_v62 = vpop.f32.mrb[9].mxu1 }
 0x1ba   :  { %v5993_v6 = vpop.f32.mrb[8].mxu0  ;;  %5214 = vmatpush3.bf16.msra.mxu0 %v5213_v51  ;;  %v5223_v51 = vpack.c.bf16 %v2708_v42, %v2707_v41 }
 0x1bb   :  { %v5995_v9 = vpop.f32.mrb[9].mxu0  ;;  %5216 = vmatprep.subr.bf16.mxu0 %v5215_v54  ;;  %v5227_v54 = vpack.c.bf16 %v2710_v48, %v2709_v47  ;;  %v2721_v47 = vld [vmem:[#allocation8 + $0x1f0] sm:$0xff]  ;;  %v2722_v48 = vld [vmem:[#allocation8 + $0x1f8] sm:$0xff] }
 0x1bc   :  { %2422 = vmatpush1.msra.mxu1 %v1682_v61 }
 0x1bd   :  { %4017 = vmatmul.mubr.msk.f32.vlgmr.msra.gmra.mrb[24].mxu1 %vm411_vm0, %v5968_v63  ;;  %5173 = vmatprep.subr.bf16.mxu1 %v5764_v27 }
 0x1be   :  { %5175 = vmatpush3.bf16.msra.mxu1 %v5174_v4  ;;  %4541 = vmatprep.mubr.msk.f32.mxu1 %vm5765_vm1, %v5763_v0 }
 0x1bf   :  { %5176 = vmatprep.subr.bf16.mxu1 %v5764_v27  ;;  %5218 = vmatpush3.bf16.msra.mxu0 %v5217_v10  ;;  %v2695_v10 = vld [vmem:[#allocation8 + $0x120] sm:$0xff] }
 0x1c0   :  { %5220 = vmatprep.subr.bf16.mxu0 %v5219_v11  ;;  %v2696_v11 = vld [vmem:[#allocation8 + $0x128] sm:$0xff] }
 0x1c1   :  { %v5233_v17 = vpack.c.bf16 %v2696_v11, %v2695_v10 }
 0x1c2   :  { %5178 = vmatpush3.bf16.msra.mxu1 %v5177_v20  ;;  %v2697_v20 = vld [vmem:[#allocation8 + $0x130] sm:$0xff] }
 0x1c3   :  { %5179 = vmatprep.subr.bf16.mxu1 %v5764_v27  ;;  %5222 = vmatpush3.bf16.msra.mxu0 %v5221_v26  ;;  %v2716_v26 = vld [vmem:[#allocation8 + $0x1c8] sm:$0xff] }
 0x1c4   :  { %5256 = vmatprep.subr.bf16.mxu0 %v5255_v29  ;;  %v5237_v29 = vpack.c.bf16 %v2698_v21, %v2697_v20  ;;  %v2756_v20 = vld [vmem:[#allocation8 + $0x308] sm:$0xff] }
 0x1c6   :  { %5181 = vmatpush3.bf16.msra.mxu1 %v5180_v30  ;;  %v2699_v30 = vld [vmem:[#allocation8 + $0x140] sm:$0xff] }
 0x1c7   :  { %5182 = vmatprep.subr.bf16.mxu1 %v5764_v27  ;;  %v5241_v36 = vpack.c.bf16 %v2700_v33, %v2699_v30  ;;  %v2757_v30 = vld [vmem:[#allocation8 + $0x310] sm:$0xff]  ;;  %v2758_v33 = vld [vmem:[#allocation8 + $0x318] sm:$0xff] }
 0x1c8   :  { %v5293_v18 = vpack.c.bf16 %v2758_v33, %v2757_v30  ;;  %v2786_v30 = vld [vmem:[#allocation8 + $0x3f8] sm:$0xff]  ;;  %v1343_v33 = vmax.f32 %v5960_v44, 0.0 }
 0x1ca   :  { %5184 = vmatpush3.bf16.msra.mxu1 %v5183_v35  ;;  %v2718_v35 = vld [vmem:[#allocation8 + $0x1d8] sm:$0xff] }
 0x1cb   :  { %5185 = vmatprep.subr.bf16.mxu1 %v5764_v27  ;;  %v5243_v24 = vpack.c.bf16 %v2718_v35, %v2717_v34  ;;  %v2775_v34 = vld [vmem:[#allocation8 + $0x3a0] sm:$0xff]  ;;  %v2776_v35 = vld [vmem:[#allocation8 + $0x3a8] sm:$0xff] }
 0x1ce   :  { %5187 = vmatpush3.bf16.msra.mxu1 %v5186_v37  ;;  %v2701_v37 = vld [vmem:[#allocation8 + $0x150] sm:$0xff] }
 0x1cf   :  { %5188 = vmatprep.subr.bf16.mxu1 %v5764_v27  ;;  %v5245_v41 = vpack.c.bf16 %v2702_v38, %v2701_v37  ;;  %v2760_v37 = vld [vmem:[#allocation8 + $0x328] sm:$0xff]  ;;  %v2777_v38 = vld [vmem:[#allocation8 + $0x3b0] sm:$0xff] }
 0x1d2   :  { %5190 = vmatpush3.bf16.msra.mxu1 %v5189_v40  ;;  %v2720_v40 = vld [vmem:[#allocation8 + $0x1e8] sm:$0xff] }
 0x1d3   :  { %4539 = vmatprep.subr.mxu1 %v5763_v0  ;;  %v6008_v50 = vpop.f32.mrb[10].mxu1  ;;  %v5247_v42 = vpack.c.bf16 %v2720_v40, %v2719_v39  ;;  %v2778_v39 = vld [vmem:[#allocation8 + $0x3b8] sm:$0xff] }
 0x1d4   :  { %v6010_v23 = vpop.f32.mrb[11].mxu1 }
 0x1d5   :  { %v6012_v61 = vpop.f32.mrb[10].mxu0 }
 0x1d6   :  { %4540 = vmatpush3.msra.mxu1 %v1686_v49  ;;  %v4514_v4 = vpop.f32.mrb[11].mxu0  ;;  %v5249_v49 = vpack.c.bf16 %v2704_v45, %v2703_v43  ;;  %v2762_v43 = vld [vmem:[#allocation8 + $0x338] sm:$0xff]  ;;  %v2779_v45 = vld [vmem:[#allocation8 + $0x3c0] sm:$0xff] }
 0x1d7   :  { %4542 = vmatmul.mubr.msk.f32.vlgmr.msra.gmra.mrb[26].mxu1 %vm411_vm0, %v5968_v63  ;;  %5224 = vmatprep.subr.bf16.mxu1 %v5223_v51  ;;  %v5239_v63 = vpack.c.bf16 %v2716_v26, %v2715_v22  ;;  %v5251_v51 = vpack.c.bf16 %v2722_v48, %v2721_v47  ;;  %v2773_v22 = vld [vmem:[#allocation8 + $0x390] sm:$0xff]  ;;  %v2774_v26 = vld [vmem:[#allocation8 + $0x398] sm:$0xff]  ;;  %v2780_v47 = vld [vmem:[#allocation8 + $0x3c8] sm:$0xff] }
 0x1d8   :  { %5226 = vmatpush3.bf16.msra.mxu1 %v5225_v53  ;;  %v2705_v53 = vld [vmem:[#allocation8 + $0x170] sm:$0xff] }
 0x1d9   :  { %5228 = vmatprep.subr.bf16.mxu1 %v5227_v54  ;;  %v2706_v54 = vld [vmem:[#allocation8 + $0x178] sm:$0xff] }
 0x1da   :  { %v5253_v11 = vpack.c.bf16 %v2706_v54, %v2705_v53  ;;  %v2764_v53 = vld [vmem:[#allocation8 + $0x348] sm:$0xff]  ;;  %v2781_v54 = vld [vmem:[#allocation8 + $0x3d0] sm:$0xff] }
 0x1dc   :  { %5230 = vmatpush3.bf16.msra.mxu1 %v5229_v7  ;;  %v1339_v7 = vmax.f32 %v5946_v16, 0.0  ;;  %v5291_v16 = vpack.c.bf16 %v2774_v26, %v2773_v22  ;;  %v1338_v22 = vmax.f32 %v5934_v58, 0.0  ;;  %v2742_v58 = vld [vmem:[#allocation8 + $0x298] sm:$0xff] }
 0x1dd   :  { %5232 = vmatprep.subr.bf16.mxu1 %v5231_v8 }
 0x1e0   :  { %5234 = vmatpush3.bf16.msra.mxu1 %v5233_v17  ;;  %v5287_v17 = vpack.c.bf16 %v2772_v1, %v2771_v60  ;;  %v2782_v60 = vld [vmem:[#allocation8 + $0x3d8] sm:$0xff] }
 0x1e1   :  { %5236 = vmatprep.subr.bf16.mxu1 %v5235_v19  ;;  %v2755_v19 = vld [vmem:[#allocation8 + $0x300] sm:$0xff] }
 0x1e4   :  { %5238 = vmatpush3.bf16.msra.mxu1 %v5237_v29 }
 0x1e5   :  { %5240 = vmatprep.subr.bf16.mxu1 %v5239_v63  ;;  %v5289_v63 = vpack.c.bf16 %v2756_v20, %v2755_v19  ;;  %v2767_v20 = vld [vmem:[#allocation8 + $0x360] sm:$0xff] }
 0x1e8   :  { %5242 = vmatpush3.bf16.msra.mxu1 %v5241_v36  ;;  %v5295_v36 = vpack.c.bf16 %v2776_v35, %v2775_v34 }
 0x1e9   :  { %5244 = vmatprep.subr.bf16.mxu1 %v5243_v24  ;;  %v2759_v24 = vld [vmem:[#allocation8 + $0x320] sm:$0xff] }
 0x1ea   :  { %v5297_v40 = vpack.c.bf16 %v2760_v37, %v2759_v24  ;;  %v2724_v24 = vld [vmem:[#allocation8 + $0x208] sm:$0xff] }
 0x1ec   :  { %5246 = vmatpush3.bf16.msra.mxu1 %v5245_v41  ;;  %v5299_v41 = vpack.c.bf16 %v2778_v39, %v2777_v38 }
 0x1ed   :  { %5248 = vmatprep.subr.bf16.mxu1 %v5247_v42  ;;  %v2761_v42 = vld [vmem:[#allocation8 + $0x330] sm:$0xff] }
 0x1ee   :  { %v6016_v59 = vpop.f32.mrb[12].mxu1  ;;  %v5301_v48 = vpack.c.bf16 %v2762_v43, %v2761_v42 }
 0x1ef   :  { %v1824_v3 = vpop.f32.mrb[12].mxu0  ;;  %v6018_v4 = vpop.f32.mrb[13].mxu1 }
 0x1f0   :  { %5250 = vmatpush3.bf16.msra.mxu1 %v5249_v49  ;;  %v2611_v8 = vmax.f32 %v1824_v3, 0.0  ;;  %v1826_v10 = vpop.f32.mrb[13].mxu0  ;;  %v5303_v49 = vpack.c.bf16 %v2780_v47, %v2779_v45  ;;  %v5307_v3 = vpack.c.bf16 %v2782_v60, %v2781_v54  ;;  %v2769_v45 = vld [vmem:[#allocation8 + $0x370] sm:$0xff]  ;;  %v2770_v47 = vld [vmem:[#allocation8 + $0x378] sm:$0xff] }
 0x1f1   :  { %v2612_v14 = vmax.f32 %v1826_v10, 0.0  ;;  %5252 = vmatprep.subr.bf16.mxu1 %v5251_v51  ;;  %v2763_v51 = vld [vmem:[#allocation8 + $0x340] sm:$0xff]  ;;  %v2725_v54 = vld [vmem:[#allocation8 + $0x210] sm:$0xff]  ;;  %v5317_v60 = vpack.c.bf16 %v2770_v47, %v2769_v45 }
 0x1f2   :  { %v2636_v21 = vmax.f32 %v1339_v7, %v2611_v8  ;;  %v5305_v1 = vpack.c.bf16 %v2764_v53, %v2763_v51  ;;  %v2765_v7 = vld [vmem:[#allocation8 + $0x350] sm:$0xff]  ;;  %v2766_v8 = vld [vmem:[#allocation8 + $0x358] sm:$0xff]  ;;  %v2783_v10 = vld [vmem:[#allocation8 + $0x3e0] sm:$0xff] }
 0x1f3   :  { %v2637_v29 = vmax.f32 %v1340_v12, %v2612_v14  ;;  %v5309_v12 = vpack.c.bf16 %v2766_v8, %v2765_v7  ;;  %v1337_v14 = vmax.f32 %v5932_v56, 0.0  ;;  %v1344_v56 = vmax.f32 %v5962_v46, 0.0  ;;  %v2836_v51 = vld [vmem:[#allocation8 + $0x588] sm:$0xff]  ;;  %v2726_v46 = vld [vmem:[#allocation8 + $0x218] sm:$0xff]  ;;  %v2819_v8 = vld [vmem:[#allocation8 + $0x500] sm:$0xff] }
 0x1f4   :  { %5254 = vmatpush3.bf16.msra.mxu1 %v5253_v11  ;;  %v2784_v11 = vld [vmem:[#allocation8 + $0x3e8] sm:$0xff]  ;;  %v2731_v47 = vld [vmem:[#allocation8 + $0x240] sm:$0xff] }
 0x1f5   :  { %3200 = vmatprep.mubr.f32.mxu1 %v2637_v29  ;;  %5288 = vmatprep.subr.bf16.mxu1 %v5287_v17  ;;  %v5311_v19 = vpack.c.bf16 %v2784_v11, %v2783_v10  ;;  %v2820_v10 = vld [vmem:[#allocation8 + $0x508] sm:$0xff]  ;;  %v5261_v11 = vpack.c.bf16 %v2726_v46, %v2725_v54  ;;  %v2826_v54 = vld [vmem:[#allocation8 + $0x538] sm:$0xff] }
 0x1f7   :  { %3201 = vmatmul.mubr.f32.vlgmr.msra.gmra.mrb[28].mxu1 %v2636_v21  ;;  %v2768_v21 = vld [vmem:[#allocation8 + $0x368] sm:$0xff] }
 0x1f8   :  { %5290 = vmatpush3.bf16.msra.mxu1 %v5289_v63  ;;  %v5313_v39 = vpack.c.bf16 %v2768_v21, %v2767_v20  ;;  %v2728_v20 = vld [vmem:[#allocation8 + $0x228] sm:$0xff]  ;;  %v5353_v21 = vpack.c.bf16 %v2820_v10, %v2819_v8  ;;  %v2734_v8 = vld [vmem:[#allocation8 + $0x258] sm:$0xff] }
 0x1f9   :  { %5292 = vmatprep.subr.bf16.mxu1 %v5291_v16  ;;  %v2785_v16 = vld [vmem:[#allocation8 + $0x3f0] sm:$0xff] }
 0x1fa   :  { %v5315_v43 = vpack.c.bf16 %v2786_v30, %v2785_v16  ;;  %v2822_v16 = vld [vmem:[#allocation8 + $0x518] sm:$0xff] }
 0x1fc   :  { %5294 = vmatpush3.bf16.msra.mxu1 %v5293_v18 }
 0x1fd   :  { %5296 = vmatprep.subr.bf16.mxu1 %v5295_v36  ;;  %v2723_v36 = vld [vmem:[#allocation8 + $0x200] sm:$0xff] }
 0x200   :  { %5298 = vmatpush3.bf16.msra.mxu1 %v5297_v40  ;;  %v2741_v40 = vld [vmem:[#allocation8 + $0x290] sm:$0xff] }
 0x201   :  { %5300 = vmatprep.subr.bf16.mxu1 %v5299_v41  ;;  %v5259_v53 = vpack.c.bf16 %v2742_v58, %v2741_v40  ;;  %v2824_v40 = vld [vmem:[#allocation8 + $0x528] sm:$0xff] }
 0x204   :  { %5302 = vmatpush3.bf16.msra.mxu1 %v5301_v48  ;;  %v5257_v48 = vpack.c.bf16 %v2724_v24, %v2723_v36  ;;  %v2730_v36 = vld [vmem:[#allocation8 + $0x238] sm:$0xff] }
 0x205   :  { %5304 = vmatprep.subr.bf16.mxu1 %v5303_v49  ;;  %v2835_v49 = vld [vmem:[#allocation8 + $0x580] sm:$0xff] }
 0x206   :  { %v5351_v7 = vpack.c.bf16 %v2836_v51, %v2835_v49  ;;  %v2750_v49 = vld [vmem:[#allocation8 + $0x2d8] sm:$0xff] }
 0x208   :  { %5306 = vmatpush3.bf16.msra.mxu1 %v5305_v1  ;;  %v2743_v1 = vld [vmem:[#allocation8 + $0x2a0] sm:$0xff] }
 0x209   :  { %v1753_v17 = vpop.f32.mrb[14].mxu1  ;;  %5308 = vmatprep.subr.bf16.mxu1 %v5307_v3  ;;  %v2744_v3 = vld [vmem:[#allocation8 + $0x2a8] sm:$0xff] }
 0x20a   :  { %v2609_v26 = vmax.f32 %v1753_v17, 0.0  ;;  %v1966_v29 = vpop.f32.mrb[14].mxu0  ;;  %v1755_v63 = vpop.f32.mrb[15].mxu1  ;;  %v5263_v17 = vpack.c.bf16 %v2744_v3, %v2743_v1  ;;  %v2844_v1 = vld [vmem:[#allocation8 + $0x5c8] sm:$0xff] }
 0x20b   :  { %v2615_v34 = vmax.f32 %v1966_v29, 0.0  ;;  %v2610_v35 = vmax.f32 %v1755_v63, 0.0  ;;  %v1968_v18 = vpop.f32.mrb[15].mxu0  ;;  %v2821_v63 = vld [vmem:[#allocation8 + $0x510] sm:$0xff] }
 0x20c   :  { %v2634_v37 = vmax.f32 %v1337_v14, %v2609_v26  ;;  %v2616_v38 = vmax.f32 %v1968_v18, 0.0  ;;  %5310 = vmatpush3.bf16.msra.mxu1 %v5309_v12  ;;  %v2837_v12 = vld [vmem:[#allocation8 + $0x590] sm:$0xff]  ;;  %v2838_v14 = vld [vmem:[#allocation8 + $0x598] sm:$0xff]  ;;  %v5357_v24 = vpack.c.bf16 %v2822_v16, %v2821_v63  ;;  %v2736_v63 = vld [vmem:[#allocation8 + $0x268] sm:$0xff]  ;;  %v1341_v16 = vmax.f32 %v5936_v2, 0.0 }
 0x20d   :  { %v2640_v41 = vmax.f32 %v1343_v33, %v2615_v34  ;;  %v2635_v42 = vmax.f32 %v1338_v22, %v2610_v35  ;;  %5312 = vmatprep.subr.bf16.mxu1 %v5311_v19  ;;  %v2727_v19 = vld [vmem:[#allocation8 + $0x220] sm:$0xff]  ;;  %v2745_v22 = vld [vmem:[#allocation8 + $0x2b0] sm:$0xff]  ;;  %v2746_v26 = vld [vmem:[#allocation8 + $0x2b8] sm:$0xff]  ;;  %v5355_v29 = vpack.c.bf16 %v2838_v14, %v2837_v12 }
 0x20e   :  { %v2641_v44 = vmax.f32 %v1344_v56, %v2616_v38  ;;  %v5265_v30 = vpack.c.bf16 %v2728_v20, %v2727_v19  ;;  %v2839_v33 = vld [vmem:[#allocation8 + $0x5a0] sm:$0xff]  ;;  %v2840_v34 = vld [vmem:[#allocation8 + $0x5a8] sm:$0xff]  ;;  %v5267_v35 = vpack.c.bf16 %v2746_v26, %v2745_v22  ;;  %v2729_v18 = vld [vmem:[#allocation8 + $0x230] sm:$0xff] }
 0x20f   :  { %3130 = vmatprep.mubr.f32.mxu0 %v2635_v42  ;;  %v2747_v56 = vld [vmem:[#allocation8 + $0x2c0] sm:$0xff]  ;;  %v5359_v38 = vpack.c.bf16 %v2840_v34, %v2839_v33  ;;  %v5269_v58 = vpack.c.bf16 %v2730_v36, %v2729_v18  ;;  %v2841_v42 = vld [vmem:[#allocation8 + $0x5b0] sm:$0xff]  ;;  %v2752_v12 = vld [vmem:[#allocation8 + $0x2e8] sm:$0xff]  ;;  %v1342_v18 = vmax.f32 %v5938_v5, 0.0 }
 0x210   :  { %5314 = vmatpush3.bf16.msra.mxu1 %v5313_v39  ;;  %3340 = vmatprep.mubr.f32.mxu1 %v2641_v44  ;;  %v2823_v39 = vld [vmem:[#allocation8 + $0x520] sm:$0xff]  ;;  %v2828_v19 = vld [vmem:[#allocation8 + $0x548] sm:$0xff]  ;;  %v2846_v22 = vld [vmem:[#allocation8 + $0x5d8] sm:$0xff] }
 0x211   :  { %3131 = vmatmul.mubr.f32.vlgmr.msra.gmra.mrb[24].mxu0 %v2634_v37  ;;  %5316 = vmatprep.subr.bf16.mxu1 %v5315_v43  ;;  %v2748_v37 = vld [vmem:[#allocation8 + $0x2c8] sm:$0xff]  ;;  %v2842_v43 = vld [vmem:[#allocation8 + $0x5b8] sm:$0xff]  ;;  %v5361_v44 = vpack.c.bf16 %v2824_v40, %v2823_v39  ;;  %v2753_v34 = vld [vmem:[#allocation8 + $0x2f0] sm:$0xff]  ;;  %v1347_v40 = vmax.f32 %v5976_v13, 0.0 }
 0x212   :  { %5258 = vmatpush3.bf16.msra.mxu0 %v5257_v48  ;;  %v5271_v45 = vpack.c.bf16 %v2748_v37, %v2747_v56  ;;  %v2749_v48 = vld [vmem:[#allocation8 + $0x2d0] sm:$0xff]  ;;  %v5363_v51 = vpack.c.bf16 %v2842_v43, %v2841_v42  ;;  %v2830_v39 = vld [vmem:[#allocation8 + $0x558] sm:$0xff] }
 0x213   :  { %5260 = vmatprep.subr.bf16.mxu0 %v5259_v53  ;;  %v2825_v53 = vld [vmem:[#allocation8 + $0x530] sm:$0xff]  ;;  %v5275_v3 = vpack.c.bf16 %v2750_v49, %v2749_v48 }
 0x214   :  { %5318 = vmatpush3.bf16.msra.mxu1 %v5317_v60  ;;  %v2843_v60 = vld [vmem:[#allocation8 + $0x5c0] sm:$0xff]  ;;  %v5365_v10 = vpack.c.bf16 %v2826_v54, %v2825_v53  ;;  %v2737_v49 = vld [vmem:[#allocation8 + $0x270] sm:$0xff] }
 0x215   :  { %5352 = vmatprep.subr.bf16.mxu1 %v5351_v7  ;;  %v2733_v7 = vld [vmem:[#allocation8 + $0x250] sm:$0xff]  ;;  %v5367_v14 = vpack.c.bf16 %v2844_v1, %v2843_v60  ;;  %v2804_v60 = vld [vmem:[#allocation8 + $0x488] sm:$0xff] }
 0x216   :  { %5262 = vmatpush3.bf16.msra.mxu0 %v5261_v11  ;;  %v2751_v11 = vld [vmem:[#allocation8 + $0x2e0] sm:$0xff]  ;;  %v5277_v20 = vpack.c.bf16 %v2734_v8, %v2733_v7  ;;  %v2832_v8 = vld [vmem:[#allocation8 + $0x568] sm:$0xff] }
 0x217   :  { %3341 = vmatmul.mubr.f32.vlgmr.msra.gmra.mrb[30].mxu1 %v2640_v41  ;;  %5264 = vmatprep.subr.bf16.mxu0 %v5263_v17  ;;  %v2732_v41 = vld [vmem:[#allocation8 + $0x248] sm:$0xff]  ;;  %v2827_v17 = vld [vmem:[#allocation8 + $0x540] sm:$0xff]  ;;  %v5279_v26 = vpack.c.bf16 %v2752_v12, %v2751_v11  ;;  %v2850_v11 = vld [vmem:[#allocation8 + $0x5f8] sm:$0xff] }
 0x218   :  { %5354 = vmatpush3.bf16.msra.mxu1 %v5353_v21  ;;  %v5273_v46 = vpack.c.bf16 %v2732_v41, %v2731_v47  ;;  %v2845_v21 = vld [vmem:[#allocation8 + $0x5d0] sm:$0xff]  ;;  %v5369_v33 = vpack.c.bf16 %v2828_v19, %v2827_v17  ;;  %v2848_v47 = vld [vmem:[#allocation8 + $0x5e8] sm:$0xff]  ;;  %v1348_v41 = vmax.f32 %v5978_v15, 0.0  ;;  %v2831_v7 = vld [vmem:[#allocation8 + $0x560] sm:$0xff] }
 0x219   :  { %5356 = vmatprep.subr.bf16.mxu1 %v5355_v29  ;;  %v2735_v29 = vld [vmem:[#allocation8 + $0x260] sm:$0xff]  ;;  %v5371_v37 = vpack.c.bf16 %v2846_v22, %v2845_v21  ;;  %v2788_v17 = vld [vmem:[#allocation8 + $0x408] sm:$0xff]  ;;  %v5377_v19 = vpack.c.bf16 %v2832_v8, %v2831_v7  ;;  %v2806_v21 = vld [vmem:[#allocation8 + $0x498] sm:$0xff] }
 0x21a   :  { %5266 = vmatpush3.bf16.msra.mxu0 %v5265_v30  ;;  %v5281_v2 = vpack.c.bf16 %v2736_v63, %v2735_v29  ;;  %v2834_v29 = vld [vmem:[#allocation8 + $0x578] sm:$0xff]  ;;  %v2812_v7 = vld [vmem:[#allocation8 + $0x4c8] sm:$0xff] }
 0x21b   :  { %5268 = vmatprep.subr.bf16.mxu0 %v5267_v35  ;;  %v2754_v35 = vld [vmem:[#allocation8 + $0x2f8] sm:$0xff] }
 0x21c   :  { %5358 = vmatpush3.bf16.msra.mxu1 %v5357_v24  ;;  %v5283_v48 = vpack.c.bf16 %v2754_v35, %v2753_v34  ;;  %v2789_v34 = vld [vmem:[#allocation8 + $0x410] sm:$0xff]  ;;  %v2790_v35 = vld [vmem:[#allocation8 + $0x418] sm:$0xff] }
 0x21d   :  { %5360 = vmatprep.subr.bf16.mxu1 %v5359_v38  ;;  %v2829_v38 = vld [vmem:[#allocation8 + $0x550] sm:$0xff] }
 0x21e   :  { %5270 = vmatpush3.bf16.msra.mxu0 %v5269_v58  ;;  %v5373_v13 = vpack.c.bf16 %v2830_v39, %v2829_v38  ;;  %v2884_v38 = vld [vmem:[#allocation8 + $0x708] sm:$0xff]  ;;  %v5325_v39 = vpack.c.bf16 %v2790_v35, %v2789_v34  ;;  %v1345_v34 = vmax.f32 %v5950_v28, 0.0 }
 0x21f   :  { %5272 = vmatprep.subr.bf16.mxu0 %v5271_v45  ;;  %v2847_v45 = vld [vmem:[#allocation8 + $0x5e0] sm:$0xff] }
 0x220   :  { %5362 = vmatpush3.bf16.msra.mxu1 %v5361_v44 }
 0x221   :  { %5364 = vmatprep.subr.bf16.mxu1 %v5363_v51  ;;  %v2738_v51 = vld [vmem:[#allocation8 + $0x278] sm:$0xff] }
 0x222   :  { %5274 = vmatpush3.bf16.msra.mxu0 %v5273_v46  ;;  %v2803_v46 = vld [vmem:[#allocation8 + $0x480] sm:$0xff]  ;;  %v5285_v15 = vpack.c.bf16 %v2738_v51, %v2737_v49 }
 0x223   :  { %5276 = vmatprep.subr.bf16.mxu0 %v5275_v3  ;;  %v5375_v3 = vpack.c.bf16 %v2848_v47, %v2847_v45  ;;  %v5319_v12 = vpack.c.bf16 %v2804_v60, %v2803_v46  ;;  %v2809_v47 = vld [vmem:[#allocation8 + $0x4b0] sm:$0xff]  ;;  %v2903_v51 = vld [vmem:[#allocation8 + $0x7a0] sm:$0xff]  ;;  %v2794_v60 = vld [vmem:[#allocation8 + $0x438] sm:$0xff] }
 0x224   :  { %5366 = vmatpush3.bf16.msra.mxu1 %v5365_v10  ;;  %v1895_v30 = vpop.f32.mrb[16].mxu1  ;;  %v2849_v10 = vld [vmem:[#allocation8 + $0x5f0] sm:$0xff] }
 0x225   :  { %v2613_v36 = vmax.f32 %v1895_v30, 0.0  ;;  %v2108_v24 = vpop.f32.mrb[16].mxu0  ;;  %v1897_v56 = vpop.f32.mrb[17].mxu1  ;;  %5368 = vmatprep.subr.bf16.mxu1 %v5367_v14  ;;  %v2787_v14 = vld [vmem:[#allocation8 + $0x400] sm:$0xff]  ;;  %v5379_v22 = vpack.c.bf16 %v2850_v11, %v2849_v10  ;;  %v2900_v30 = vld [vmem:[#allocation8 + $0x788] sm:$0xff]  ;;  %v2793_v46 = vld [vmem:[#allocation8 + $0x430] sm:$0xff] }
 0x226   :  { %v2619_v58 = vmax.f32 %v2108_v24, 0.0  ;;  %v2614_v42 = vmax.f32 %v1897_v56, 0.0  ;;  %v2110_v43 = vpop.f32.mrb[17].mxu0  ;;  %5278 = vmatpush3.bf16.msra.mxu0 %v5277_v20  ;;  %v2805_v20 = vld [vmem:[#allocation8 + $0x490] sm:$0xff]  ;;  %v5321_v63 = vpack.c.bf16 %v2788_v17, %v2787_v14  ;;  %v2808_v24 = vld [vmem:[#allocation8 + $0x4a8] sm:$0xff]  ;;  %v5333_v11 = vpack.c.bf16 %v2794_v60, %v2793_v46  ;;  %v2906_v14 = vld [vmem:[#allocation8 + $0x7b8] sm:$0xff] }
 0x227   :  { %v2638_v44 = vmax.f32 %v1341_v16, %v2613_v36  ;;  %v2620_v5 = vmax.f32 %v2110_v43, 0.0  ;;  %5280 = vmatprep.subr.bf16.mxu0 %v5279_v26  ;;  %v2833_v26 = vld [vmem:[#allocation8 + $0x570] sm:$0xff]  ;;  %v2899_v16 = vld [vmem:[#allocation8 + $0x780] sm:$0xff]  ;;  %v2888_v10 = vld [vmem:[#allocation8 + $0x728] sm:$0xff] }
 0x228   :  { %v6030_v53 = vmax.f32 %v1347_v40, %v2619_v58  ;;  %v2639_v54 = vmax.f32 %v1342_v18, %v2614_v42  ;;  %5370 = vmatpush3.bf16.msra.mxu1 %v5369_v33  ;;  %v5323_v33 = vpack.c.bf16 %v2806_v21, %v2805_v20  ;;  %v5381_v18 = vpack.c.bf16 %v2834_v29, %v2833_v26  ;;  %v2807_v36 = vld [vmem:[#allocation8 + $0x4a0] sm:$0xff]  ;;  %v2901_v40 = vld [vmem:[#allocation8 + $0x790] sm:$0xff]  ;;  %v2902_v58 = vld [vmem:[#allocation8 + $0x798] sm:$0xff] }
 0x229   :  { %v2645_v1 = vmax.f32 %v1348_v41, %v2620_v5  ;;  %5372 = vmatprep.subr.bf16.mxu1 %v5371_v37  ;;  %v5415_v56 = vpack.c.bf16 %v2900_v30, %v2899_v16  ;;  %v2883_v37 = vld [vmem:[#allocation8 + $0x700] sm:$0xff]  ;;  %v5327_v42 = vpack.c.bf16 %v2808_v24, %v2807_v36  ;;  %v2810_v41 = vld [vmem:[#allocation8 + $0x4b8] sm:$0xff]  ;;  %v5419_v5 = vpack.c.bf16 %v2902_v58, %v2901_v40  ;;  %v2813_v21 = vld [vmem:[#allocation8 + $0x4d0] sm:$0xff] }
 0x22a   :  { %5282 = vmatpush3.bf16.msra.mxu0 %v5281_v2  ;;  %3270 = vmatprep.mubr.f32.mxu0 %v2639_v54  ;;  %v2791_v43 = vld [vmem:[#allocation8 + $0x420] sm:$0xff]  ;;  %v2792_v2 = vld [vmem:[#allocation8 + $0x428] sm:$0xff]  ;;  %v5417_v45 = vpack.c.bf16 %v2884_v38, %v2883_v37  ;;  %v2889_v29 = vld [vmem:[#allocation8 + $0x730] sm:$0xff] }
 0x22b   :  { %3480 = vmatprep.mubr.f32.mxu1 %v2645_v1  ;;  %5284 = vmatprep.subr.bf16.mxu0 %v5283_v48  ;;  %v2885_v48 = vld [vmem:[#allocation8 + $0x710] sm:$0xff]  ;;  %v5329_v49 = vpack.c.bf16 %v2792_v2, %v2791_v43  ;;  %v2904_v54 = vld [vmem:[#allocation8 + $0x7a8] sm:$0xff]  ;;  %v2907_v30 = vld [vmem:[#allocation8 + $0x7c0] sm:$0xff]  ;;  %v1351_v43 = vmax.f32 %v5989_v57, 0.0 }
 0x22c   :  { %5374 = vmatpush3.bf16.msra.mxu1 %v5373_v13  ;;  %v5331_v13 = vpack.c.bf16 %v2810_v41, %v2809_v47  ;;  %v5423_v8 = vpack.c.bf16 %v2904_v54, %v2903_v51  ;;  %v2797_v36 = vld [vmem:[#allocation8 + $0x450] sm:$0xff]  ;;  %v2798_v24 = vld [vmem:[#allocation8 + $0x458] sm:$0xff]  ;;  %v2815_v58 = vld [vmem:[#allocation8 + $0x4e0] sm:$0xff] }
 0x22d   :  { %5376 = vmatprep.subr.bf16.mxu1 %v5375_v3  ;;  %v2811_v3 = vld [vmem:[#allocation8 + $0x4c0] sm:$0xff]  ;;  %v2909_v51 = vld [vmem:[#allocation8 + $0x7d0] sm:$0xff]  ;;  %v2910_v54 = vld [vmem:[#allocation8 + $0x7d8] sm:$0xff] }
 0x22e   :  { %5286 = vmatpush3.bf16.msra.mxu0 %v5285_v15  ;;  %v2887_v15 = vld [vmem:[#allocation8 + $0x720] sm:$0xff]  ;;  %v5335_v17 = vpack.c.bf16 %v2812_v7, %v2811_v3 }
 0x22f   :  { %5320 = vmatprep.subr.bf16.mxu0 %v5319_v12  ;;  %v2905_v12 = vld [vmem:[#allocation8 + $0x7b0] sm:$0xff]  ;;  %v5425_v20 = vpack.c.bf16 %v2888_v10, %v2887_v15  ;;  %v2891_v41 = vld [vmem:[#allocation8 + $0x740] sm:$0xff]  ;;  %v2818_v15 = vld [vmem:[#allocation8 + $0x4f8] sm:$0xff] }
 0x230   :  { %5378 = vmatpush3.bf16.msra.mxu1 %v5377_v19  ;;  %v2795_v19 = vld [vmem:[#allocation8 + $0x440] sm:$0xff]  ;;  %v5427_v26 = vpack.c.bf16 %v2906_v14, %v2905_v12  ;;  %v2893_v10 = vld [vmem:[#allocation8 + $0x750] sm:$0xff] }
 0x231   :  { %3271 = vmatmul.mubr.f32.vlgmr.msra.gmra.mrb[26].mxu0 %v2638_v44  ;;  %5380 = vmatprep.subr.bf16.mxu1 %v5379_v22  ;;  %v2886_v44 = vld [vmem:[#allocation8 + $0x718] sm:$0xff]  ;;  %v2799_v60 = vld [vmem:[#allocation8 + $0x460] sm:$0xff] }
 0x232   :  { %5322 = vmatpush3.bf16.msra.mxu0 %v5321_v63  ;;  %v5421_v1 = vpack.c.bf16 %v2886_v44, %v2885_v48  ;;  %v2814_v22 = vld [vmem:[#allocation8 + $0x4d8] sm:$0xff]  ;;  %v1352_v48 = vmax.f32 %v5991_v62, 0.0  ;;  %v5435_v62 = vpack.c.bf16 %v2910_v54, %v2909_v51  ;;  %v2911_v14 = vld [vmem:[#allocation8 + $0x7e0] sm:$0xff]  ;;  %v2965_v54 = vld [vmem:[#allocation8 + $0x990] sm:$0xff] }
 0x233   :  { %5324 = vmatprep.subr.bf16.mxu0 %v5323_v33  ;;  %v2890_v63 = vld [vmem:[#allocation8 + $0x738] sm:$0xff]  ;;  %v2908_v33 = vld [vmem:[#allocation8 + $0x7c8] sm:$0xff] }
 0x234   :  { %5382 = vmatpush3.bf16.msra.mxu1 %v5381_v18  ;;  %v5339_v18 = vpack.c.bf16 %v2814_v22, %v2813_v21  ;;  %v5429_v40 = vpack.c.bf16 %v2890_v63, %v2889_v29  ;;  %v5431_v28 = vpack.c.bf16 %v2908_v33, %v2907_v30  ;;  %v2867_v22 = vld [vmem:[#allocation8 + $0x680] sm:$0xff]  ;;  %v2913_v33 = vld [vmem:[#allocation8 + $0x7f0] sm:$0xff] }
 0x235   :  { %5416 = vmatprep.subr.bf16.mxu1 %v5415_v56  ;;  %v1346_v56 = vmax.f32 %v5952_v31, 0.0  ;;  %v2895_v63 = vld [vmem:[#allocation8 + $0x760] sm:$0xff] }
 0x236   :  { %5326 = vmatpush3.bf16.msra.mxu0 %v5325_v39 }
 0x237   :  { %3481 = vmatmul.mubr.f32.vlgmr.msra.gmra.mrb[32].mxu1 %v6030_v53  ;;  %5328 = vmatprep.subr.bf16.mxu0 %v5327_v42  ;;  %v2796_v53 = vld [vmem:[#allocation8 + $0x448] sm:$0xff] }
 0x238   :  { %5418 = vmatpush3.bf16.msra.mxu1 %v5417_v45  ;;  %v5337_v16 = vpack.c.bf16 %v2796_v53, %v2795_v19  ;;  %v2816_v42 = vld [vmem:[#allocation8 + $0x4e8] sm:$0xff]  ;;  %v2801_v53 = vld [vmem:[#allocation8 + $0x470] sm:$0xff] }
 0x239   :  { %5420 = vmatprep.subr.bf16.mxu1 %v5419_v5  ;;  %v2892_v5 = vld [vmem:[#allocation8 + $0x748] sm:$0xff]  ;;  %v5343_v57 = vpack.c.bf16 %v2816_v42, %v2815_v58  ;;  %v2963_v42 = vld [vmem:[#allocation8 + $0x980] sm:$0xff] }
 0x23a   :  { %5330 = vmatpush3.bf16.msra.mxu0 %v5329_v49  ;;  %v5341_v49 = vpack.c.bf16 %v2798_v24, %v2797_v36  ;;  %v5433_v7 = vpack.c.bf16 %v2892_v5, %v2891_v41  ;;  %v2852_v36 = vld [vmem:[#allocation8 + $0x608] sm:$0xff]  ;;  %v2871_v41 = vld [vmem:[#allocation8 + $0x6a0] sm:$0xff] }
 0x23b   :  { %5332 = vmatprep.subr.bf16.mxu0 %v5331_v13  ;;  %v2872_v5 = vld [vmem:[#allocation8 + $0x6a8] sm:$0xff] }
 0x23c   :  { %5422 = vmatpush3.bf16.msra.mxu1 %v5421_v1  ;;  %v2800_v1 = vld [vmem:[#allocation8 + $0x468] sm:$0xff] }
 0x23d   :  { %5424 = vmatprep.subr.bf16.mxu1 %v5423_v8  ;;  %v2817_v8 = vld [vmem:[#allocation8 + $0x4f0] sm:$0xff]  ;;  %v5345_v12 = vpack.c.bf16 %v2800_v1, %v2799_v60  ;;  %v2855_v60 = vld [vmem:[#allocation8 + $0x620] sm:$0xff]  ;;  %v2856_v1 = vld [vmem:[#allocation8 + $0x628] sm:$0xff] }
 0x23e   :  { %5334 = vmatpush3.bf16.msra.mxu0 %v5333_v11  ;;  %v2894_v11 = vld [vmem:[#allocation8 + $0x758] sm:$0xff]  ;;  %v5347_v19 = vpack.c.bf16 %v2818_v15, %v2817_v8 }
 0x23f   :  { %v2037_v35 = vpop.f32.mrb[18].mxu1  ;;  %5336 = vmatprep.subr.bf16.mxu0 %v5335_v17  ;;  %v2912_v17 = vld [vmem:[#allocation8 + $0x7e8] sm:$0xff]  ;;  %v5437_v21 = vpack.c.bf16 %v2894_v11, %v2893_v10  ;;  %v2874_v8 = vld [vmem:[#allocation8 + $0x6b8] sm:$0xff]  ;;  %v5393_v10 = vpack.c.bf16 %v2856_v1, %v2855_v60  ;;  %v2967_v11 = vld [vmem:[#allocation8 + $0x9a0] sm:$0xff] }
 0x240   :  { %v2617_v37 = vmax.f32 %v2037_v35, 0.0  ;;  %v2250_v38 = vpop.f32.mrb[18].mxu0  ;;  %v2039_v39 = vpop.f32.mrb[19].mxu1  ;;  %5426 = vmatpush3.bf16.msra.mxu1 %v5425_v20  ;;  %v2802_v20 = vld [vmem:[#allocation8 + $0x478] sm:$0xff]  ;;  %v5439_v29 = vpack.c.bf16 %v2912_v17, %v2911_v14  ;;  %v2857_v17 = vld [vmem:[#allocation8 + $0x630] sm:$0xff]  ;;  %v2879_v60 = vld [vmem:[#allocation8 + $0x6e0] sm:$0xff] }
 0x241   :  { %v2623_v2 = vmax.f32 %v2250_v38, 0.0  ;;  %v2618_v45 = vmax.f32 %v2039_v39, 0.0  ;;  %v2252_v47 = vpop.f32.mrb[19].mxu0  ;;  %5428 = vmatprep.subr.bf16.mxu1 %v5427_v26  ;;  %v2868_v26 = vld [vmem:[#allocation8 + $0x688] sm:$0xff]  ;;  %v5349_v30 = vpack.c.bf16 %v2802_v20, %v2801_v53  ;;  %v2897_v39 = vld [vmem:[#allocation8 + $0x770] sm:$0xff]  ;;  %v2875_v20 = vld [vmem:[#allocation8 + $0x6c0] sm:$0xff] }
 0x242   :  { %v6037_v44 = vmax.f32 %v1345_v34, %v2617_v37  ;;  %v2624_v31 = vmax.f32 %v2252_v47, 0.0  ;;  %5338 = vmatpush3.bf16.msra.mxu0 %v5337_v16  ;;  %v2896_v16 = vld [vmem:[#allocation8 + $0x768] sm:$0xff]  ;;  %v2914_v34 = vld [vmem:[#allocation8 + $0x7f8] sm:$0xff]  ;;  %v5383_v35 = vpack.c.bf16 %v2868_v26, %v2867_v22  ;;  %v2951_v26 = vld [vmem:[#allocation8 + $0x920] sm:$0xff] }
 0x243   :  { %v6039_v13 = vmax.f32 %v1351_v43, %v2623_v2  ;;  %v2643_v46 = vmax.f32 %v1346_v56, %v2618_v45  ;;  %5340 = vmatprep.subr.bf16.mxu0 %v5339_v18  ;;  %v2851_v18 = vld [vmem:[#allocation8 + $0x600] sm:$0xff]  ;;  %v5441_v24 = vpack.c.bf16 %v2896_v16, %v2895_v63  ;;  %v2869_v56 = vld [vmem:[#allocation8 + $0x690] sm:$0xff]  ;;  %v2870_v37 = vld [vmem:[#allocation8 + $0x698] sm:$0xff]  ;;  %v5443_v38 = vpack.c.bf16 %v2914_v34, %v2913_v33 }
 0x244   :  { %v2649_v3 = vmax.f32 %v1352_v48, %v2624_v31  ;;  %5430 = vmatpush3.bf16.msra.mxu1 %v5429_v40  ;;  %v2898_v40 = vld [vmem:[#allocation8 + $0x778] sm:$0xff]  ;;  %v5385_v58 = vpack.c.bf16 %v2852_v36, %v2851_v18  ;;  %v2964_v43 = vld [vmem:[#allocation8 + $0x988] sm:$0xff]  ;;  %v5387_v2 = vpack.c.bf16 %v2870_v37, %v2869_v56  ;;  %v2853_v45 = vld [vmem:[#allocation8 + $0x610] sm:$0xff]  ;;  %v1349_v63 = vmax.f32 %v5964_v52, 0.0 }
 0x245   :  { %3410 = vmatprep.mubr.f32.mxu0 %v2643_v46  ;;  %5432 = vmatprep.subr.bf16.mxu1 %v5431_v28  ;;  %v2854_v47 = vld [vmem:[#allocation8 + $0x618] sm:$0xff]  ;;  %v5445_v28 = vpack.c.bf16 %v2898_v40, %v2897_v39  ;;  %v5479_v48 = vpack.c.bf16 %v2964_v43, %v2963_v42  ;;  %v2947_v31 = vld [vmem:[#allocation8 + $0x900] sm:$0xff]  ;;  %v2969_v33 = vld [vmem:[#allocation8 + $0x9b0] sm:$0xff] }
 0x246   :  { %3620 = vmatprep.mubr.f32.mxu1 %v2649_v3  ;;  %5342 = vmatpush3.bf16.msra.mxu0 %v5341_v49  ;;  %v2948_v49 = vld [vmem:[#allocation8 + $0x908] sm:$0xff]  ;;  %v5389_v51 = vpack.c.bf16 %v2854_v47, %v2853_v45  ;;  %v2966_v46 = vld [vmem:[#allocation8 + $0x998] sm:$0xff]  ;;  %v2859_v56 = vld [vmem:[#allocation8 + $0x640] sm:$0xff] }
 0x247   :  { %5344 = vmatprep.subr.bf16.mxu0 %v5343_v57  ;;  %v5391_v57 = vpack.c.bf16 %v2872_v5, %v2871_v41  ;;  %v5481_v3 = vpack.c.bf16 %v2948_v49, %v2947_v31  ;;  %v5483_v15 = vpack.c.bf16 %v2966_v46, %v2965_v54  ;;  %v2970_v34 = vld [vmem:[#allocation8 + $0x9b8] sm:$0xff]  ;;  %v2860_v37 = vld [vmem:[#allocation8 + $0x648] sm:$0xff]  ;;  %v2877_v42 = vld [vmem:[#allocation8 + $0x6d0] sm:$0xff] }
 0x248   :  { %5434 = vmatpush3.bf16.msra.mxu1 %v5433_v7  ;;  %v2873_v7 = vld [vmem:[#allocation8 + $0x6b0] sm:$0xff]  ;;  %v2878_v43 = vld [vmem:[#allocation8 + $0x6d8] sm:$0xff]  ;;  %v5491_v47 = vpack.c.bf16 %v2970_v34, %v2969_v33  ;;  %v2971_v31 = vld [vmem:[#allocation8 + $0x9c0] sm:$0xff] }
 0x249   :  { %5436 = vmatprep.subr.bf16.mxu1 %v5435_v62  ;;  %v2949_v62 = vld [vmem:[#allocation8 + $0x910] sm:$0xff]  ;;  %v5395_v14 = vpack.c.bf16 %v2874_v8, %v2873_v7  ;;  %v2954_v41 = vld [vmem:[#allocation8 + $0x938] sm:$0xff]  ;;  %v2972_v49 = vld [vmem:[#allocation8 + $0x9c8] sm:$0xff]  ;;  %v5403_v54 = vpack.c.bf16 %v2878_v43, %v2877_v42 }
 0x24a   :  { %5346 = vmatpush3.bf16.msra.mxu0 %v5345_v12  ;;  %v2968_v12 = vld [vmem:[#allocation8 + $0x9a8] sm:$0xff]  ;;  %v2861_v46 = vld [vmem:[#allocation8 + $0x650] sm:$0xff]  ;;  %v2955_v7 = vld [vmem:[#allocation8 + $0x940] sm:$0xff] }
 0x24b   :  { %5348 = vmatprep.subr.bf16.mxu0 %v5347_v19  ;;  %v2858_v19 = vld [vmem:[#allocation8 + $0x638] sm:$0xff]  ;;  %v5487_v22 = vpack.c.bf16 %v2968_v12, %v2967_v11  ;;  %v2880_v1 = vld [vmem:[#allocation8 + $0x6e8] sm:$0xff]  ;;  %v2863_v11 = vld [vmem:[#allocation8 + $0x660] sm:$0xff] }
 0x24c   :  { %5438 = vmatpush3.bf16.msra.mxu1 %v5437_v21  ;;  %v2876_v21 = vld [vmem:[#allocation8 + $0x6c8] sm:$0xff]  ;;  %v2931_v34 = vld [vmem:[#allocation8 + $0x880] sm:$0xff]  ;;  %v2934_v42 = vld [vmem:[#allocation8 + $0x898] sm:$0xff] }
 0x24d   :  { %5440 = vmatprep.subr.bf16.mxu1 %v5439_v29  ;;  %v2952_v29 = vld [vmem:[#allocation8 + $0x928] sm:$0xff] }
 0x24e   :  { %5350 = vmatpush3.bf16.msra.mxu0 %v5349_v30  ;;  %v5397_v30 = vpack.c.bf16 %v2858_v19, %v2857_v17  ;;  %v5489_v52 = vpack.c.bf16 %v2952_v29, %v2951_v26  ;;  %v2956_v8 = vld [vmem:[#allocation8 + $0x948] sm:$0xff]  ;;  %v2881_v17 = vld [vmem:[#allocation8 + $0x6f0] sm:$0xff]  ;;  %v2882_v19 = vld [vmem:[#allocation8 + $0x6f8] sm:$0xff] }
 0x24f   :  { %5384 = vmatprep.subr.bf16.mxu0 %v5383_v35  ;;  %v2864_v12 = vld [vmem:[#allocation8 + $0x668] sm:$0xff]  ;;  %v2975_v26 = vld [vmem:[#allocation8 + $0x9e0] sm:$0xff] }
 0x250   :  { %5442 = vmatpush3.bf16.msra.mxu1 %v5441_v24  ;;  %v5399_v24 = vpack.c.bf16 %v2876_v21, %v2875_v20  ;;  %v2957_v20 = vld [vmem:[#allocation8 + $0x950] sm:$0xff]  ;;  %v2958_v21 = vld [vmem:[#allocation8 + $0x958] sm:$0xff]  ;;  %v2976_v29 = vld [vmem:[#allocation8 + $0x9e8] sm:$0xff] }
 0x251   :  { %3411 = vmatmul.mubr.f32.vlgmr.msra.gmra.mrb[28].mxu0 %v6037_v44  ;;  %5444 = vmatprep.subr.bf16.mxu1 %v5443_v38  ;;  %v2950_v44 = vld [vmem:[#allocation8 + $0x918] sm:$0xff]  ;;  %v1355_v38 = vmax.f32 %v6008_v50, 0.0  ;;  %v5401_v50 = vpack.c.bf16 %v2860_v37, %v2859_v56  ;;  %v5501_v33 = vpack.c.bf16 %v2958_v21, %v2957_v20  ;;  %v2977_v56 = vld [vmem:[#allocation8 + $0x9f0] sm:$0xff] }
 0x252   :  { %5386 = vmatpush3.bf16.msra.mxu0 %v5385_v58  ;;  %v5485_v53 = vpack.c.bf16 %v2950_v44, %v2949_v62  ;;  %v2973_v62 = vld [vmem:[#allocation8 + $0x9d0] sm:$0xff]  ;;  %v2974_v44 = vld [vmem:[#allocation8 + $0x9d8] sm:$0xff] }
 0x253   :  { %5388 = vmatprep.subr.bf16.mxu0 %v5387_v2  ;;  %v1356_v2 = vmax.f32 %v6010_v23, 0.0  ;;  %v2978_v37 = vld [vmem:[#allocation8 + $0x9f8] sm:$0xff] }
 0x254   :  { %5446 = vmatpush3.bf16.msra.mxu1 %v5445_v28  ;;  %v2953_v28 = vld [vmem:[#allocation8 + $0x930] sm:$0xff]  ;;  %v5507_v43 = vpack.c.bf16 %v2978_v37, %v2977_v56  ;;  %v2940_v56 = vld [vmem:[#allocation8 + $0x8c8] sm:$0xff] }
 0x255   :  { %5480 = vmatprep.subr.bf16.mxu1 %v5479_v48  ;;  %v5493_v23 = vpack.c.bf16 %v2954_v41, %v2953_v28  ;;  %v3027_v28 = vld [vmem:[#allocation8 + $0xb80] sm:$0xff]  ;;  %v3028_v41 = vld [vmem:[#allocation8 + $0xb88] sm:$0xff] }
 0x256   :  { %5390 = vmatpush3.bf16.msra.mxu0 %v5389_v51 }
 0x257   :  { %3621 = vmatmul.mubr.f32.vlgmr.msra.gmra.mrb[34].mxu1 %v6039_v13  ;;  %5392 = vmatprep.subr.bf16.mxu0 %v5391_v57  ;;  %v1350_v13 = vmax.f32 %v5966_v55, 0.0  ;;  %v2862_v57 = vld [vmem:[#allocation8 + $0x658] sm:$0xff] }
 0x258   :  { %5482 = vmatpush3.bf16.msra.mxu1 %v5481_v3  ;;  %v5495_v3 = vpack.c.bf16 %v2972_v49, %v2971_v31  ;;  %v2918_v31 = vld [vmem:[#allocation8 + $0x818] sm:$0xff] }
 0x259   :  { %5484 = vmatprep.subr.bf16.mxu1 %v5483_v15  ;;  %v5405_v15 = vpack.c.bf16 %v2862_v57, %v2861_v46  ;;  %v5543_v46 = vpack.c.bf16 %v3028_v41, %v3027_v28  ;;  %v3011_v57 = vld [vmem:[#allocation8 + $0xb00] sm:$0xff]  ;;  %v2942_v28 = vld [vmem:[#allocation8 + $0x8d8] sm:$0xff] }
 0x25a   :  { %v2179_v16 = vpop.f32.mrb[20].mxu1  ;;  %5394 = vmatpush3.bf16.msra.mxu0 %v5393_v10  ;;  %v5407_v10 = vpack.c.bf16 %v2880_v1, %v2879_v60  ;;  %v3029_v1 = vld [vmem:[#allocation8 + $0xb90] sm:$0xff] }
 0x25b   :  { %v2621_v35 = vmax.f32 %v2179_v16, 0.0  ;;  %v2392_v18 = vpop.f32.mrb[20].mxu0  ;;  %v2181_v36 = vpop.f32.mrb[21].mxu1  ;;  %5396 = vmatprep.subr.bf16.mxu0 %v5395_v14  ;;  %v5497_v14 = vpack.c.bf16 %v2956_v8, %v2955_v7  ;;  %v2865_v16 = vld [vmem:[#allocation8 + $0x670] sm:$0xff]  ;;  %v2919_v8 = vld [vmem:[#allocation8 + $0x820] sm:$0xff] }
 0x25c   :  { %v2627_v39 = vmax.f32 %v2392_v18, 0.0  ;;  %v2622_v40 = vmax.f32 %v2181_v36, 0.0  ;;  %v2394_v58 = vpop.f32.mrb[21].mxu0  ;;  %5486 = vmatpush3.bf16.msra.mxu1 %v5485_v53  ;;  %v5499_v53 = vpack.c.bf16 %v2974_v44, %v2973_v62  ;;  %v2959_v18 = vld [vmem:[#allocation8 + $0x960] sm:$0xff]  ;;  %v2960_v36 = vld [vmem:[#allocation8 + $0x968] sm:$0xff]  ;;  %v2937_v44 = vld [vmem:[#allocation8 + $0x8b0] sm:$0xff] }
 0x25d   :  { %v6047_v45 = vmax.f32 %v1349_v63, %v2621_v35  ;;  %v2628_v55 = vmax.f32 %v2394_v58, 0.0  ;;  %5488 = vmatprep.subr.bf16.mxu1 %v5487_v22  ;;  %v5409_v22 = vpack.c.bf16 %v2864_v12, %v2863_v11  ;;  %v5411_v63 = vpack.c.bf16 %v2882_v19, %v2881_v17  ;;  %v3014_v17 = vld [vmem:[#allocation8 + $0xb18] sm:$0xff] }
 0x25e   :  { %v6049_v5 = vmax.f32 %v1355_v38, %v2627_v39  ;;  %v2647_v48 = vmax.f32 %v1350_v13, %v2622_v40  ;;  %5398 = vmatpush3.bf16.msra.mxu0 %v5397_v30  ;;  %v2866_v30 = vld [vmem:[#allocation8 + $0x678] sm:$0xff]  ;;  %v2932_v13 = vld [vmem:[#allocation8 + $0x888] sm:$0xff]  ;;  %v5503_v35 = vpack.c.bf16 %v2976_v29, %v2975_v26  ;;  %v2915_v39 = vld [vmem:[#allocation8 + $0x800] sm:$0xff]  ;;  %v5505_v58 = vpack.c.bf16 %v2960_v36, %v2959_v18 }
 0x25f   :  { %v2653_v51 = vmax.f32 %v1356_v2, %v2628_v55  ;;  %5400 = vmatprep.subr.bf16.mxu0 %v5399_v24  ;;  %v5413_v24 = vpack.c.bf16 %v2866_v30, %v2865_v16  ;;  %v5447_v38 = vpack.c.bf16 %v2932_v13, %v2931_v34  ;;  %v2916_v40 = vld [vmem:[#allocation8 + $0x808] sm:$0xff]  ;;  %v2961_v2 = vld [vmem:[#allocation8 + $0x970] sm:$0xff]  ;;  %v2962_v55 = vld [vmem:[#allocation8 + $0x978] sm:$0xff]  ;;  %v1353_v11 = vmax.f32 %v5980_v25, 0.0 }
 0x260   :  { %3550 = vmatprep.mubr.f32.mxu0 %v2647_v48  ;;  %5490 = vmatpush3.bf16.msra.mxu1 %v5489_v52  ;;  %v2933_v52 = vld [vmem:[#allocation8 + $0x890] sm:$0xff]  ;;  %v5509_v49 = vpack.c.bf16 %v2962_v55, %v2961_v2  ;;  %v1354_v19 = vmax.f32 %v5982_v32, 0.0  ;;  %v3031_v26 = vld [vmem:[#allocation8 + $0xba0] sm:$0xff]  ;;  %v3032_v29 = vld [vmem:[#allocation8 + $0xba8] sm:$0xff]  ;;  %v1360_v32 = vmax.f32 %v6018_v4, 0.0 }
 0x261   :  { %3760 = vmatprep.mubr.f32.mxu1 %v2653_v51  ;;  %5492 = vmatprep.subr.bf16.mxu1 %v5491_v47  ;;  %v5449_v47 = vpack.c.bf16 %v2916_v40, %v2915_v39  ;;  %v5451_v48 = vpack.c.bf16 %v2934_v42, %v2933_v52  ;;  %v2935_v51 = vld [vmem:[#allocation8 + $0x8a0] sm:$0xff]  ;;  %v2921_v34 = vld [vmem:[#allocation8 + $0x830] sm:$0xff]  ;;  %v2922_v13 = vld [vmem:[#allocation8 + $0x838] sm:$0xff] }
 0x262   :  { %5402 = vmatpush3.bf16.msra.mxu0 %v5401_v50  ;;  %v2917_v50 = vld [vmem:[#allocation8 + $0x810] sm:$0xff]  ;;  %v3015_v39 = vld [vmem:[#allocation8 + $0xb20] sm:$0xff]  ;;  %v3034_v42 = vld [vmem:[#allocation8 + $0xbb8] sm:$0xff] }
 0x263   :  { %5404 = vmatprep.subr.bf16.mxu0 %v5403_v54  ;;  %v2936_v54 = vld [vmem:[#allocation8 + $0x8a8] sm:$0xff]  ;;  %v5453_v60 = vpack.c.bf16 %v2918_v31, %v2917_v50  ;;  %v3033_v52 = vld [vmem:[#allocation8 + $0xbb0] sm:$0xff]  ;;  %v3018_v50 = vld [vmem:[#allocation8 + $0xb38] sm:$0xff] }
 0x264   :  { %5494 = vmatpush3.bf16.msra.mxu1 %v5493_v23  ;;  %v3012_v23 = vld [vmem:[#allocation8 + $0xb08] sm:$0xff]  ;;  %v5455_v7 = vpack.c.bf16 %v2936_v54, %v2935_v51  ;;  %v5555_v41 = vpack.c.bf16 %v3034_v42, %v3033_v52  ;;  %v3025_v52 = vld [vmem:[#allocation8 + $0xb70] sm:$0xff]  ;;  %v3026_v42 = vld [vmem:[#allocation8 + $0xb78] sm:$0xff] }
 0x265   :  { %5496 = vmatprep.subr.bf16.mxu1 %v5495_v3  ;;  %v3030_v3 = vld [vmem:[#allocation8 + $0xb98] sm:$0xff]  ;;  %v5545_v62 = vpack.c.bf16 %v3012_v23, %v3011_v57  ;;  %v2924_v2 = vld [vmem:[#allocation8 + $0x848] sm:$0xff] }
 0x266   :  { %5406 = vmatpush3.bf16.msra.mxu0 %v5405_v15  ;;  %v2920_v15 = vld [vmem:[#allocation8 + $0x828] sm:$0xff]  ;;  %v2926_v57 = vld [vmem:[#allocation8 + $0x858] sm:$0xff] }
 0x267   :  { %5408 = vmatprep.subr.bf16.mxu0 %v5407_v10  ;;  %v2938_v10 = vld [vmem:[#allocation8 + $0x8b8] sm:$0xff]  ;;  %v3036_v51 = vld [vmem:[#allocation8 + $0xbc8] sm:$0xff] }
 0x268   :  { %5498 = vmatpush3.bf16.msra.mxu1 %v5497_v14  ;;  %v3013_v14 = vld [vmem:[#allocation8 + $0xb10] sm:$0xff]  ;;  %v5459_v25 = vpack.c.bf16 %v2938_v10, %v2937_v44  ;;  %v3038_v44 = vld [vmem:[#allocation8 + $0xbd8] sm:$0xff] }
 0x269   :  { %5500 = vmatprep.subr.bf16.mxu1 %v5499_v53  ;;  %v5549_v36 = vpack.c.bf16 %v3014_v17, %v3013_v14  ;;  %v2945_v14 = vld [vmem:[#allocation8 + $0x8f0] sm:$0xff]  ;;  %v2946_v17 = vld [vmem:[#allocation8 + $0x8f8] sm:$0xff] }
 0x26a   :  { %5410 = vmatpush3.bf16.msra.mxu0 %v5409_v22  ;;  %v5457_v22 = vpack.c.bf16 %v2920_v15, %v2919_v8  ;;  %v3020_v8 = vld [vmem:[#allocation8 + $0xb48] sm:$0xff] }
 0x26b   :  { %5412 = vmatprep.subr.bf16.mxu0 %v5411_v63  ;;  %v1359_v63 = vmax.f32 %v6016_v59, 0.0 }
 0x26c   :  { %5502 = vmatpush3.bf16.msra.mxu1 %v5501_v33 }
 0x26d   :  { %5504 = vmatprep.subr.bf16.mxu1 %v5503_v35 }
 0x26e   :  { %5414 = vmatpush3.bf16.msra.mxu0 %v5413_v24  ;;  %v2939_v24 = vld [vmem:[#allocation8 + $0x8c0] sm:$0xff] }
 0x26f   :  { %5448 = vmatprep.subr.bf16.mxu0 %v5447_v38  ;;  %v5551_v38 = vpack.c.bf16 %v3032_v29, %v3031_v26  ;;  %v5463_v4 = vpack.c.bf16 %v2940_v56, %v2939_v24  ;;  %v3040_v26 = vld [vmem:[#allocation8 + $0xbe8] sm:$0xff]  ;;  %v5475_v29 = vpack.c.bf16 %v2946_v17, %v2945_v14  ;;  %v3042_v24 = vld [vmem:[#allocation8 + $0xbf8] sm:$0xff]  ;;  %v3005_v14 = vld [vmem:[#allocation8 + $0xad0] sm:$0xff] }
 0x270   :  { %5506 = vmatpush3.bf16.msra.mxu1 %v5505_v58  ;;  %v5461_v58 = vpack.c.bf16 %v2922_v13, %v2921_v34  ;;  %v3023_v13 = vld [vmem:[#allocation8 + $0xb60] sm:$0xff]  ;;  %v3006_v17 = vld [vmem:[#allocation8 + $0xad8] sm:$0xff] }
 0x271   :  { %3551 = vmatmul.mubr.f32.vlgmr.msra.gmra.mrb[30].mxu0 %v6047_v45  ;;  %5508 = vmatprep.subr.bf16.mxu1 %v5507_v43  ;;  %v5547_v45 = vpack.c.bf16 %v3030_v3, %v3029_v1  ;;  %v2923_v43 = vld [vmem:[#allocation8 + $0x840] sm:$0xff]  ;;  %v2944_v1 = vld [vmem:[#allocation8 + $0x8e8] sm:$0xff] }
 0x272   :  { %5450 = vmatpush3.bf16.msra.mxu0 %v5449_v47  ;;  %v2941_v47 = vld [vmem:[#allocation8 + $0x8d0] sm:$0xff]  ;;  %v5465_v31 = vpack.c.bf16 %v2924_v2, %v2923_v43 }
 0x273   :  { %5452 = vmatprep.subr.bf16.mxu0 %v5451_v48  ;;  %v3017_v48 = vld [vmem:[#allocation8 + $0xb30] sm:$0xff]  ;;  %v5467_v54 = vpack.c.bf16 %v2942_v28, %v2941_v47  ;;  %v5573_v28 = vpack.c.bf16 %v3026_v42, %v3025_v52  ;;  %v3046_v52 = vld [vmem:[#allocation8 + $0xc18] sm:$0xff] }
 0x274   :  { %5510 = vmatpush3.bf16.msra.mxu1 %v5509_v49  ;;  %v3035_v49 = vld [vmem:[#allocation8 + $0xbc0] sm:$0xff]  ;;  %v5557_v23 = vpack.c.bf16 %v3018_v50, %v3017_v48  ;;  %v2981_v2 = vld [vmem:[#allocation8 + $0xa10] sm:$0xff]  ;;  %v3000_v48 = vld [vmem:[#allocation8 + $0xaa8] sm:$0xff]  ;;  %v1357_v50 = vmax.f32 %v5993_v6, 0.0 }
 0x275   :  { %v2321_v12 = vpop.f32.mrb[22].mxu1  ;;  %5544 = vmatprep.subr.bf16.mxu1 %v5543_v46  ;;  %v2925_v46 = vld [vmem:[#allocation8 + $0x850] sm:$0xff]  ;;  %v5559_v3 = vpack.c.bf16 %v3036_v51, %v3035_v49  ;;  %v1358_v51 = vmax.f32 %v5995_v9, 0.0  ;;  %v3002_v6 = vld [vmem:[#allocation8 + $0xab8] sm:$0xff] }
 0x276   :  { %v2625_v53 = vmax.f32 %v2321_v12, 0.0  ;;  %v2534_v20 = vpop.f32.mrb[22].mxu0  ;;  %v2323_v21 = vpop.f32.mrb[23].mxu1  ;;  %5454 = vmatpush3.bf16.msra.mxu0 %v5453_v60  ;;  %v2943_v60 = vld [vmem:[#allocation8 + $0x8e0] sm:$0xff]  ;;  %v5469_v15 = vpack.c.bf16 %v2926_v57, %v2925_v46  ;;  %v2928_v12 = vld [vmem:[#allocation8 + $0x868] sm:$0xff] }
 0x277   :  { %v2631_v16 = vmax.f32 %v2534_v20, 0.0  ;;  %v2626_v30 = vmax.f32 %v2323_v21, 0.0  ;;  %v2536_v33 = vpop.f32.mrb[23].mxu0  ;;  %3761 = vmatmul.mubr.f32.vlgmr.msra.gmra.mrb[36].mxu1 %v6049_v5  ;;  %5456 = vmatprep.subr.bf16.mxu0 %v5455_v7  ;;  %v3016_v5 = vld [vmem:[#allocation8 + $0xb28] sm:$0xff]  ;;  %v3019_v7 = vld [vmem:[#allocation8 + $0xb40] sm:$0xff]  ;;  %v5471_v10 = vpack.c.bf16 %v2944_v1, %v2943_v60  ;;  %v3022_v20 = vld [vmem:[#allocation8 + $0xb58] sm:$0xff] }
 0x278   :  { %v6057_v35 = vmax.f32 %v1353_v11, %v2625_v53  ;;  %v2632_v18 = vmax.f32 %v2536_v33, 0.0  ;;  %5546 = vmatpush3.bf16.msra.mxu1 %v5545_v62  ;;  %v5553_v55 = vpack.c.bf16 %v3016_v5, %v3015_v39  ;;  %v3037_v62 = vld [vmem:[#allocation8 + $0xbd0] sm:$0xff]  ;;  %v2927_v11 = vld [vmem:[#allocation8 + $0x860] sm:$0xff]  ;;  %v2984_v1 = vld [vmem:[#allocation8 + $0xa28] sm:$0xff] }
 0x279   :  { %v6059_v37 = vmax.f32 %v1359_v63, %v2631_v16  ;;  %v2651_v59 = vmax.f32 %v1354_v19, %v2626_v30  ;;  %5548 = vmatprep.subr.bf16.mxu1 %v5547_v45  ;;  %v5561_v45 = vpack.c.bf16 %v3020_v8, %v3019_v7  ;;  %v5563_v19 = vpack.c.bf16 %v3038_v44, %v3037_v62  ;;  %v3021_v53 = vld [vmem:[#allocation8 + $0xb50] sm:$0xff]  ;;  %v2930_v16 = vld [vmem:[#allocation8 + $0x878] sm:$0xff]  ;;  %v2995_v33 = vld [vmem:[#allocation8 + $0xa80] sm:$0xff] }
 0x27a   :  { %v2657_v40 = vmax.f32 %v1360_v32, %v2632_v18  ;;  %5458 = vmatpush3.bf16.msra.mxu0 %v5457_v22  ;;  %v5473_v21 = vpack.c.bf16 %v2928_v12, %v2927_v11  ;;  %v3039_v22 = vld [vmem:[#allocation8 + $0xbe0] sm:$0xff]  ;;  %v2929_v63 = vld [vmem:[#allocation8 + $0x870] sm:$0xff]  ;;  %v5565_v30 = vpack.c.bf16 %v3022_v20, %v3021_v53  ;;  %v3024_v32 = vld [vmem:[#allocation8 + $0xb68] sm:$0xff]  ;;  %v5531_v53 = vpack.c.bf16 %v3006_v17, %v3005_v14 }
 0x27b   :  { %3690 = vmatprep.mubr.f32.mxu0 %v2651_v59  ;;  %5460 = vmatprep.subr.bf16.mxu0 %v5459_v25  ;;  %v2996_v25 = vld [vmem:[#allocation8 + $0xa88] sm:$0xff]  ;;  %v5567_v34 = vpack.c.bf16 %v3040_v26, %v3039_v22  ;;  %v5477_v18 = vpack.c.bf16 %v2930_v16, %v2929_v63  ;;  %v2979_v59 = vld [vmem:[#allocation8 + $0xa00] sm:$0xff]  ;;  %v5569_v39 = vpack.c.bf16 %v3024_v32, %v3023_v13  ;;  %v2997_v5 = vld [vmem:[#allocation8 + $0xa90] sm:$0xff] }
 0x27c   :  { %3900 = vmatprep.mubr.f32.mxu1 %v2657_v40  ;;  %5550 = vmatpush3.bf16.msra.mxu1 %v5549_v36  ;;  %v3041_v36 = vld [vmem:[#allocation8 + $0xbf0] sm:$0xff]  ;;  %v5511_v56 = vpack.c.bf16 %v2996_v25, %v2995_v33  ;;  %v2998_v40 = vld [vmem:[#allocation8 + $0xa98] sm:$0xff]  ;;  %v2983_v60 = vld [vmem:[#allocation8 + $0xa20] sm:$0xff] }
 0x27d   :  { %5552 = vmatprep.subr.bf16.mxu1 %v5551_v38  ;;  %v2980_v38 = vld [vmem:[#allocation8 + $0xa08] sm:$0xff]  ;;  %v5515_v43 = vpack.c.bf16 %v2998_v40, %v2997_v5  ;;  %v3001_v7 = vld [vmem:[#allocation8 + $0xab0] sm:$0xff]  ;;  %v5521_v8 = vpack.c.bf16 %v2984_v1, %v2983_v60  ;;  %v3003_v62 = vld [vmem:[#allocation8 + $0xac0] sm:$0xff] }
 0x27e   :  { %5462 = vmatpush3.bf16.msra.mxu0 %v5461_v58  ;;  %v5571_v58 = vpack.c.bf16 %v3042_v24, %v3041_v36  ;;  %v5523_v9 = vpack.c.bf16 %v3002_v6, %v3001_v7  ;;  %v3004_v44 = vld [vmem:[#allocation8 + $0xac8] sm:$0xff]  ;;  %v2987_v12 = vld [vmem:[#allocation8 + $0xa40] sm:$0xff]  ;;  %v2989_v20 = vld [vmem:[#allocation8 + $0xa50] sm:$0xff]  ;;  %v1361_v24 = vmax.f32 %v6012_v61, 0.0 }
 0x27f   :  { %5464 = vmatprep.subr.bf16.mxu0 %v5463_v4  ;;  %v5513_v4 = vpack.c.bf16 %v2980_v38, %v2979_v59  ;;  %v5527_v11 = vpack.c.bf16 %v3004_v44, %v3003_v62  ;;  %v3008_v22 = vld [vmem:[#allocation8 + $0xae8] sm:$0xff]  ;;  %v2991_v63 = vld [vmem:[#allocation8 + $0xa60] sm:$0xff]  ;;  %v3010_v33 = vld [vmem:[#allocation8 + $0xaf8] sm:$0xff] }
 0x280   :  { %5554 = vmatpush3.bf16.msra.mxu1 %v5553_v55  ;;  %v2982_v55 = vld [vmem:[#allocation8 + $0xa18] sm:$0xff]  ;;  %v2992_v16 = vld [vmem:[#allocation8 + $0xa68] sm:$0xff]  ;;  %v2993_v13 = vld [vmem:[#allocation8 + $0xa70] sm:$0xff] }
 0x281   :  { %5556 = vmatprep.subr.bf16.mxu1 %v5555_v41  ;;  %v2999_v41 = vld [vmem:[#allocation8 + $0xaa0] sm:$0xff]  ;;  %v5517_v46 = vpack.c.bf16 %v2982_v55, %v2981_v2  ;;  %v5537_v25 = vpack.c.bf16 %v2992_v16, %v2991_v63  ;;  %v2994_v32 = vld [vmem:[#allocation8 + $0xa78] sm:$0xff]  ;;  %v3044_v38 = vld [vmem:[#allocation8 + $0xc08] sm:$0xff] }
 0x282   :  { %5466 = vmatpush3.bf16.msra.mxu0 %v5465_v31  ;;  %v5541_v36 = vpack.c.bf16 %v2994_v32, %v2993_v13  ;;  %v3043_v59 = vld [vmem:[#allocation8 + $0xc00] sm:$0xff]  ;;  %v3049_v2 = vld [vmem:[#allocation8 + $0xc30] sm:$0xff]  ;;  %v3050_v55 = vld [vmem:[#allocation8 + $0xc38] sm:$0xff] }
 0x283   :  { %5468 = vmatprep.subr.bf16.mxu0 %v5467_v54  ;;  %v5576_v40 = vpack.c.bf16 %v3044_v38, %v3043_v59  ;;  %v3047_v61 = vld [vmem:[#allocation8 + $0xc20] sm:$0xff] }
 0x284   :  { %5558 = vmatpush3.bf16.msra.mxu1 %v5557_v23  ;;  %v5519_v23 = vpack.c.bf16 %v3000_v48, %v2999_v41  ;;  %v3052_v41 = vld [vmem:[#allocation8 + $0xc48] sm:$0xff]  ;;  %v4020_v6 = vld [vmem:[#allocation10] ss:$0 sm:$0xff] }
 0x285   :  { %5560 = vmatprep.subr.bf16.mxu1 %v5559_v3 }
 0x286   :  { %5470 = vmatpush3.bf16.msra.mxu0 %v5469_v15  ;;  %v2986_v15 = vld [vmem:[#allocation8 + $0xa38] sm:$0xff] }
 0x287   :  { %5472 = vmatprep.subr.bf16.mxu0 %v5471_v10 }
 0x288   :  { %5562 = vmatpush3.bf16.msra.mxu1 %v5561_v45  ;;  %v2988_v45 = vld [vmem:[#allocation8 + $0xa48] sm:$0xff] }
 0x289   :  { %5564 = vmatprep.subr.bf16.mxu1 %v5563_v19  ;;  %v5529_v19 = vpack.c.bf16 %v2988_v45, %v2987_v12 }
 0x28a   :  { %5474 = vmatpush3.bf16.msra.mxu0 %v5473_v21  ;;  %v3007_v21 = vld [vmem:[#allocation8 + $0xae0] sm:$0xff] }
 0x28b   :  { %5476 = vmatprep.subr.bf16.mxu0 %v5475_v29  ;;  %v5535_v29 = vpack.c.bf16 %v3008_v22, %v3007_v21 }
 0x28c   :  { %5566 = vmatpush3.bf16.msra.mxu1 %v5565_v30  ;;  %v3009_v30 = vld [vmem:[#allocation8 + $0xaf0] sm:$0xff] }
 0x28d   :  { %5568 = vmatprep.subr.bf16.mxu1 %v5567_v34  ;;  %v5539_v34 = vpack.c.bf16 %v3010_v33, %v3009_v30 }
 0x28e   :  { %5478 = vmatpush3.bf16.msra.mxu0 %v5477_v18 }
 0x28f   :  { %5512 = vmatprep.subr.bf16.mxu0 %v5511_v56 }
 0x290   :  { %v2463_v47 = vpop.f32.mrb[24].mxu1  ;;  %5570 = vmatpush3.bf16.msra.mxu1 %v5569_v39 }
 0x291   :  { %v2629_v31 = vmax.f32 %v2463_v47, 0.0  ;;  %v2465_v49 = vpop.f32.mrb[25].mxu1  ;;  %3691 = vmatmul.mubr.f32.vlgmr.msra.gmra.mrb[32].mxu0 %v6057_v35  ;;  %5572 = vmatprep.subr.bf16.mxu1 %v5571_v58  ;;  %v2985_v35 = vld [vmem:[#allocation8 + $0xa30] sm:$0xff]  ;;  %v5585_v47 = vpack.c.bf16 %v3050_v55, %v3049_v2 }
 0x292   :  { %v2630_v54 = vmax.f32 %v2465_v49, 0.0  ;;  %5514 = vmatpush3.bf16.msra.mxu0 %v5513_v4  ;;  %v5525_v10 = vpack.c.bf16 %v2986_v15, %v2985_v35  ;;  %v3045_v58 = vld [vmem:[#allocation8 + $0xc10] sm:$0xff]  ;;  %v3048_v4 = vld [vmem:[#allocation8 + $0xc28] sm:$0xff]  ;;  %v3055_v49 = vld [vmem:[#allocation8 + $0xc60] sm:$0xff] }
 0x293   :  { %v6064_v57 = vmax.f32 %v1357_v50, %v2629_v31  ;;  %5516 = vmatprep.subr.bf16.mxu0 %v5515_v43  ;;  %v5579_v42 = vpack.c.bf16 %v3046_v52, %v3045_v58  ;;  %v5582_v43 = vpack.c.bf16 %v3048_v4, %v3047_v61  ;;  %v3054_v50 = vld [vmem:[#allocation8 + $0xc58] sm:$0xff] }
 0x294   :  { %v2655_v3 = vmax.f32 %v1358_v51, %v2630_v54  ;;  %5574 = vmatpush3.bf16.msra.mxu1 %v5573_v28  ;;  %v3051_v28 = vld [vmem:[#allocation8 + $0xc40] sm:$0xff]  ;;  %v3056_v51 = vld [vmem:[#allocation8 + $0xc68] sm:$0xff] }
 0x295   :  { %v5588_v48 = vpack.c.bf16 %v3052_v41, %v3051_v28  ;;  %v5594_v54 = vpack.c.bf16 %v3056_v51, %v3055_v49 }
 0x296   :  { %3830 = vmatprep.mubr.f32.mxu0 %v2655_v3  ;;  %5518 = vmatpush3.bf16.msra.mxu0 %v5517_v46  ;;  %v3057_v46 = vld [vmem:[#allocation8 + $0xc70] sm:$0xff] }
 0x297   :  { %3901 = vmatmul.mubr.f32.vlgmr.msra.gmra.mrb[38].mxu1 %v6059_v37  ;;  %5520 = vmatprep.subr.bf16.mxu0 %v5519_v23  ;;  %v2990_v37 = vld [vmem:[#allocation8 + $0xa58] sm:$0xff] }
 0x298   :  { %v5533_v26 = vpack.c.bf16 %v2990_v37, %v2989_v20 }
 0x29a   :  { %5522 = vmatpush3.bf16.msra.mxu0 %v5521_v8 }
 0x29b   :  { %5524 = vmatprep.subr.bf16.mxu0 %v5523_v9 }
 0x29e   :  { %5526 = vmatpush3.bf16.msra.mxu0 %v5525_v10 }
 0x29f   :  { %5528 = vmatprep.subr.bf16.mxu0 %v5527_v11 }
 0x2a2   :  { %5530 = vmatpush3.bf16.msra.mxu0 %v5529_v19 }
 0x2a3   :  { %5532 = vmatprep.subr.bf16.mxu0 %v5531_v53 }
 0x2a6   :  { %5534 = vmatpush3.bf16.msra.mxu0 %v5533_v26 }
 0x2a7   :  { %5536 = vmatprep.subr.bf16.mxu0 %v5535_v29 }
 0x2aa   :  { %v2605_v18 = vpop.f32.mrb[26].mxu1  ;;  %5538 = vmatpush3.bf16.msra.mxu0 %v5537_v25 }
 0x2ab   :  { %v2633_v56 = vmax.f32 %v2605_v18, 0.0  ;;  %5540 = vmatprep.subr.bf16.mxu0 %v5539_v34  ;;  %v4543_v39 = vpop.f32.mrb[27].mxu1 }
 0x2ad   :  { %v2658_v5 = vmax.f32 %v1361_v24, %v2633_v56 }
 0x2ae   :  { %5542 = vmatpush3.bf16.msra.mxu0 %v5541_v36 }
 0x2af   :  { %5575 = vmatprep.subr.bf16.mxu0 %v5764_v27 }
 0x2b1   :  { %3831 = vmatmul.mubr.f32.vlgmr.msra.gmra.mrb[34].mxu0 %v6064_v57  ;;  %v3058_v57 = vld [vmem:[#allocation8 + $0xc78] sm:$0xff] }
 0x2b2   :  { %5577 = vmatpush3.bf16.msra.mxu0 %v5576_v40  ;;  %4576 = vmatprep.mubr.msk.f32.mxu0 %vm5765_vm1, %v5763_v0  ;;  %v3053_v0 = vld [vmem:[#allocation8 + $0xc50] sm:$0xff]  ;;  %v5597_v60 = vpack.c.bf16 %v3058_v57, %v3057_v46 }
 0x2b3   :  { %5578 = vmatprep.subr.bf16.mxu0 %v5764_v27  ;;  %v5591_v31 = vpack.c.bf16 %v3054_v50, %v3053_v0 }
 0x2b6   :  { %5580 = vmatpush3.bf16.msra.mxu0 %v5579_v42 }
 0x2b7   :  { %5581 = vmatprep.subr.bf16.mxu0 %v5764_v27 }
 0x2ba   :  { %5583 = vmatpush3.bf16.msra.mxu0 %v5582_v43 }
 0x2bb   :  { %5584 = vmatprep.subr.bf16.mxu0 %v5764_v27 }
 0x2be   :  { %5586 = vmatpush3.bf16.msra.mxu0 %v5585_v47 }
 0x2bf   :  { %5587 = vmatprep.subr.bf16.mxu0 %v5764_v27 }
 0x2c2   :  { %5589 = vmatpush3.bf16.msra.mxu0 %v5588_v48 }
 0x2c3   :  { %5590 = vmatprep.subr.bf16.mxu0 %v5764_v27 }
 0x2c6   :  { %5592 = vmatpush3.bf16.msra.mxu0 %v5591_v31 }
 0x2c7   :  { %5593 = vmatprep.subr.bf16.mxu0 %v5764_v27 }
 0x2ca   :  { %5595 = vmatpush3.bf16.msra.mxu0 %v5594_v54  ;;  %v4116_v23 = vpop.f32.mrb[28].mxu1 }
 0x2cb   :  { %v4117_v1 = vpop.f32.mrb[29].mxu1  ;;  %5596 = vmatprep.subr.bf16.mxu0 %v5764_v27 }
 0x2cc   :  { %v4118_v3 = vadd.f32 %v4117_v1, %v4116_v23 }
 0x2ce   :  { %5598 = vmatpush3.bf16.msra.mxu0 %v5597_v60 }
 0x2d1   :  { %4577 = vmatmul.mubr.f32.vlgmr.msra.gmra.mrb[36].mxu0 %v2658_v5 }
 0x2e4   :  { %v4081_v7 = vpop.f32.mrb[24].mxu0 }
 0x2e5   :  { %v4082_v8 = vpop.f32.mrb[25].mxu0 }
 0x2e6   :  { %v4083_v9 = vadd.f32 %v4082_v8, %v4081_v7 }
 0x2e8   :  { %v3133_v35 = vadd.f32 %v4083_v9, %v4020_v6 }
 0x2ea   :  { %v4186_v15 = vpop.f32.mrb[30].mxu1  ;;  %v3203_v62 = vadd.f32 %v4118_v3, %v3133_v35 }
 0x2eb   :  { %v4187_v44 = vpop.f32.mrb[31].mxu1 }
 0x2ec   :  { %v4188_v10 = vadd.f32 %v4187_v44, %v4186_v15 }
 0x304   :  { %v4151_v11 = vpop.f32.mrb[26].mxu0 }
 0x305   :  { %v4152_v12 = vpop.f32.mrb[27].mxu0 }
 0x306   :  { %v4153_v45 = vadd.f32 %v4152_v12, %v4151_v11 }
 0x308   :  { %v3273_v14 = vadd.f32 %v4153_v45, %v3203_v62 }
 0x30a   :  { %v4256_v17 = vpop.f32.mrb[32].mxu1  ;;  %v3343_v19 = vadd.f32 %v4188_v10, %v3273_v14 }
 0x30b   :  { %v4257_v53 = vpop.f32.mrb[33].mxu1 }
 0x30c   :  { %v4258_v27 = vadd.f32 %v4257_v53, %v4256_v17 }
 0x324   :  { %v4221_v20 = vpop.f32.mrb[28].mxu0 }
 0x325   :  { %v4222_v37 = vpop.f32.mrb[29].mxu0 }
 0x326   :  { %v4223_v21 = vadd.f32 %v4222_v37, %v4221_v20 }
 0x328   :  { %v3413_v22 = vadd.f32 %v4223_v21, %v3343_v19 }
 0x32a   :  { %v4326_v26 = vpop.f32.mrb[34].mxu1  ;;  %v3483_v29 = vadd.f32 %v4258_v27, %v3413_v22 }
 0x32b   :  { %v4327_v63 = vpop.f32.mrb[35].mxu1 }
 0x32c   :  { %v4328_v16 = vadd.f32 %v4327_v63, %v4326_v26 }
 0x344   :  { %v4291_v30 = vpop.f32.mrb[30].mxu0 }
 0x345   :  { %v4292_v33 = vpop.f32.mrb[31].mxu0 }
 0x346   :  { %v4293_v25 = vadd.f32 %v4292_v33, %v4291_v30 }
 0x348   :  { %v3553_v34 = vadd.f32 %v4293_v25, %v3483_v29 }
 0x34a   :  { %v4396_v13 = vpop.f32.mrb[36].mxu1  ;;  %v3623_v32 = vadd.f32 %v4328_v16, %v3553_v34 }
 0x34b   :  { %v4397_v18 = vpop.f32.mrb[37].mxu1 }
 0x34c   :  { %v4398_v36 = vadd.f32 %v4397_v18, %v4396_v13 }
 0x364   :  { %v4361_v24 = vpop.f32.mrb[32].mxu0 }
 0x365   :  { %v4362_v56 = vpop.f32.mrb[33].mxu0 }
 0x366   :  { %v4363_v59 = vadd.f32 %v4362_v56, %v4361_v24 }
 0x368   :  { %v3693_v38 = vadd.f32 %v4363_v59, %v3623_v32 }
 0x36a   :  { %v4466_v39 = vpop.f32.mrb[38].mxu1  ;;  %v3763_v5 = vadd.f32 %v4398_v36, %v3693_v38 }
 0x36b   :  { %v4467_v40 = vpop.f32.mrb[39].mxu1 }
 0x36c   :  { %v4468_v58 = vadd.f32 %v4467_v40, %v4466_v39 }
 0x384   :  { %v4431_v52 = vpop.f32.mrb[34].mxu0 }
 0x385   :  { %v4432_v42 = vpop.f32.mrb[35].mxu0 }
 0x386   :  { %v4433_v61 = vadd.f32 %v4432_v42, %v4431_v52 }
 0x388   :  { %v3833_v4 = vadd.f32 %v4433_v61, %v3763_v5 }
 0x38a   :  { %v3903_v43 = vadd.f32 %v4468_v58, %v3833_v4 }
 0x3a4   :  { %v3972_v2 = vpop.f32.mrb[36].mxu0 }
 0x3a5   :  { %v3973_v55 = vadd.f32 %v3972_v2, %v3903_v43  ;;  %v4578_v47 = vpop.f32.mrb[37].mxu0 }
 0x3a7   :  { %3976 = vst [vmem:[#allocation11] sm:$0xff] %v3973_v55 }
 0x3a8   :  { %5735 = shalt.err (!%p5732_p2)
}
 0x3a9   :  { %s5736_s8 = scalar_lea.hbm %s6096_s5, 128 }
 0x3aa   :  { %p5737_p3 = scmp.ne.s32.totalorder %s6096_s5, %s5736_s8  ;;  %p5740_p4 = scmp.lt.u32.totalorder %s5736_s8, %s6096_s5 }
 0x3ac   :  { %p5742_p5 = pnand %p5740_p4, %p5737_p3 }
 0x3ae   :  { %5745 = shalt.err (!%p5742_p5)
}
 0x3af   :  { %3986 = dma.vmem_to_hbm [thread:$0]  %s3984_s23, 128, %s6096_s5, [#allocation4]  }
 0x3b0   :  { %5752 = dma.done.wait [#allocation4], 128  }
 0x3b1   :  { %5753 = vsyncadd [#allocation4], 4294967168 }
 0x3b2   :  { %3990 = vsyncpa [#allocation3], 1 }
 0x3b3   :  { %3991 = vsyncpa [#allocation6], 1 }
 0x3b4   :  { %3992 = vsyncpa [#allocation9], 1 }
 0x3b5   :  { %3993 = vsyncpa [#allocation4], 1 }

</bundles_post_ra>
